<compile_context>
chip_gen: v7x
topology: tpu7x:2x2x1
jax: 0.10.0
libtpu: 0.0.40
codegen_flags: <defaults>
</compile_context>

<pallas_src>
import functools

import jax
import jax.numpy as jnp
from jax import lax
from jax.experimental import pallas as pl
from jax.experimental.pallas import tpu as pltpu


# ----------------------------------------------------------------------------
# VMEM / tiling helpers (layout-padding and generation aware)
# ----------------------------------------------------------------------------
def _padded_bytes(shape, dtype):
    """Bytes an array of `shape`/`dtype` really occupies in VMEM: last dim
    rounded up to 128 lanes, second-to-last to the dtype's sublane packing
    (8 for 4B, 16 for 2B, 32 for 1B)."""
    itemsize = jnp.dtype(dtype).itemsize
    dims = [int(d) for d in shape]
    if not dims:
        return itemsize
    dims[-1] = -(-dims[-1] // 128) * 128
    if len(dims) >= 2:
        sub = {4: 8, 2: 16, 1: 32}.get(itemsize, 8)
        dims[-2] = -(-dims[-2] // sub) * sub
    size = 1
    for d in dims:
        size *= d
    return size * itemsize


def _tpu_vmem_capacity():
    cap = 128 << 20                              # v5e / v6e physical
    try:
        info = pltpu.get_tpu_info()
        cap = int(getattr(info, "vmem_capacity_bytes", cap) or cap)
    except Exception:
        pass
    return cap


def _scoped_vmem_budget():
    # ~70% of physical VMEM: ~90 MiB on v5e/v6e (128 MiB), ~45 MiB on v7x.
    return int(_tpu_vmem_capacity() * 0.7)


def _likely_two_core():
    # v7x has 64 MiB VMEM/TC and 2 TCs/chip; v5e/v6e have 128 MiB and 1 TC.
    return _tpu_vmem_capacity() <= (96 << 20)


def _choose_tile(n, cost_fn, budget, prefer_multi):
    """Largest legal tile (multiple of 8 dividing n, or n itself) whose
    padded-VMEM cost fits `budget`; optionally prefer >= 2 grid steps so a
    2-TensorCore chip can shard the parallel axis."""
    cands = sorted({c for c in range(8, n, 8) if n % c == 0} | {n}, reverse=True)
    fitting = [c for c in cands if cost_fn(c) <= budget]
    if not fitting:
        # nothing fits the target budget; take the smallest legal tile and let
        # the caller raise vmem_limit_bytes to cover it.
        return cands[-1]
    if prefer_multi:
        multi = [c for c in fitting if n // c >= 2]
        if multi:
            return multi[0]
    return fitting[0]


def _divisor_at_most(n, cap):
    for c in range(min(cap, n), 0, -1):
        if n % c == 0:
            return c
    return n


def _vmem_limit(budget, needed):
    cap = _tpu_vmem_capacity()
    return int(min(max(budget, needed + (4 << 20)), cap - (2 << 20)))


# ----------------------------------------------------------------------------
# Kernel A: GRU temporal encoder + mean pool over time
#   grid = (BN tiles ["parallel"], T blocks ["arbitrary"])
#   x:    (T_blk, tile, Din) f32    wih: (3, Din, H) bf16   whh: (3, H, H) bf16
#   bih/bhh: (3, 1, H) f32          out: (tile, H) f32 (mean_t h_t, resident)
#   scratch: 3x (T_blk, tile, H) bf16 hoisted gates, (tile, H) f32 h carry
# ----------------------------------------------------------------------------
def gru_mean_pool_kernel(x_ref, wih_ref, whh_ref, bih_ref, bhh_ref, o_ref,
                         gr_ref, gz_ref, gn_ref, h_ref,
                         *, t_total, fuse_gates, unroll):
    t_idx = pl.program_id(1)
    t_blk, tile, din = x_ref.shape
    H = o_ref.shape[-1]

    @pl.when(t_idx == 0)
    def _():
        h_ref[...] = jnp.zeros_like(h_ref)
        o_ref[...] = jnp.zeros_like(o_ref)      # output block doubles as mean acc

    # ---- phase 1: hoisted input projection, ONE flattened matmul per gate
    #      (M = T_blk*tile fills the MXU; no per-timestep launches).
    x_flat = x_ref[...].reshape(t_blk * tile, din).astype(jnp.bfloat16)
    for g, g_ref in enumerate((gr_ref, gz_ref, gn_ref)):
        gi = jnp.dot(x_flat, wih_ref[g], preferred_element_type=jnp.float32)
        gi = gi + bih_ref[g]                    # bias in f32
        g_ref[...] = gi.reshape(t_blk, tile, H).astype(jnp.bfloat16)

    # ---- phase 2: serial recurrence (only the HxH matmuls + gate math).
    if fuse_gates:
        # single (tile,H)@(H,3H) matmul per step; slices are lane-aligned
        # because H % 128 == 0 on this path.
        w_h = jnp.concatenate([whh_ref[0], whh_ref[1], whh_ref[2]], axis=-1)
    else:
        w_hr, w_hz, w_hn = whh_ref[0], whh_ref[1], whh_ref[2]
    b_hr, b_hz, b_hn = bhh_ref[0], bhh_ref[1], bhh_ref[2]

    def step(t, carry):
        h, acc = carry                           # h, acc stay f32
        hb = h.astype(jnp.bfloat16)
        if fuse_gates:
            gh = jnp.dot(hb, w_h, preferred_element_type=jnp.float32)
            gh_r = gh[:, :H] + b_hr
            gh_z = gh[:, H:2 * H] + b_hz
            gh_n = gh[:, 2 * H:] + b_hn
        else:
            gh_r = jnp.dot(hb, w_hr, preferred_element_type=jnp.float32) + b_hr
            gh_z = jnp.dot(hb, w_hz, preferred_element_type=jnp.float32) + b_hz
            gh_n = jnp.dot(hb, w_hn, preferred_element_type=jnp.float32) + b_hn
        r = jax.nn.sigmoid(gr_ref[t].astype(jnp.float32) + gh_r)
        z = jax.nn.sigmoid(gz_ref[t].astype(jnp.float32) + gh_z)
        n = jnp.tanh(gn_ref[t].astype(jnp.float32) + r * gh_n)
        h_new = (1.0 - z) * n + z * h
        return h_new, acc + h_new

    h_fin, acc_fin = lax.fori_loop(0, t_blk, step, (h_ref[...], o_ref[...]),
                                   unroll=unroll)
    h_ref[...] = h_fin
    o_ref[...] = acc_fin

    @pl.when(t_idx == pl.num_programs(1) - 1)
    def _():
        o_ref[...] = o_ref[...] * (1.0 / t_total)   # temporal_pool='mean'


def gru_mean_pool(x_tm, wih_bf, whh_bf, bih, bhh):
    T, BN, Din = x_tm.shape
    H = whh_bf.shape[-1]
    budget = _scoped_vmem_budget()

    # stream T in blocks so scratch is bounded even for long sequences (v7x)
    t_blk = _divisor_at_most(T, 64)

    fixed = (2 * _padded_bytes((3, Din, H), jnp.bfloat16)
             + 2 * _padded_bytes((3, H, H), jnp.bfloat16)
             + 4 * _padded_bytes((3, 1, H), jnp.float32))

    def cost(tile):
        return (fixed
                + 2 * _padded_bytes((t_blk, tile, Din), jnp.float32)   # x (dbl buf)
                + 3 * _padded_bytes((t_blk, tile, H), jnp.bfloat16)    # gate scratch
                + 3 * _padded_bytes((tile, H), jnp.float32))           # h + out (dbl)

    tile = _choose_tile(BN, cost, int(budget * 0.8),
                        prefer_multi=_likely_two_core())
    vmem = _vmem_limit(budget, cost(tile))

    fuse_gates = (H % 128 == 0)                 # fused N=3H recurrence matmul
    unroll = True if t_blk <= 16 else 4         # partial unroll for long blocks

    kernel = functools.partial(gru_mean_pool_kernel, t_total=T,
                               fuse_gates=fuse_gates, unroll=unroll)
    return pl.pallas_call(
        kernel,
        out_shape=jax.ShapeDtypeStruct((BN, H), jnp.float32),
        grid=(BN // tile, T // t_blk),
        in_specs=[
            pl.BlockSpec((t_blk, tile, Din), lambda i, t: (t, i, 0)),
            pl.BlockSpec((3, Din, H), lambda i, t: (0, 0, 0)),
            pl.BlockSpec((3, H, H), lambda i, t: (0, 0, 0)),
            pl.BlockSpec((3, 1, H), lambda i, t: (0, 0, 0)),
            pl.BlockSpec((3, 1, H), lambda i, t: (0, 0, 0)),
        ],
        out_specs=pl.BlockSpec((tile, H), lambda i, t: (i, 0)),
        scratch_shapes=[pltpu.VMEM((t_blk, tile, H), jnp.bfloat16)
                        for _ in range(3)]
                       + [pltpu.VMEM((tile, H), jnp.float32)],
        compiler_params=pltpu.CompilerParams(
            dimension_semantics=("parallel", "arbitrary"),
            vmem_limit_bytes=vmem),
    )(x_tm, wih_bf, whh_bf, bih, bhh)


# ----------------------------------------------------------------------------
# Kernel B: per-graph cosine-similarity matrix (hot matmul of graph building)
#   z: (B, N, F) f32  ->  S: (B, N, N) f32      (several graphs per grid step)
# ----------------------------------------------------------------------------
def cosine_sim_kernel(z_ref, s_ref):
    z = z_ref[...]                                               # (bt, N, F) f32
    inv = lax.rsqrt(jnp.sum(z * z, axis=-1, keepdims=True) + 1e-12)
    zn = (z * inv).astype(jnp.bfloat16)                          # bf16 MXU operands
    # contract the last axes directly: no materialized transpose of zn.
    s_ref[...] = lax.dot_general(
        zn, zn, dimension_numbers=(((2,), (2,)), ((0,), (0,))),
        preferred_element_type=jnp.float32)


def cosine_similarity(z):
    B, N, F = z.shape
    budget = _scoped_vmem_budget()

    def cost(bt):
        return (2 * _padded_bytes((bt, N, F), jnp.float32)
                + 2 * _padded_bytes((bt, N, N), jnp.float32))

    bt = _choose_tile(B, cost, int(budget * 0.8),
                      prefer_multi=_likely_two_core())
    vmem = _vmem_limit(budget, cost(bt))
    return pl.pallas_call(
        cosine_sim_kernel,
        out_shape=jax.ShapeDtypeStruct((B, N, N), jnp.float32),
        grid=(B // bt,),
        in_specs=[pl.BlockSpec((bt, N, F), lambda b: (b, 0, 0))],
        out_specs=pl.BlockSpec((bt, N, N), lambda b: (b, 0, 0)),
        compiler_params=pltpu.CompilerParams(
            dimension_semantics=("parallel",), vmem_limit_bytes=vmem),
    )(z)


# ----------------------------------------------------------------------------
# Kernel C: GCN layers + graph sum-pool + linear classifier (bt graphs / step)
#   adj: (bt, N, N) f32 with self-loops (weight 1);  x: (bt, N, H) f32
#   weights pre-cast to bf16 on host;  out: (bt, C) f32
# ----------------------------------------------------------------------------
def gnn_head_kernel(adj_ref, x_ref, w1_ref, b1_ref, w2_ref, b2_ref,
                    wc_ref, bc_ref, o_ref):
    adj = adj_ref[...]
    # symmetric normalization; adj is symmetric so the column factor is the
    # rsqrt of the sum over axis=-2 -- no lane<->sublane transpose needed.
    dinv_r = lax.rsqrt(jnp.maximum(jnp.sum(adj, axis=-1, keepdims=True), 1e-12))
    dinv_c = lax.rsqrt(jnp.maximum(jnp.sum(adj, axis=-2, keepdims=True), 1e-12))
    adj_n = (adj * dinv_r * dinv_c).astype(jnp.bfloat16)

    bt, N, H = x_ref.shape
    h = x_ref[...]                                               # (bt, N, H) f32
    for w_ref, b_ref in ((w1_ref, b1_ref), (w2_ref, b2_ref)):
        # flattened (bt*N, H) @ (H, H) feature transform -> full MXU M dim
        hw = jnp.dot(h.reshape(bt * N, H).astype(jnp.bfloat16), w_ref[...],
                     preferred_element_type=jnp.float32).reshape(bt, N, H)
        h = lax.dot_general(adj_n, hw.astype(jnp.bfloat16),
                            dimension_numbers=(((2,), (1,)), ((0,), (0,))),
                            preferred_element_type=jnp.float32) + b_ref[...]
        h = jnp.maximum(h, 0.0)                  # ReLU; dropout = identity (eval)

    pooled = jnp.sum(h, axis=1)                  # graph_pool='sum' -> (bt, H)
    o_ref[...] = jnp.dot(pooled.astype(jnp.bfloat16), wc_ref[...],
                         preferred_element_type=jnp.float32) + bc_ref[...]


def gnn_head(adj, x_nodes, w1_bf, b1, w2_bf, b2, wc_bf, bc):
    B, N, H = x_nodes.shape
    C = wc_bf.shape[1]
    budget = _scoped_vmem_budget()

    fixed = (4 * _padded_bytes((H, H), jnp.bfloat16)
             + 4 * _padded_bytes((1, H), jnp.float32)
             + 2 * _padded_bytes((H, C), jnp.bfloat16)
             + 2 * _padded_bytes((1, C), jnp.float32))

    def cost(bt):
        return (fixed
                + 2 * _padded_bytes((bt, N, N), jnp.float32)
                + 2 * _padded_bytes((bt, N, H), jnp.float32)
                + 2 * _padded_bytes((bt, C), jnp.float32))

    bt = _choose_tile(B, cost, int(budget * 0.8),
                      prefer_multi=_likely_two_core())
    vmem = _vmem_limit(budget, cost(bt))
    return pl.pallas_call(
        gnn_head_kernel,
        out_shape=jax.ShapeDtypeStruct((B, C), jnp.float32),
        grid=(B // bt,),
        in_specs=[
            pl.BlockSpec((bt, N, N), lambda b: (b, 0, 0)),
            pl.BlockSpec((bt, N, H), lambda b: (b, 0, 0)),
            pl.BlockSpec((H, H), lambda b: (0, 0)),
            pl.BlockSpec((1, H), lambda b: (0, 0)),
            pl.BlockSpec((H, H), lambda b: (0, 0)),
            pl.BlockSpec((1, H), lambda b: (0, 0)),
            pl.BlockSpec((H, C), lambda b: (0, 0)),
            pl.BlockSpec((1, C), lambda b: (0, 0)),
        ],
        out_specs=pl.BlockSpec((bt, C), lambda b: (b, 0)),
        compiler_params=pltpu.CompilerParams(
            dimension_semantics=("parallel",), vmem_limit_bytes=vmem),
    )(adj, x_nodes, w1_bf, b1, w2_bf, b2, wc_bf, bc)


# ----------------------------------------------------------------------------
# Glue: KNN graph construction (top-K selection is irregular -> plain JAX)
# ----------------------------------------------------------------------------
def build_knn_adj(sim, K):
    B, N, _ = sim.shape
    eye = jnp.eye(N, dtype=bool)[None]
    sim_noself = jnp.where(eye, -jnp.inf, sim)
    k = min(K, N - 1)
    kth = lax.top_k(sim_noself, k)[0][..., -1:]                  # (B, N, 1)
    # TODO(synk): `>= kth` keeps >K neighbors on exact ties; torch.topk keeps K.
    mask = sim_noself >= kth
    adj = jnp.where(mask, sim, 0.0)
    adj = jnp.maximum(adj, jnp.swapaxes(adj, -1, -2))            # undirected
    adj = jnp.where(eye, 1.0, adj)                               # remove+add self loops (fill=1)
    return adj


# ----------------------------------------------------------------------------
# Full forward
# ----------------------------------------------------------------------------
def s4gnn_forward(x, params, *, num_nodes, K):
    BN, T, Din = x.shape
    B = BN // num_nodes
    bf = jnp.bfloat16

    # graph construction from the raw sequences: z = x.reshape(B, N, -1)
    z = x.reshape(B, num_nodes, T * Din)
    sim = cosine_similarity(z)
    adj = build_knn_adj(sim, K)

    # temporal model + mean pool over time.
    # NOTE: one XLA transpose of the raw (narrow, Din-wide) tensor is retained
    # so the kernel gets time-major blocks; all 3H projections stay in-kernel.
    x_tm = jnp.transpose(x, (1, 0, 2))                           # (T, BN, Din)
    h = gru_mean_pool(x_tm,
                      params['wih'].astype(bf), params['whh'].astype(bf),
                      params['bih'], params['bhh'])              # (BN, H)

    # GNN layers + graph pool + classifier
    h_nodes = h.reshape(B, num_nodes, h.shape[-1])
    out = gnn_head(adj, h_nodes,
                   params['w1'].astype(bf), params['b1'],
                   params['w2'].astype(bf), params['b2'],
                   params['wc'].astype(bf), params['bc'])        # (B, C)
    return out


def init_params(key, input_dim, hidden_dim, num_classes):
    ks = jax.random.split(key, 10)
    s = 0.1
    H, D, C = hidden_dim, input_dim, num_classes
    return {
        # GRU, gate-major (r, z, n): no unaligned 3H lane slices in-kernel
        'wih': s * jax.random.normal(ks[0], (3, D, H), jnp.float32),
        'whh': s * jax.random.normal(ks[1], (3, H, H), jnp.float32),
        'bih': s * jax.random.normal(ks[2], (3, 1, H), jnp.float32),
        'bhh': s * jax.random.normal(ks[3], (3, 1, H), jnp.float32),
        # two GCN layers
        'w1': s * jax.random.normal(ks[4], (H, H), jnp.float32),
        'b1': s * jax.random.normal(ks[5], (1, H), jnp.float32),
        'w2': s * jax.random.normal(ks[6], (H, H), jnp.float32),
        'b2': s * jax.random.normal(ks[7], (1, H), jnp.float32),
        # classifier
        'wc': s * jax.random.normal(ks[8], (H, C), jnp.float32),
        'bc': s * jax.random.normal(ks[9], (1, C), jnp.float32),
    }


if __name__ == "__main__":
    B, N, T, Din, H, C, K = 2, 4, 8, 4, 32, 1, 3

    key = jax.random.PRNGKey(0)
    kx, kp = jax.random.split(key)
    x = jax.random.normal(kx, (B * N, T, Din), jnp.float32)      # data.x
    params = init_params(kp, Din, H, C)

    fwd = jax.jit(functools.partial(s4gnn_forward, num_nodes=N, K=K))
    out = fwd(x, params)
    jax.block_until_ready(out)

    assert out.shape == (B, C), out.shape
    assert jnp.all(jnp.isfinite(out))
    print("KERNEL_OK")
</pallas_src>

<mosaic_0001>
module attributes {stable_mosaic.version = 11 : i64} {
  func.func @cosine_sim_kernel(%arg0: i32, %arg1: memref<2x4x32xf32, #tpu.memory_space<vmem>>, %arg2: memref<2x4x4xf32, #tpu.memory_space<vmem>>) attributes {dimension_semantics = [#tpu.dimension_semantics<parallel>], iteration_bounds = array<i64: 1>, scalar_prefetch = 0 : i64, scratch_operands = 0 : i64, tpu.core_type = #tpu.core_type<tc>, window_params = [{transform_indices = @transform_0, window_bounds = array<i64: 2, 4, 32>}, {transform_indices = @transform_1, window_bounds = array<i64: 2, 4, 4>}]} {
    %c0 = arith.constant 0 : index
    %c0_0 = arith.constant 0 : index
    %c0_1 = arith.constant 0 : index
    %0 = vector.load %arg1[%c0, %c0_0, %c0_1] : memref<2x4x32xf32, #tpu.memory_space<vmem>>, vector<2x4x32xf32>
    %1 = arith.mulf %0, %0 : vector<2x4x32xf32>
    %cst = arith.constant dense<0.000000e+00> : vector<2x4xf32>
    %2 = vector.multi_reduction <add>, %1, %cst [2] : vector<2x4x32xf32> to vector<2x4xf32>
    %3 = vector.shape_cast %2 : vector<2x4xf32> to vector<2x4x1xf32>
    %cst_2 = arith.constant 9.99999996E-13 : f32
    %4 = vector.broadcast %cst_2 : f32 to vector<2x4x1xf32>
    %5 = arith.addf %3, %4 : vector<2x4x1xf32>
    %6 = math.rsqrt %5 : vector<2x4x1xf32>
    %7 = vector.broadcast %6 : vector<2x4x1xf32> to vector<2x4x32xf32>
    %8 = arith.mulf %0, %7 : vector<2x4x32xf32>
    %9 = arith.truncf %8 : vector<2x4x32xf32> to vector<2x4x32xbf16>
    %cst_3 = arith.constant dense<0.000000e+00> : vector<2x4x4xf32>
    %10 = tpu.matmul %9, %9, %cst_3 {dimension_numbers = #tpu.dot_dimension_numbers<[2], [2], [1], [1], [0, 0, 0, 1, 1, 1], [0], [0]>} : vector<2x4x32xbf16>, vector<2x4x32xbf16>, vector<2x4x4xf32> -> vector<2x4x4xf32>
    %c0_4 = arith.constant 0 : index
    %c0_5 = arith.constant 0 : index
    %c0_6 = arith.constant 0 : index
    %11 = vector.load %arg2[%c0_4, %c0_5, %c0_6] : memref<2x4x4xf32, #tpu.memory_space<vmem>>, vector<2x4x4xf32>
    tpu.vector_store %arg2[%c0_4, %c0_5, %c0_6], %10 {strides = array<i32>} : memref<2x4x4xf32, #tpu.memory_space<vmem>>, vector<2x4x4xf32>,
    return
  }
  func.func @transform_0(%arg0: i32) -> (i32, i32, i32) {
    %c0_i32 = arith.constant 0 : i32
    %c0_i32_0 = arith.constant 0 : i32
    %c0_i32_1 = arith.constant 0 : i32
    return %arg0, %c0_i32, %c0_i32_0 : i32, i32, i32
  }
  func.func @transform_1(%arg0: i32) -> (i32, i32, i32) {
    %c0_i32 = arith.constant 0 : i32
    %c0_i32_0 = arith.constant 0 : i32
    %c0_i32_1 = arith.constant 0 : i32
    return %arg0, %c0_i32, %c0_i32_0 : i32, i32, i32
  }
}

module attributes {stable_mosaic.version = 11 : i64} {
  func.func @gnn_head_kernel(%arg0: i32, %arg1: memref<2x4x4xf32, #tpu.memory_space<vmem>>, %arg2: memref<2x4x32xf32, #tpu.memory_space<vmem>>, %arg3: memref<32x32xbf16, #tpu.memory_space<vmem>>, %arg4: memref<1x32xf32, #tpu.memory_space<vmem>>, %arg5: memref<32x32xbf16, #tpu.memory_space<vmem>>, %arg6: memref<1x32xf32, #tpu.memory_space<vmem>>, %arg7: memref<32x1xbf16, #tpu.memory_space<vmem>>, %arg8: memref<1x1xf32, #tpu.memory_space<vmem>>, %arg9: memref<2x1xf32, #tpu.memory_space<vmem>>) attributes {dimension_semantics = [#tpu.dimension_semantics<parallel>], iteration_bounds = array<i64: 1>, scalar_prefetch = 0 : i64, scratch_operands = 0 : i64, tpu.core_type = #tpu.core_type<tc>, window_params = [{transform_indices = @transform_0, window_bounds = array<i64: 2, 4, 4>}, {transform_indices = @transform_1, window_bounds = array<i64: 2, 4, 32>}, {pipeline_mode = #tpu.pipeline_mode<synchronous>, transform_indices = @transform_2, window_bounds = array<i64: 32, 32>}, {pipeline_mode = #tpu.pipeline_mode<synchronous>, transform_indices = @transform_3, window_bounds = array<i64: 1, 32>}, {pipeline_mode = #tpu.pipeline_mode<synchronous>, transform_indices = @transform_4, window_bounds = array<i64: 32, 32>}, {pipeline_mode = #tpu.pipeline_mode<synchronous>, transform_indices = @transform_5, window_bounds = array<i64: 1, 32>}, {pipeline_mode = #tpu.pipeline_mode<synchronous>, transform_indices = @transform_6, window_bounds = array<i64: 32, 1>}, {pipeline_mode = #tpu.pipeline_mode<synchronous>, transform_indices = @transform_7, window_bounds = array<i64: 1, 1>}, {transform_indices = @transform_8, window_bounds = array<i64: 2, 1>}]} {
    %c0 = arith.constant 0 : index
    %c0_0 = arith.constant 0 : index
    %c0_1 = arith.constant 0 : index
    %0 = vector.load %arg1[%c0, %c0_0, %c0_1] : memref<2x4x4xf32, #tpu.memory_space<vmem>>, vector<2x4x4xf32>
    %cst = arith.constant dense<0.000000e+00> : vector<2x4xf32>
    %1 = vector.multi_reduction <add>, %0, %cst [2] : vector<2x4x4xf32> to vector<2x4xf32>
    %2 = vector.shape_cast %1 : vector<2x4xf32> to vector<2x4x1xf32>
    %cst_2 = arith.constant 9.99999996E-13 : f32
    %3 = vector.broadcast %cst_2 : f32 to vector<2x4x1xf32>
    %4 = arith.maximumf %2, %3 : vector<2x4x1xf32>
    %5 = math.rsqrt %4 : vector<2x4x1xf32>
    %cst_3 = arith.constant dense<0.000000e+00> : vector<2x4xf32>
    %6 = vector.multi_reduction <add>, %0, %cst_3 [1] : vector<2x4x4xf32> to vector<2x4xf32>
    %7 = vector.shape_cast %6 : vector<2x4xf32> to vector<2x1x4xf32>
    %cst_4 = arith.constant 9.99999996E-13 : f32
    %8 = vector.broadcast %cst_4 : f32 to vector<2x1x4xf32>
    %9 = arith.maximumf %7, %8 : vector<2x1x4xf32>
    %10 = math.rsqrt %9 : vector<2x1x4xf32>
    %11 = vector.broadcast %5 : vector<2x4x1xf32> to vector<2x4x4xf32>
    %12 = arith.mulf %0, %11 : vector<2x4x4xf32>
    %13 = vector.broadcast %10 : vector<2x1x4xf32> to vector<2x4x4xf32>
    %14 = arith.mulf %12, %13 : vector<2x4x4xf32>
    %15 = arith.truncf %14 : vector<2x4x4xf32> to vector<2x4x4xbf16>
    %c0_5 = arith.constant 0 : index
    %c0_6 = arith.constant 0 : index
    %c0_7 = arith.constant 0 : index
    %16 = vector.load %arg2[%c0_5, %c0_6, %c0_7] : memref<2x4x32xf32, #tpu.memory_space<vmem>>, vector<2x4x32xf32>
    %17 = vector.shape_cast %16 : vector<2x4x32xf32> to vector<8x32xf32>
    %18 = arith.truncf %17 : vector<8x32xf32> to vector<8x32xbf16>
    %c0_8 = arith.constant 0 : index
    %c0_9 = arith.constant 0 : index
    %19 = vector.load %arg3[%c0_8, %c0_9] : memref<32x32xbf16, #tpu.memory_space<vmem>>, vector<32x32xbf16>
    %cst_10 = arith.constant dense<0.000000e+00> : vector<8x32xf32>
    %20 = tpu.matmul %18, %19, %cst_10 {dimension_numbers = #tpu.dot_dimension_numbers<[1], [0], [0], [1], [0, 0, 1, 1], [], []>} : vector<8x32xbf16>, vector<32x32xbf16>, vector<8x32xf32> -> vector<8x32xf32>
    %21 = vector.shape_cast %20 : vector<8x32xf32> to vector<2x4x32xf32>
    %22 = arith.truncf %21 : vector<2x4x32xf32> to vector<2x4x32xbf16>
    %cst_11 = arith.constant dense<0.000000e+00> : vector<2x4x32xf32>
    %23 = tpu.matmul %15, %22, %cst_11 {dimension_numbers = #tpu.dot_dimension_numbers<[2], [1], [1], [2], [0, 0, 0, 1, 1, 2], [0], [0]>} : vector<2x4x4xbf16>, vector<2x4x32xbf16>, vector<2x4x32xf32> -> vector<2x4x32xf32>
    %c0_12 = arith.constant 0 : index
    %c0_13 = arith.constant 0 : index
    %24 = vector.load %arg4[%c0_12, %c0_13] : memref<1x32xf32, #tpu.memory_space<vmem>>, vector<1x32xf32>
    %25 = vector.shape_cast %24 : vector<1x32xf32> to vector<1x1x32xf32>
    %26 = vector.broadcast %25 : vector<1x1x32xf32> to vector<2x4x32xf32>
    %27 = arith.addf %23, %26 : vector<2x4x32xf32>
    %cst_14 = arith.constant 0.000000e+00 : f32
    %28 = vector.broadcast %cst_14 : f32 to vector<2x4x32xf32>
    %29 = arith.maximumf %27, %28 : vector<2x4x32xf32>
    %30 = vector.shape_cast %29 : vector<2x4x32xf32> to vector<8x32xf32>
    %31 = arith.truncf %30 : vector<8x32xf32> to vector<8x32xbf16>
    %c0_15 = arith.constant 0 : index
    %c0_16 = arith.constant 0 : index
    %32 = vector.load %arg5[%c0_15, %c0_16] : memref<32x32xbf16, #tpu.memory_space<vmem>>, vector<32x32xbf16>
    %cst_17 = arith.constant dense<0.000000e+00> : vector<8x32xf32>
    %33 = tpu.matmul %31, %32, %cst_17 {dimension_numbers = #tpu.dot_dimension_numbers<[1], [0], [0], [1], [0, 0, 1, 1], [], []>} : vector<8x32xbf16>, vector<32x32xbf16>, vector<8x32xf32> -> vector<8x32xf32>
    %34 = vector.shape_cast %33 : vector<8x32xf32> to vector<2x4x32xf32>
    %35 = arith.truncf %34 : vector<2x4x32xf32> to vector<2x4x32xbf16>
    %cst_18 = arith.constant dense<0.000000e+00> : vector<2x4x32xf32>
    %36 = tpu.matmul %15, %35, %cst_18 {dimension_numbers = #tpu.dot_dimension_numbers<[2], [1], [1], [2], [0, 0, 0, 1, 1, 2], [0], [0]>} : vector<2x4x4xbf16>, vector<2x4x32xbf16>, vector<2x4x32xf32> -> vector<2x4x32xf32>
    %c0_19 = arith.constant 0 : index
    %c0_20 = arith.constant 0 : index
    %37 = vector.load %arg6[%c0_19, %c0_20] : memref<1x32xf32, #tpu.memory_space<vmem>>, vector<1x32xf32>
    %38 = vector.shape_cast %37 : vector<1x32xf32> to vector<1x1x32xf32>
    %39 = vector.broadcast %38 : vector<1x1x32xf32> to vector<2x4x32xf32>
    %40 = arith.addf %36, %39 : vector<2x4x32xf32>
    %cst_21 = arith.constant 0.000000e+00 : f32
    %41 = vector.broadcast %cst_21 : f32 to vector<2x4x32xf32>
    %42 = arith.maximumf %40, %41 : vector<2x4x32xf32>
    %cst_22 = arith.constant dense<0.000000e+00> : vector<2x32xf32>
    %43 = vector.multi_reduction <add>, %42, %cst_22 [1] : vector<2x4x32xf32> to vector<2x32xf32>
    %44 = arith.truncf %43 : vector<2x32xf32> to vector<2x32xbf16>
    %c0_23 = arith.constant 0 : index
    %c0_24 = arith.constant 0 : index
    %45 = vector.load %arg7[%c0_23, %c0_24] : memref<32x1xbf16, #tpu.memory_space<vmem>>, vector<32x1xbf16>
    %cst_25 = arith.constant dense<0.000000e+00> : vector<2x1xf32>
    %46 = tpu.matmul %44, %45, %cst_25 {dimension_numbers = #tpu.dot_dimension_numbers<[1], [0], [0], [1], [0, 0, 1, 1], [], []>} : vector<2x32xbf16>, vector<32x1xbf16>, vector<2x1xf32> -> vector<2x1xf32>
    %c0_26 = arith.constant 0 : index
    %c0_27 = arith.constant 0 : index
    %47 = vector.load %arg8[%c0_26, %c0_27] : memref<1x1xf32, #tpu.memory_space<vmem>>, vector<1x1xf32>
    %48 = vector.broadcast %47 : vector<1x1xf32> to vector<2x1xf32>
    %49 = arith.addf %46, %48 : vector<2x1xf32>
    %c0_28 = arith.constant 0 : index
    %c0_29 = arith.constant 0 : index
    %50 = vector.load %arg9[%c0_28, %c0_29] : memref<2x1xf32, #tpu.memory_space<vmem>>, vector<2x1xf32>
    tpu.vector_store %arg9[%c0_28, %c0_29], %49 {strides = array<i32>} : memref<2x1xf32, #tpu.memory_space<vmem>>, vector<2x1xf32>,
    return
  }
  func.func @transform_0(%arg0: i32) -> (i32, i32, i32) {
    %c0_i32 = arith.constant 0 : i32
    %c0_i32_0 = arith.constant 0 : i32
    %c0_i32_1 = arith.constant 0 : i32
    return %arg0, %c0_i32, %c0_i32_0 : i32, i32, i32
  }
  func.func @transform_1(%arg0: i32) -> (i32, i32, i32) {
    %c0_i32 = arith.constant 0 : i32
    %c0_i32_0 = arith.constant 0 : i32
    %c0_i32_1 = arith.constant 0 : i32
    return %arg0, %c0_i32, %c0_i32_0 : i32, i32, i32
  }
  func.func @transform_2(%arg0: i32) -> (i32, i32) {
    %c0_i32 = arith.constant 0 : i32
    %c0_i32_0 = arith.constant 0 : i32
    %c0_i32_1 = arith.constant 0 : i32
    return %c0_i32, %c0_i32_0 : i32, i32
  }
  func.func @transform_3(%arg0: i32) -> (i32, i32) {
    %c0_i32 = arith.constant 0 : i32
    %c0_i32_0 = arith.constant 0 : i32
    %c0_i32_1 = arith.constant 0 : i32
    return %c0_i32, %c0_i32_0 : i32, i32
  }
  func.func @transform_4(%arg0: i32) -> (i32, i32) {
    %c0_i32 = arith.constant 0 : i32
    %c0_i32_0 = arith.constant 0 : i32
    %c0_i32_1 = arith.constant 0 : i32
    return %c0_i32, %c0_i32_0 : i32, i32
  }
  func.func @transform_5(%arg0: i32) -> (i32, i32) {
    %c0_i32 = arith.constant 0 : i32
    %c0_i32_0 = arith.constant 0 : i32
    %c0_i32_1 = arith.constant 0 : i32
    return %c0_i32, %c0_i32_0 : i32, i32
  }
  func.func @transform_6(%arg0: i32) -> (i32, i32) {
    %c0_i32 = arith.constant 0 : i32
    %c0_i32_0 = arith.constant 0 : i32
    %c0_i32_1 = arith.constant 0 : i32
    return %c0_i32, %c0_i32_0 : i32, i32
  }
  func.func @transform_7(%arg0: i32) -> (i32, i32) {
    %c0_i32 = arith.constant 0 : i32
    %c0_i32_0 = arith.constant 0 : i32
    %c0_i32_1 = arith.constant 0 : i32
    return %c0_i32, %c0_i32_0 : i32, i32
  }
  func.func @transform_8(%arg0: i32) -> (i32, i32) {
    %c0_i32 = arith.constant 0 : i32
    %c0_i32_0 = arith.constant 0 : i32
    return %arg0, %c0_i32 : i32, i32
  }
}

module attributes {stable_mosaic.version = 11 : i64} {
  func.func @gru_mean_pool_kernel(%arg0: i32, %arg1: i32, %arg2: memref<8x8x4xf32, #tpu.memory_space<vmem>>, %arg3: memref<3x4x32xbf16, #tpu.memory_space<vmem>>, %arg4: memref<3x32x32xbf16, #tpu.memory_space<vmem>>, %arg5: memref<3x1x32xf32, #tpu.memory_space<vmem>>, %arg6: memref<3x1x32xf32, #tpu.memory_space<vmem>>, %arg7: memref<8x32xf32, #tpu.memory_space<vmem>>, %arg8: memref<8x8x32xbf16, #tpu.memory_space<vmem>>, %arg9: memref<8x8x32xbf16, #tpu.memory_space<vmem>>, %arg10: memref<8x8x32xbf16, #tpu.memory_space<vmem>>, %arg11: memref<8x32xf32, #tpu.memory_space<vmem>>) attributes {dimension_semantics = [#tpu.dimension_semantics<parallel>, #tpu.dimension_semantics<arbitrary>], iteration_bounds = array<i64: 1, 1>, scalar_prefetch = 0 : i64, scratch_operands = 4 : i64, tpu.core_type = #tpu.core_type<tc>, window_params = [{transform_indices = @transform_0, window_bounds = array<i64: 8, 8, 4>}, {pipeline_mode = #tpu.pipeline_mode<synchronous>, transform_indices = @transform_1, window_bounds = array<i64: 3, 4, 32>}, {pipeline_mode = #tpu.pipeline_mode<synchronous>, transform_indices = @transform_2, window_bounds = array<i64: 3, 32, 32>}, {pipeline_mode = #tpu.pipeline_mode<synchronous>, transform_indices = @transform_3, window_bounds = array<i64: 3, 1, 32>}, {pipeline_mode = #tpu.pipeline_mode<synchronous>, transform_indices = @transform_4, window_bounds = array<i64: 3, 1, 32>}, {transform_indices = @transform_5, window_bounds = array<i64: 8, 32>}]} {
    %c0_i32 = arith.constant 0 : i32
    %0 = arith.cmpi eq, %arg1, %c0_i32 : i32
    %1 = arith.extui %0 : i1 to i32
    %c0_i32_0 = arith.constant 0 : i32
    %2 = arith.cmpi ne, %1, %c0_i32_0 : i32
    scf.if %2 {
      %cst_155 = arith.constant 0.000000e+00 : f32
      %399 = vector.broadcast %cst_155 : f32 to vector<8x32xf32>
      %c0_156 = arith.constant 0 : index
      %c0_157 = arith.constant 0 : index
      %400 = vector.load %arg11[%c0_156, %c0_157] : memref<8x32xf32, #tpu.memory_space<vmem>>, vector<8x32xf32>
      tpu.vector_store %arg11[%c0_156, %c0_157], %399 {strides = array<i32>} : memref<8x32xf32, #tpu.memory_space<vmem>>, vector<8x32xf32>,
      %cst_158 = arith.constant 0.000000e+00 : f32
      %401 = vector.broadcast %cst_158 : f32 to vector<8x32xf32>
      %c0_159 = arith.constant 0 : index
      %c0_160 = arith.constant 0 : index
      %402 = vector.load %arg7[%c0_159, %c0_160] : memref<8x32xf32, #tpu.memory_space<vmem>>, vector<8x32xf32>
      tpu.vector_store %arg7[%c0_159, %c0_160], %401 {strides = array<i32>} : memref<8x32xf32, #tpu.memory_space<vmem>>, vector<8x32xf32>,
    } else {
    }
    %c0 = arith.constant 0 : index
    %c0_1 = arith.constant 0 : index
    %c0_2 = arith.constant 0 : index
    %3 = vector.load %arg2[%c0, %c0_1, %c0_2] : memref<8x8x4xf32, #tpu.memory_space<vmem>>, vector<8x8x4xf32>
    %4 = vector.shape_cast %3 : vector<8x8x4xf32> to vector<64x4xf32>
    %5 = arith.truncf %4 : vector<64x4xf32> to vector<64x4xbf16>
    %c0_3 = arith.constant 0 : index
    %c0_4 = arith.constant 0 : index
    %c0_5 = arith.constant 0 : index
    %6 = vector.load %arg3[%c0_3, %c0_4, %c0_5] : memref<3x4x32xbf16, #tpu.memory_space<vmem>>, vector<1x4x32xbf16>
    %7 = vector.shape_cast %6 : vector<1x4x32xbf16> to vector<4x32xbf16>
    %cst = arith.constant dense<0.000000e+00> : vector<64x32xf32>
    %8 = tpu.matmul %5, %7, %cst {dimension_numbers = #tpu.dot_dimension_numbers<[1], [0], [0], [1], [0, 0, 1, 1], [], []>} : vector<64x4xbf16>, vector<4x32xbf16>, vector<64x32xf32> -> vector<64x32xf32>
    %c0_6 = arith.constant 0 : index
    %c0_7 = arith.constant 0 : index
    %c0_8 = arith.constant 0 : index
    %9 = vector.load %arg5[%c0_6, %c0_7, %c0_8] : memref<3x1x32xf32, #tpu.memory_space<vmem>>, vector<1x1x32xf32>
    %10 = vector.shape_cast %9 : vector<1x1x32xf32> to vector<1x32xf32>
    %11 = vector.broadcast %10 : vector<1x32xf32> to vector<64x32xf32>
    %12 = arith.addf %8, %11 : vector<64x32xf32>
    %13 = vector.shape_cast %12 : vector<64x32xf32> to vector<8x8x32xf32>
    %14 = arith.truncf %13 : vector<8x8x32xf32> to vector<8x8x32xbf16>
    %c0_9 = arith.constant 0 : index
    %c0_10 = arith.constant 0 : index
    %c0_11 = arith.constant 0 : index
    %15 = vector.load %arg8[%c0_9, %c0_10, %c0_11] : memref<8x8x32xbf16, #tpu.memory_space<vmem>>, vector<8x8x32xbf16>
    tpu.vector_store %arg8[%c0_9, %c0_10, %c0_11], %14 {strides = array<i32>} : memref<8x8x32xbf16, #tpu.memory_space<vmem>>, vector<8x8x32xbf16>,
    %c1 = arith.constant 1 : index
    %c0_12 = arith.constant 0 : index
    %c0_13 = arith.constant 0 : index
    %16 = vector.load %arg3[%c1, %c0_12, %c0_13] : memref<3x4x32xbf16, #tpu.memory_space<vmem>>, vector<1x4x32xbf16>
    %17 = vector.shape_cast %16 : vector<1x4x32xbf16> to vector<4x32xbf16>
    %cst_14 = arith.constant dense<0.000000e+00> : vector<64x32xf32>
    %18 = tpu.matmul %5, %17, %cst_14 {dimension_numbers = #tpu.dot_dimension_numbers<[1], [0], [0], [1], [0, 0, 1, 1], [], []>} : vector<64x4xbf16>, vector<4x32xbf16>, vector<64x32xf32> -> vector<64x32xf32>
    %c1_15 = arith.constant 1 : index
    %c0_16 = arith.constant 0 : index
    %c0_17 = arith.constant 0 : index
    %19 = vector.load %arg5[%c1_15, %c0_16, %c0_17] : memref<3x1x32xf32, #tpu.memory_space<vmem>>, vector<1x1x32xf32>
    %20 = vector.shape_cast %19 : vector<1x1x32xf32> to vector<1x32xf32>
    %21 = vector.broadcast %20 : vector<1x32xf32> to vector<64x32xf32>
    %22 = arith.addf %18, %21 : vector<64x32xf32>
    %23 = vector.shape_cast %22 : vector<64x32xf32> to vector<8x8x32xf32>
    %24 = arith.truncf %23 : vector<8x8x32xf32> to vector<8x8x32xbf16>
    %c0_18 = arith.constant 0 : index
    %c0_19 = arith.constant 0 : index
    %c0_20 = arith.constant 0 : index
    %25 = vector.load %arg9[%c0_18, %c0_19, %c0_20] : memref<8x8x32xbf16, #tpu.memory_space<vmem>>, vector<8x8x32xbf16>
    tpu.vector_store %arg9[%c0_18, %c0_19, %c0_20], %24 {strides = array<i32>} : memref<8x8x32xbf16, #tpu.memory_space<vmem>>, vector<8x8x32xbf16>,
    %c2 = arith.constant 2 : index
    %c0_21 = arith.constant 0 : index
    %c0_22 = arith.constant 0 : index
    %26 = vector.load %arg3[%c2, %c0_21, %c0_22] : memref<3x4x32xbf16, #tpu.memory_space<vmem>>, vector<1x4x32xbf16>
    %27 = vector.shape_cast %26 : vector<1x4x32xbf16> to vector<4x32xbf16>
    %cst_23 = arith.constant dense<0.000000e+00> : vector<64x32xf32>
    %28 = tpu.matmul %5, %27, %cst_23 {dimension_numbers = #tpu.dot_dimension_numbers<[1], [0], [0], [1], [0, 0, 1, 1], [], []>} : vector<64x4xbf16>, vector<4x32xbf16>, vector<64x32xf32> -> vector<64x32xf32>
    %c2_24 = arith.constant 2 : index
    %c0_25 = arith.constant 0 : index
    %c0_26 = arith.constant 0 : index
    %29 = vector.load %arg5[%c2_24, %c0_25, %c0_26] : memref<3x1x32xf32, #tpu.memory_space<vmem>>, vector<1x1x32xf32>
    %30 = vector.shape_cast %29 : vector<1x1x32xf32> to vector<1x32xf32>
    %31 = vector.broadcast %30 : vector<1x32xf32> to vector<64x32xf32>
    %32 = arith.addf %28, %31 : vector<64x32xf32>
    %33 = vector.shape_cast %32 : vector<64x32xf32> to vector<8x8x32xf32>
    %34 = arith.truncf %33 : vector<8x8x32xf32> to vector<8x8x32xbf16>
    %c0_27 = arith.constant 0 : index
    %c0_28 = arith.constant 0 : index
    %c0_29 = arith.constant 0 : index
    %35 = vector.load %arg10[%c0_27, %c0_28, %c0_29] : memref<8x8x32xbf16, #tpu.memory_space<vmem>>, vector<8x8x32xbf16>
    tpu.vector_store %arg10[%c0_27, %c0_28, %c0_29], %34 {strides = array<i32>} : memref<8x8x32xbf16, #tpu.memory_space<vmem>>, vector<8x8x32xbf16>,
    %c0_30 = arith.constant 0 : index
    %c0_31 = arith.constant 0 : index
    %c0_32 = arith.constant 0 : index
    %36 = vector.load %arg4[%c0_30, %c0_31, %c0_32] : memref<3x32x32xbf16, #tpu.memory_space<vmem>>, vector<1x32x32xbf16>
    %37 = vector.shape_cast %36 : vector<1x32x32xbf16> to vector<32x32xbf16>
    %c1_33 = arith.constant 1 : index
    %c0_34 = arith.constant 0 : index
    %c0_35 = arith.constant 0 : index
    %38 = vector.load %arg4[%c1_33, %c0_34, %c0_35] : memref<3x32x32xbf16, #tpu.memory_space<vmem>>, vector<1x32x32xbf16>
    %39 = vector.shape_cast %38 : vector<1x32x32xbf16> to vector<32x32xbf16>
    %c2_36 = arith.constant 2 : index
    %c0_37 = arith.constant 0 : index
    %c0_38 = arith.constant 0 : index
    %40 = vector.load %arg4[%c2_36, %c0_37, %c0_38] : memref<3x32x32xbf16, #tpu.memory_space<vmem>>, vector<1x32x32xbf16>
    %41 = vector.shape_cast %40 : vector<1x32x32xbf16> to vector<32x32xbf16>
    %c0_39 = arith.constant 0 : index
    %c0_40 = arith.constant 0 : index
    %c0_41 = arith.constant 0 : index
    %42 = vector.load %arg6[%c0_39, %c0_40, %c0_41] : memref<3x1x32xf32, #tpu.memory_space<vmem>>, vector<1x1x32xf32>
    %43 = vector.shape_cast %42 : vector<1x1x32xf32> to vector<1x32xf32>
    %c1_42 = arith.constant 1 : index
    %c0_43 = arith.constant 0 : index
    %c0_44 = arith.constant 0 : index
    %44 = vector.load %arg6[%c1_42, %c0_43, %c0_44] : memref<3x1x32xf32, #tpu.memory_space<vmem>>, vector<1x1x32xf32>
    %45 = vector.shape_cast %44 : vector<1x1x32xf32> to vector<1x32xf32>
    %c2_45 = arith.constant 2 : index
    %c0_46 = arith.constant 0 : index
    %c0_47 = arith.constant 0 : index
    %46 = vector.load %arg6[%c2_45, %c0_46, %c0_47] : memref<3x1x32xf32, #tpu.memory_space<vmem>>, vector<1x1x32xf32>
    %47 = vector.shape_cast %46 : vector<1x1x32xf32> to vector<1x32xf32>
    %c0_48 = arith.constant 0 : index
    %c0_49 = arith.constant 0 : index
    %48 = vector.load %arg11[%c0_48, %c0_49] : memref<8x32xf32, #tpu.memory_space<vmem>>, vector<8x32xf32>
    %c0_50 = arith.constant 0 : index
    %c0_51 = arith.constant 0 : index
    %49 = vector.load %arg7[%c0_50, %c0_51] : memref<8x32xf32, #tpu.memory_space<vmem>>, vector<8x32xf32>
    %c0_i32_52 = arith.constant 0 : i32
    %50 = arith.truncf %48 : vector<8x32xf32> to vector<8x32xbf16>
    %cst_53 = arith.constant dense<0.000000e+00> : vector<8x32xf32>
    %51 = tpu.matmul %50, %37, %cst_53 {dimension_numbers = #tpu.dot_dimension_numbers<[1], [0], [0], [1], [0, 0, 1, 1], [], []>} : vector<8x32xbf16>, vector<32x32xbf16>, vector<8x32xf32> -> vector<8x32xf32>
    %52 = vector.broadcast %43 : vector<1x32xf32> to vector<8x32xf32>
    %53 = arith.addf %51, %52 : vector<8x32xf32>
    %cst_54 = arith.constant dense<0.000000e+00> : vector<8x32xf32>
    %54 = tpu.matmul %50, %39, %cst_54 {dimension_numbers = #tpu.dot_dimension_numbers<[1], [0], [0], [1], [0, 0, 1, 1], [], []>} : vector<8x32xbf16>, vector<32x32xbf16>, vector<8x32xf32> -> vector<8x32xf32>
    %55 = vector.broadcast %45 : vector<1x32xf32> to vector<8x32xf32>
    %56 = arith.addf %54, %55 : vector<8x32xf32>
    %cst_55 = arith.constant dense<0.000000e+00> : vector<8x32xf32>
    %57 = tpu.matmul %50, %41, %cst_55 {dimension_numbers = #tpu.dot_dimension_numbers<[1], [0], [0], [1], [0, 0, 1, 1], [], []>} : vector<8x32xbf16>, vector<32x32xbf16>, vector<8x32xf32> -> vector<8x32xf32>
    %58 = vector.broadcast %47 : vector<1x32xf32> to vector<8x32xf32>
    %59 = arith.addf %57, %58 : vector<8x32xf32>
    %60 = arith.index_cast %c0_i32_52 : i32 to index
    %c0_56 = arith.constant 0 : index
    %c0_57 = arith.constant 0 : index
    %61 = vector.load %arg8[%60, %c0_56, %c0_57] : memref<8x8x32xbf16, #tpu.memory_space<vmem>>, vector<1x8x32xbf16>
    %62 = vector.shape_cast %61 : vector<1x8x32xbf16> to vector<8x32xbf16>
    %63 = arith.extf %62 : vector<8x32xbf16> to vector<8x32xf32>
    %64 = arith.addf %63, %53 : vector<8x32xf32>
    %65 = arith.negf %64 : vector<8x32xf32>
    %66 = math.exp %65 : vector<8x32xf32>
    %cst_58 = arith.constant 1.000000e+00 : f32
    %67 = vector.broadcast %cst_58 : f32 to vector<8x32xf32>
    %68 = arith.addf %67, %66 : vector<8x32xf32>
    %69 = arith.divf %67, %68 : vector<8x32xf32>
    %70 = arith.index_cast %c0_i32_52 : i32 to index
    %c0_59 = arith.constant 0 : index
    %c0_60 = arith.constant 0 : index
    %71 = vector.load %arg9[%70, %c0_59, %c0_60] : memref<8x8x32xbf16, #tpu.memory_space<vmem>>, vector<1x8x32xbf16>
    %72 = vector.shape_cast %71 : vector<1x8x32xbf16> to vector<8x32xbf16>
    %73 = arith.extf %72 : vector<8x32xbf16> to vector<8x32xf32>
    %74 = arith.addf %73, %56 : vector<8x32xf32>
    %75 = arith.negf %74 : vector<8x32xf32>
    %76 = math.exp %75 : vector<8x32xf32>
    %cst_61 = arith.constant 1.000000e+00 : f32
    %77 = vector.broadcast %cst_61 : f32 to vector<8x32xf32>
    %78 = arith.addf %77, %76 : vector<8x32xf32>
    %79 = arith.divf %77, %78 : vector<8x32xf32>
    %80 = arith.index_cast %c0_i32_52 : i32 to index
    %c0_62 = arith.constant 0 : index
    %c0_63 = arith.constant 0 : index
    %81 = vector.load %arg10[%80, %c0_62, %c0_63] : memref<8x8x32xbf16, #tpu.memory_space<vmem>>, vector<1x8x32xbf16>
    %82 = vector.shape_cast %81 : vector<1x8x32xbf16> to vector<8x32xbf16>
    %83 = arith.extf %82 : vector<8x32xbf16> to vector<8x32xf32>
    %84 = arith.mulf %69, %59 : vector<8x32xf32>
    %85 = arith.addf %83, %84 : vector<8x32xf32>
    %86 = math.tanh %85 : vector<8x32xf32>
    %cst_64 = arith.constant 1.000000e+00 : f32
    %87 = vector.broadcast %cst_64 : f32 to vector<8x32xf32>
    %88 = arith.subf %87, %79 : vector<8x32xf32>
    %89 = arith.mulf %88, %86 : vector<8x32xf32>
    %90 = arith.mulf %79, %48 : vector<8x32xf32>
    %91 = arith.addf %89, %90 : vector<8x32xf32>
    %92 = arith.addf %49, %91 : vector<8x32xf32>
    %c1_i32 = arith.constant 1 : i32
    %93 = arith.truncf %91 : vector<8x32xf32> to vector<8x32xbf16>
    %cst_65 = arith.constant dense<0.000000e+00> : vector<8x32xf32>
    %94 = tpu.matmul %93, %37, %cst_65 {dimension_numbers = #tpu.dot_dimension_numbers<[1], [0], [0], [1], [0, 0, 1, 1], [], []>} : vector<8x32xbf16>, vector<32x32xbf16>, vector<8x32xf32> -> vector<8x32xf32>
    %95 = vector.broadcast %43 : vector<1x32xf32> to vector<8x32xf32>
    %96 = arith.addf %94, %95 : vector<8x32xf32>
    %cst_66 = arith.constant dense<0.000000e+00> : vector<8x32xf32>
    %97 = tpu.matmul %93, %39, %cst_66 {dimension_numbers = #tpu.dot_dimension_numbers<[1], [0], [0], [1], [0, 0, 1, 1], [], []>} : vector<8x32xbf16>, vector<32x32xbf16>, vector<8x32xf32> -> vector<8x32xf32>
    %98 = vector.broadcast %45 : vector<1x32xf32> to vector<8x32xf32>
    %99 = arith.addf %97, %98 : vector<8x32xf32>
    %cst_67 = arith.constant dense<0.000000e+00> : vector<8x32xf32>
    %100 = tpu.matmul %93, %41, %cst_67 {dimension_numbers = #tpu.dot_dimension_numbers<[1], [0], [0], [1], [0, 0, 1, 1], [], []>} : vector<8x32xbf16>, vector<32x32xbf16>, vector<8x32xf32> -> vector<8x32xf32>
    %101 = vector.broadcast %47 : vector<1x32xf32> to vector<8x32xf32>
    %102 = arith.addf %100, %101 : vector<8x32xf32>
    %103 = arith.index_cast %c1_i32 : i32 to index
    %c0_68 = arith.constant 0 : index
    %c0_69 = arith.constant 0 : index
    %104 = vector.load %arg8[%103, %c0_68, %c0_69] : memref<8x8x32xbf16, #tpu.memory_space<vmem>>, vector<1x8x32xbf16>
    %105 = vector.shape_cast %104 : vector<1x8x32xbf16> to vector<8x32xbf16>
    %106 = arith.extf %105 : vector<8x32xbf16> to vector<8x32xf32>
    %107 = arith.addf %106, %96 : vector<8x32xf32>
    %108 = arith.negf %107 : vector<8x32xf32>
    %109 = math.exp %108 : vector<8x32xf32>
    %cst_70 = arith.constant 1.000000e+00 : f32
    %110 = vector.broadcast %cst_70 : f32 to vector<8x32xf32>
    %111 = arith.addf %110, %109 : vector<8x32xf32>
    %112 = arith.divf %110, %111 : vector<8x32xf32>
    %113 = arith.index_cast %c1_i32 : i32 to index
    %c0_71 = arith.constant 0 : index
    %c0_72 = arith.constant 0 : index
    %114 = vector.load %arg9[%113, %c0_71, %c0_72] : memref<8x8x32xbf16, #tpu.memory_space<vmem>>, vector<1x8x32xbf16>
    %115 = vector.shape_cast %114 : vector<1x8x32xbf16> to vector<8x32xbf16>
    %116 = arith.extf %115 : vector<8x32xbf16> to vector<8x32xf32>
    %117 = arith.addf %116, %99 : vector<8x32xf32>
    %118 = arith.negf %117 : vector<8x32xf32>
    %119 = math.exp %118 : vector<8x32xf32>
    %cst_73 = arith.constant 1.000000e+00 : f32
    %120 = vector.broadcast %cst_73 : f32 to vector<8x32xf32>
    %121 = arith.addf %120, %119 : vector<8x32xf32>
    %122 = arith.divf %120, %121 : vector<8x32xf32>
    %123 = arith.index_cast %c1_i32 : i32 to index
    %c0_74 = arith.constant 0 : index
    %c0_75 = arith.constant 0 : index
    %124 = vector.load %arg10[%123, %c0_74, %c0_75] : memref<8x8x32xbf16, #tpu.memory_space<vmem>>, vector<1x8x32xbf16>
    %125 = vector.shape_cast %124 : vector<1x8x32xbf16> to vector<8x32xbf16>
    %126 = arith.extf %125 : vector<8x32xbf16> to vector<8x32xf32>
    %127 = arith.mulf %112, %102 : vector<8x32xf32>
    %128 = arith.addf %126, %127 : vector<8x32xf32>
    %129 = math.tanh %128 : vector<8x32xf32>
    %cst_76 = arith.constant 1.000000e+00 : f32
    %130 = vector.broadcast %cst_76 : f32 to vector<8x32xf32>
    %131 = arith.subf %130, %122 : vector<8x32xf32>
    %132 = arith.mulf %131, %129 : vector<8x32xf32>
    %133 = arith.mulf %122, %91 : vector<8x32xf32>
    %134 = arith.addf %132, %133 : vector<8x32xf32>
    %135 = arith.addf %92, %134 : vector<8x32xf32>
    %c2_i32 = arith.constant 2 : i32
    %136 = arith.truncf %134 : vector<8x32xf32> to vector<8x32xbf16>
    %cst_77 = arith.constant dense<0.000000e+00> : vector<8x32xf32>
    %137 = tpu.matmul %136, %37, %cst_77 {dimension_numbers = #tpu.dot_dimension_numbers<[1], [0], [0], [1], [0, 0, 1, 1], [], []>} : vector<8x32xbf16>, vector<32x32xbf16>, vector<8x32xf32> -> vector<8x32xf32>
    %138 = vector.broadcast %43 : vector<1x32xf32> to vector<8x32xf32>
    %139 = arith.addf %137, %138 : vector<8x32xf32>
    %cst_78 = arith.constant dense<0.000000e+00> : vector<8x32xf32>
    %140 = tpu.matmul %136, %39, %cst_78 {dimension_numbers = #tpu.dot_dimension_numbers<[1], [0], [0], [1], [0, 0, 1, 1], [], []>} : vector<8x32xbf16>, vector<32x32xbf16>, vector<8x32xf32> -> vector<8x32xf32>
    %141 = vector.broadcast %45 : vector<1x32xf32> to vector<8x32xf32>
    %142 = arith.addf %140, %141 : vector<8x32xf32>
    %cst_79 = arith.constant dense<0.000000e+00> : vector<8x32xf32>
    %143 = tpu.matmul %136, %41, %cst_79 {dimension_numbers = #tpu.dot_dimension_numbers<[1], [0], [0], [1], [0, 0, 1, 1], [], []>} : vector<8x32xbf16>, vector<32x32xbf16>, vector<8x32xf32> -> vector<8x32xf32>
    %144 = vector.broadcast %47 : vector<1x32xf32> to vector<8x32xf32>
    %145 = arith.addf %143, %144 : vector<8x32xf32>
    %146 = arith.index_cast %c2_i32 : i32 to index
    %c0_80 = arith.constant 0 : index
    %c0_81 = arith.constant 0 : index
    %147 = vector.load %arg8[%146, %c0_80, %c0_81] : memref<8x8x32xbf16, #tpu.memory_space<vmem>>, vector<1x8x32xbf16>
    %148 = vector.shape_cast %147 : vector<1x8x32xbf16> to vector<8x32xbf16>
    %149 = arith.extf %148 : vector<8x32xbf16> to vector<8x32xf32>
    %150 = arith.addf %149, %139 : vector<8x32xf32>
    %151 = arith.negf %150 : vector<8x32xf32>
    %152 = math.exp %151 : vector<8x32xf32>
    %cst_82 = arith.constant 1.000000e+00 : f32
    %153 = vector.broadcast %cst_82 : f32 to vector<8x32xf32>
    %154 = arith.addf %153, %152 : vector<8x32xf32>
    %155 = arith.divf %153, %154 : vector<8x32xf32>
    %156 = arith.index_cast %c2_i32 : i32 to index
    %c0_83 = arith.constant 0 : index
    %c0_84 = arith.constant 0 : index
    %157 = vector.load %arg9[%156, %c0_83, %c0_84] : memref<8x8x32xbf16, #tpu.memory_space<vmem>>, vector<1x8x32xbf16>
    %158 = vector.shape_cast %157 : vector<1x8x32xbf16> to vector<8x32xbf16>
    %159 = arith.extf %158 : vector<8x32xbf16> to vector<8x32xf32>
    %160 = arith.addf %159, %142 : vector<8x32xf32>
    %161 = arith.negf %160 : vector<8x32xf32>
    %162 = math.exp %161 : vector<8x32xf32>
    %cst_85 = arith.constant 1.000000e+00 : f32
    %163 = vector.broadcast %cst_85 : f32 to vector<8x32xf32>
    %164 = arith.addf %163, %162 : vector<8x32xf32>
    %165 = arith.divf %163, %164 : vector<8x32xf32>
    %166 = arith.index_cast %c2_i32 : i32 to index
    %c0_86 = arith.constant 0 : index
    %c0_87 = arith.constant 0 : index
    %167 = vector.load %arg10[%166, %c0_86, %c0_87] : memref<8x8x32xbf16, #tpu.memory_space<vmem>>, vector<1x8x32xbf16>
    %168 = vector.shape_cast %167 : vector<1x8x32xbf16> to vector<8x32xbf16>
    %169 = arith.extf %168 : vector<8x32xbf16> to vector<8x32xf32>
    %170 = arith.mulf %155, %145 : vector<8x32xf32>
    %171 = arith.addf %169, %170 : vector<8x32xf32>
    %172 = math.tanh %171 : vector<8x32xf32>
    %cst_88 = arith.constant 1.000000e+00 : f32
    %173 = vector.broadcast %cst_88 : f32 to vector<8x32xf32>
    %174 = arith.subf %173, %165 : vector<8x32xf32>
    %175 = arith.mulf %174, %172 : vector<8x32xf32>
    %176 = arith.mulf %165, %134 : vector<8x32xf32>
    %177 = arith.addf %175, %176 : vector<8x32xf32>
    %178 = arith.addf %135, %177 : vector<8x32xf32>
    %c3_i32 = arith.constant 3 : i32
    %179 = arith.truncf %177 : vector<8x32xf32> to vector<8x32xbf16>
    %cst_89 = arith.constant dense<0.000000e+00> : vector<8x32xf32>
    %180 = tpu.matmul %179, %37, %cst_89 {dimension_numbers = #tpu.dot_dimension_numbers<[1], [0], [0], [1], [0, 0, 1, 1], [], []>} : vector<8x32xbf16>, vector<32x32xbf16>, vector<8x32xf32> -> vector<8x32xf32>
    %181 = vector.broadcast %43 : vector<1x32xf32> to vector<8x32xf32>
    %182 = arith.addf %180, %181 : vector<8x32xf32>
    %cst_90 = arith.constant dense<0.000000e+00> : vector<8x32xf32>
    %183 = tpu.matmul %179, %39, %cst_90 {dimension_numbers = #tpu.dot_dimension_numbers<[1], [0], [0], [1], [0, 0, 1, 1], [], []>} : vector<8x32xbf16>, vector<32x32xbf16>, vector<8x32xf32> -> vector<8x32xf32>
    %184 = vector.broadcast %45 : vector<1x32xf32> to vector<8x32xf32>
    %185 = arith.addf %183, %184 : vector<8x32xf32>
    %cst_91 = arith.constant dense<0.000000e+00> : vector<8x32xf32>
    %186 = tpu.matmul %179, %41, %cst_91 {dimension_numbers = #tpu.dot_dimension_numbers<[1], [0], [0], [1], [0, 0, 1, 1], [], []>} : vector<8x32xbf16>, vector<32x32xbf16>, vector<8x32xf32> -> vector<8x32xf32>
    %187 = vector.broadcast %47 : vector<1x32xf32> to vector<8x32xf32>
    %188 = arith.addf %186, %187 : vector<8x32xf32>
    %189 = arith.index_cast %c3_i32 : i32 to index
    %c0_92 = arith.constant 0 : index
    %c0_93 = arith.constant 0 : index
    %190 = vector.load %arg8[%189, %c0_92, %c0_93] : memref<8x8x32xbf16, #tpu.memory_space<vmem>>, vector<1x8x32xbf16>
    %191 = vector.shape_cast %190 : vector<1x8x32xbf16> to vector<8x32xbf16>
    %192 = arith.extf %191 : vector<8x32xbf16> to vector<8x32xf32>
    %193 = arith.addf %192, %182 : vector<8x32xf32>
    %194 = arith.negf %193 : vector<8x32xf32>
    %195 = math.exp %194 : vector<8x32xf32>
    %cst_94 = arith.constant 1.000000e+00 : f32
    %196 = vector.broadcast %cst_94 : f32 to vector<8x32xf32>
    %197 = arith.addf %196, %195 : vector<8x32xf32>
    %198 = arith.divf %196, %197 : vector<8x32xf32>
    %199 = arith.index_cast %c3_i32 : i32 to index
    %c0_95 = arith.constant 0 : index
    %c0_96 = arith.constant 0 : index
    %200 = vector.load %arg9[%199, %c0_95, %c0_96] : memref<8x8x32xbf16, #tpu.memory_space<vmem>>, vector<1x8x32xbf16>
    %201 = vector.shape_cast %200 : vector<1x8x32xbf16> to vector<8x32xbf16>
    %202 = arith.extf %201 : vector<8x32xbf16> to vector<8x32xf32>
    %203 = arith.addf %202, %185 : vector<8x32xf32>
    %204 = arith.negf %203 : vector<8x32xf32>
    %205 = math.exp %204 : vector<8x32xf32>
    %cst_97 = arith.constant 1.000000e+00 : f32
    %206 = vector.broadcast %cst_97 : f32 to vector<8x32xf32>
    %207 = arith.addf %206, %205 : vector<8x32xf32>
    %208 = arith.divf %206, %207 : vector<8x32xf32>
    %209 = arith.index_cast %c3_i32 : i32 to index
    %c0_98 = arith.constant 0 : index
    %c0_99 = arith.constant 0 : index
    %210 = vector.load %arg10[%209, %c0_98, %c0_99] : memref<8x8x32xbf16, #tpu.memory_space<vmem>>, vector<1x8x32xbf16>
    %211 = vector.shape_cast %210 : vector<1x8x32xbf16> to vector<8x32xbf16>
    %212 = arith.extf %211 : vector<8x32xbf16> to vector<8x32xf32>
    %213 = arith.mulf %198, %188 : vector<8x32xf32>
    %214 = arith.addf %212, %213 : vector<8x32xf32>
    %215 = math.tanh %214 : vector<8x32xf32>
    %cst_100 = arith.constant 1.000000e+00 : f32
    %216 = vector.broadcast %cst_100 : f32 to vector<8x32xf32>
    %217 = arith.subf %216, %208 : vector<8x32xf32>
    %218 = arith.mulf %217, %215 : vector<8x32xf32>
    %219 = arith.mulf %208, %177 : vector<8x32xf32>
    %220 = arith.addf %218, %219 : vector<8x32xf32>
    %221 = arith.addf %178, %220 : vector<8x32xf32>
    %c4_i32 = arith.constant 4 : i32
    %222 = arith.truncf %220 : vector<8x32xf32> to vector<8x32xbf16>
    %cst_101 = arith.constant dense<0.000000e+00> : vector<8x32xf32>
    %223 = tpu.matmul %222, %37, %cst_101 {dimension_numbers = #tpu.dot_dimension_numbers<[1], [0], [0], [1], [0, 0, 1, 1], [], []>} : vector<8x32xbf16>, vector<32x32xbf16>, vector<8x32xf32> -> vector<8x32xf32>
    %224 = vector.broadcast %43 : vector<1x32xf32> to vector<8x32xf32>
    %225 = arith.addf %223, %224 : vector<8x32xf32>
    %cst_102 = arith.constant dense<0.000000e+00> : vector<8x32xf32>
    %226 = tpu.matmul %222, %39, %cst_102 {dimension_numbers = #tpu.dot_dimension_numbers<[1], [0], [0], [1], [0, 0, 1, 1], [], []>} : vector<8x32xbf16>, vector<32x32xbf16>, vector<8x32xf32> -> vector<8x32xf32>
    %227 = vector.broadcast %45 : vector<1x32xf32> to vector<8x32xf32>
    %228 = arith.addf %226, %227 : vector<8x32xf32>
    %cst_103 = arith.constant dense<0.000000e+00> : vector<8x32xf32>
    %229 = tpu.matmul %222, %41, %cst_103 {dimension_numbers = #tpu.dot_dimension_numbers<[1], [0], [0], [1], [0, 0, 1, 1], [], []>} : vector<8x32xbf16>, vector<32x32xbf16>, vector<8x32xf32> -> vector<8x32xf32>
    %230 = vector.broadcast %47 : vector<1x32xf32> to vector<8x32xf32>
    %231 = arith.addf %229, %230 : vector<8x32xf32>
    %232 = arith.index_cast %c4_i32 : i32 to index
    %c0_104 = arith.constant 0 : index
    %c0_105 = arith.constant 0 : index
    %233 = vector.load %arg8[%232, %c0_104, %c0_105] : memref<8x8x32xbf16, #tpu.memory_space<vmem>>, vector<1x8x32xbf16>
    %234 = vector.shape_cast %233 : vector<1x8x32xbf16> to vector<8x32xbf16>
    %235 = arith.extf %234 : vector<8x32xbf16> to vector<8x32xf32>
    %236 = arith.addf %235, %225 : vector<8x32xf32>
    %237 = arith.negf %236 : vector<8x32xf32>
    %238 = math.exp %237 : vector<8x32xf32>
    %cst_106 = arith.constant 1.000000e+00 : f32
    %239 = vector.broadcast %cst_106 : f32 to vector<8x32xf32>
    %240 = arith.addf %239, %238 : vector<8x32xf32>
    %241 = arith.divf %239, %240 : vector<8x32xf32>
    %242 = arith.index_cast %c4_i32 : i32 to index
    %c0_107 = arith.constant 0 : index
    %c0_108 = arith.constant 0 : index
    %243 = vector.load %arg9[%242, %c0_107, %c0_108] : memref<8x8x32xbf16, #tpu.memory_space<vmem>>, vector<1x8x32xbf16>
    %244 = vector.shape_cast %243 : vector<1x8x32xbf16> to vector<8x32xbf16>
    %245 = arith.extf %244 : vector<8x32xbf16> to vector<8x32xf32>
    %246 = arith.addf %245, %228 : vector<8x32xf32>
    %247 = arith.negf %246 : vector<8x32xf32>
    %248 = math.exp %247 : vector<8x32xf32>
    %cst_109 = arith.constant 1.000000e+00 : f32
    %249 = vector.broadcast %cst_109 : f32 to vector<8x32xf32>
    %250 = arith.addf %249, %248 : vector<8x32xf32>
    %251 = arith.divf %249, %250 : vector<8x32xf32>
    %252 = arith.index_cast %c4_i32 : i32 to index
    %c0_110 = arith.constant 0 : index
    %c0_111 = arith.constant 0 : index
    %253 = vector.load %arg10[%252, %c0_110, %c0_111] : memref<8x8x32xbf16, #tpu.memory_space<vmem>>, vector<1x8x32xbf16>
    %254 = vector.shape_cast %253 : vector<1x8x32xbf16> to vector<8x32xbf16>
    %255 = arith.extf %254 : vector<8x32xbf16> to vector<8x32xf32>
    %256 = arith.mulf %241, %231 : vector<8x32xf32>
    %257 = arith.addf %255, %256 : vector<8x32xf32>
    %258 = math.tanh %257 : vector<8x32xf32>
    %cst_112 = arith.constant 1.000000e+00 : f32
    %259 = vector.broadcast %cst_112 : f32 to vector<8x32xf32>
    %260 = arith.subf %259, %251 : vector<8x32xf32>
    %261 = arith.mulf %260, %258 : vector<8x32xf32>
    %262 = arith.mulf %251, %220 : vector<8x32xf32>
    %263 = arith.addf %261, %262 : vector<8x32xf32>
    %264 = arith.addf %221, %263 : vector<8x32xf32>
    %c5_i32 = arith.constant 5 : i32
    %265 = arith.truncf %263 : vector<8x32xf32> to vector<8x32xbf16>
    %cst_113 = arith.constant dense<0.000000e+00> : vector<8x32xf32>
    %266 = tpu.matmul %265, %37, %cst_113 {dimension_numbers = #tpu.dot_dimension_numbers<[1], [0], [0], [1], [0, 0, 1, 1], [], []>} : vector<8x32xbf16>, vector<32x32xbf16>, vector<8x32xf32> -> vector<8x32xf32>
    %267 = vector.broadcast %43 : vector<1x32xf32> to vector<8x32xf32>
    %268 = arith.addf %266, %267 : vector<8x32xf32>
    %cst_114 = arith.constant dense<0.000000e+00> : vector<8x32xf32>
    %269 = tpu.matmul %265, %39, %cst_114 {dimension_numbers = #tpu.dot_dimension_numbers<[1], [0], [0], [1], [0, 0, 1, 1], [], []>} : vector<8x32xbf16>, vector<32x32xbf16>, vector<8x32xf32> -> vector<8x32xf32>
    %270 = vector.broadcast %45 : vector<1x32xf32> to vector<8x32xf32>
    %271 = arith.addf %269, %270 : vector<8x32xf32>
    %cst_115 = arith.constant dense<0.000000e+00> : vector<8x32xf32>
    %272 = tpu.matmul %265, %41, %cst_115 {dimension_numbers = #tpu.dot_dimension_numbers<[1], [0], [0], [1], [0, 0, 1, 1], [], []>} : vector<8x32xbf16>, vector<32x32xbf16>, vector<8x32xf32> -> vector<8x32xf32>
    %273 = vector.broadcast %47 : vector<1x32xf32> to vector<8x32xf32>
    %274 = arith.addf %272, %273 : vector<8x32xf32>
    %275 = arith.index_cast %c5_i32 : i32 to index
    %c0_116 = arith.constant 0 : index
    %c0_117 = arith.constant 0 : index
    %276 = vector.load %arg8[%275, %c0_116, %c0_117] : memref<8x8x32xbf16, #tpu.memory_space<vmem>>, vector<1x8x32xbf16>
    %277 = vector.shape_cast %276 : vector<1x8x32xbf16> to vector<8x32xbf16>
    %278 = arith.extf %277 : vector<8x32xbf16> to vector<8x32xf32>
    %279 = arith.addf %278, %268 : vector<8x32xf32>
    %280 = arith.negf %279 : vector<8x32xf32>
    %281 = math.exp %280 : vector<8x32xf32>
    %cst_118 = arith.constant 1.000000e+00 : f32
    %282 = vector.broadcast %cst_118 : f32 to vector<8x32xf32>
    %283 = arith.addf %282, %281 : vector<8x32xf32>
    %284 = arith.divf %282, %283 : vector<8x32xf32>
    %285 = arith.index_cast %c5_i32 : i32 to index
    %c0_119 = arith.constant 0 : index
    %c0_120 = arith.constant 0 : index
    %286 = vector.load %arg9[%285, %c0_119, %c0_120] : memref<8x8x32xbf16, #tpu.memory_space<vmem>>, vector<1x8x32xbf16>
    %287 = vector.shape_cast %286 : vector<1x8x32xbf16> to vector<8x32xbf16>
    %288 = arith.extf %287 : vector<8x32xbf16> to vector<8x32xf32>
    %289 = arith.addf %288, %271 : vector<8x32xf32>
    %290 = arith.negf %289 : vector<8x32xf32>
    %291 = math.exp %290 : vector<8x32xf32>
    %cst_121 = arith.constant 1.000000e+00 : f32
    %292 = vector.broadcast %cst_121 : f32 to vector<8x32xf32>
    %293 = arith.addf %292, %291 : vector<8x32xf32>
    %294 = arith.divf %292, %293 : vector<8x32xf32>
    %295 = arith.index_cast %c5_i32 : i32 to index
    %c0_122 = arith.constant 0 : index
    %c0_123 = arith.constant 0 : index
    %296 = vector.load %arg10[%295, %c0_122, %c0_123] : memref<8x8x32xbf16, #tpu.memory_space<vmem>>, vector<1x8x32xbf16>
    %297 = vector.shape_cast %296 : vector<1x8x32xbf16> to vector<8x32xbf16>
    %298 = arith.extf %297 : vector<8x32xbf16> to vector<8x32xf32>
    %299 = arith.mulf %284, %274 : vector<8x32xf32>
    %300 = arith.addf %298, %299 : vector<8x32xf32>
    %301 = math.tanh %300 : vector<8x32xf32>
    %cst_124 = arith.constant 1.000000e+00 : f32
    %302 = vector.broadcast %cst_124 : f32 to vector<8x32xf32>
    %303 = arith.subf %302, %294 : vector<8x32xf32>
    %304 = arith.mulf %303, %301 : vector<8x32xf32>
    %305 = arith.mulf %294, %263 : vector<8x32xf32>
    %306 = arith.addf %304, %305 : vector<8x32xf32>
    %307 = arith.addf %264, %306 : vector<8x32xf32>
    %c6_i32 = arith.constant 6 : i32
    %308 = arith.truncf %306 : vector<8x32xf32> to vector<8x32xbf16>
    %cst_125 = arith.constant dense<0.000000e+00> : vector<8x32xf32>
    %309 = tpu.matmul %308, %37, %cst_125 {dimension_numbers = #tpu.dot_dimension_numbers<[1], [0], [0], [1], [0, 0, 1, 1], [], []>} : vector<8x32xbf16>, vector<32x32xbf16>, vector<8x32xf32> -> vector<8x32xf32>
    %310 = vector.broadcast %43 : vector<1x32xf32> to vector<8x32xf32>
    %311 = arith.addf %309, %310 : vector<8x32xf32>
    %cst_126 = arith.constant dense<0.000000e+00> : vector<8x32xf32>
    %312 = tpu.matmul %308, %39, %cst_126 {dimension_numbers = #tpu.dot_dimension_numbers<[1], [0], [0], [1], [0, 0, 1, 1], [], []>} : vector<8x32xbf16>, vector<32x32xbf16>, vector<8x32xf32> -> vector<8x32xf32>
    %313 = vector.broadcast %45 : vector<1x32xf32> to vector<8x32xf32>
    %314 = arith.addf %312, %313 : vector<8x32xf32>
    %cst_127 = arith.constant dense<0.000000e+00> : vector<8x32xf32>
    %315 = tpu.matmul %308, %41, %cst_127 {dimension_numbers = #tpu.dot_dimension_numbers<[1], [0], [0], [1], [0, 0, 1, 1], [], []>} : vector<8x32xbf16>, vector<32x32xbf16>, vector<8x32xf32> -> vector<8x32xf32>
    %316 = vector.broadcast %47 : vector<1x32xf32> to vector<8x32xf32>
    %317 = arith.addf %315, %316 : vector<8x32xf32>
    %318 = arith.index_cast %c6_i32 : i32 to index
    %c0_128 = arith.constant 0 : index
    %c0_129 = arith.constant 0 : index
    %319 = vector.load %arg8[%318, %c0_128, %c0_129] : memref<8x8x32xbf16, #tpu.memory_space<vmem>>, vector<1x8x32xbf16>
    %320 = vector.shape_cast %319 : vector<1x8x32xbf16> to vector<8x32xbf16>
    %321 = arith.extf %320 : vector<8x32xbf16> to vector<8x32xf32>
    %322 = arith.addf %321, %311 : vector<8x32xf32>
    %323 = arith.negf %322 : vector<8x32xf32>
    %324 = math.exp %323 : vector<8x32xf32>
    %cst_130 = arith.constant 1.000000e+00 : f32
    %325 = vector.broadcast %cst_130 : f32 to vector<8x32xf32>
    %326 = arith.addf %325, %324 : vector<8x32xf32>
    %327 = arith.divf %325, %326 : vector<8x32xf32>
    %328 = arith.index_cast %c6_i32 : i32 to index
    %c0_131 = arith.constant 0 : index
    %c0_132 = arith.constant 0 : index
    %329 = vector.load %arg9[%328, %c0_131, %c0_132] : memref<8x8x32xbf16, #tpu.memory_space<vmem>>, vector<1x8x32xbf16>
    %330 = vector.shape_cast %329 : vector<1x8x32xbf16> to vector<8x32xbf16>
    %331 = arith.extf %330 : vector<8x32xbf16> to vector<8x32xf32>
    %332 = arith.addf %331, %314 : vector<8x32xf32>
    %333 = arith.negf %332 : vector<8x32xf32>
    %334 = math.exp %333 : vector<8x32xf32>
    %cst_133 = arith.constant 1.000000e+00 : f32
    %335 = vector.broadcast %cst_133 : f32 to vector<8x32xf32>
    %336 = arith.addf %335, %334 : vector<8x32xf32>
    %337 = arith.divf %335, %336 : vector<8x32xf32>
    %338 = arith.index_cast %c6_i32 : i32 to index
    %c0_134 = arith.constant 0 : index
    %c0_135 = arith.constant 0 : index
    %339 = vector.load %arg10[%338, %c0_134, %c0_135] : memref<8x8x32xbf16, #tpu.memory_space<vmem>>, vector<1x8x32xbf16>
    %340 = vector.shape_cast %339 : vector<1x8x32xbf16> to vector<8x32xbf16>
    %341 = arith.extf %340 : vector<8x32xbf16> to vector<8x32xf32>
    %342 = arith.mulf %327, %317 : vector<8x32xf32>
    %343 = arith.addf %341, %342 : vector<8x32xf32>
    %344 = math.tanh %343 : vector<8x32xf32>
    %cst_136 = arith.constant 1.000000e+00 : f32
    %345 = vector.broadcast %cst_136 : f32 to vector<8x32xf32>
    %346 = arith.subf %345, %337 : vector<8x32xf32>
    %347 = arith.mulf %346, %344 : vector<8x32xf32>
    %348 = arith.mulf %337, %306 : vector<8x32xf32>
    %349 = arith.addf %347, %348 : vector<8x32xf32>
    %350 = arith.addf %307, %349 : vector<8x32xf32>
    %c7_i32 = arith.constant 7 : i32
    %351 = arith.truncf %349 : vector<8x32xf32> to vector<8x32xbf16>
    %cst_137 = arith.constant dense<0.000000e+00> : vector<8x32xf32>
    %352 = tpu.matmul %351, %37, %cst_137 {dimension_numbers = #tpu.dot_dimension_numbers<[1], [0], [0], [1], [0, 0, 1, 1], [], []>} : vector<8x32xbf16>, vector<32x32xbf16>, vector<8x32xf32> -> vector<8x32xf32>
    %353 = vector.broadcast %43 : vector<1x32xf32> to vector<8x32xf32>
    %354 = arith.addf %352, %353 : vector<8x32xf32>
    %cst_138 = arith.constant dense<0.000000e+00> : vector<8x32xf32>
    %355 = tpu.matmul %351, %39, %cst_138 {dimension_numbers = #tpu.dot_dimension_numbers<[1], [0], [0], [1], [0, 0, 1, 1], [], []>} : vector<8x32xbf16>, vector<32x32xbf16>, vector<8x32xf32> -> vector<8x32xf32>
    %356 = vector.broadcast %45 : vector<1x32xf32> to vector<8x32xf32>
    %357 = arith.addf %355, %356 : vector<8x32xf32>
    %cst_139 = arith.constant dense<0.000000e+00> : vector<8x32xf32>
    %358 = tpu.matmul %351, %41, %cst_139 {dimension_numbers = #tpu.dot_dimension_numbers<[1], [0], [0], [1], [0, 0, 1, 1], [], []>} : vector<8x32xbf16>, vector<32x32xbf16>, vector<8x32xf32> -> vector<8x32xf32>
    %359 = vector.broadcast %47 : vector<1x32xf32> to vector<8x32xf32>
    %360 = arith.addf %358, %359 : vector<8x32xf32>
    %361 = arith.index_cast %c7_i32 : i32 to index
    %c0_140 = arith.constant 0 : index
    %c0_141 = arith.constant 0 : index
    %362 = vector.load %arg8[%361, %c0_140, %c0_141] : memref<8x8x32xbf16, #tpu.memory_space<vmem>>, vector<1x8x32xbf16>
    %363 = vector.shape_cast %362 : vector<1x8x32xbf16> to vector<8x32xbf16>
    %364 = arith.extf %363 : vector<8x32xbf16> to vector<8x32xf32>
    %365 = arith.addf %364, %354 : vector<8x32xf32>
    %366 = arith.negf %365 : vector<8x32xf32>
    %367 = math.exp %366 : vector<8x32xf32>
    %cst_142 = arith.constant 1.000000e+00 : f32
    %368 = vector.broadcast %cst_142 : f32 to vector<8x32xf32>
    %369 = arith.addf %368, %367 : vector<8x32xf32>
    %370 = arith.divf %368, %369 : vector<8x32xf32>
    %371 = arith.index_cast %c7_i32 : i32 to index
    %c0_143 = arith.constant 0 : index
    %c0_144 = arith.constant 0 : index
    %372 = vector.load %arg9[%371, %c0_143, %c0_144] : memref<8x8x32xbf16, #tpu.memory_space<vmem>>, vector<1x8x32xbf16>
    %373 = vector.shape_cast %372 : vector<1x8x32xbf16> to vector<8x32xbf16>
    %374 = arith.extf %373 : vector<8x32xbf16> to vector<8x32xf32>
    %375 = arith.addf %374, %357 : vector<8x32xf32>
    %376 = arith.negf %375 : vector<8x32xf32>
    %377 = math.exp %376 : vector<8x32xf32>
    %cst_145 = arith.constant 1.000000e+00 : f32
    %378 = vector.broadcast %cst_145 : f32 to vector<8x32xf32>
    %379 = arith.addf %378, %377 : vector<8x32xf32>
    %380 = arith.divf %378, %379 : vector<8x32xf32>
    %381 = arith.index_cast %c7_i32 : i32 to index
    %c0_146 = arith.constant 0 : index
    %c0_147 = arith.constant 0 : index
    %382 = vector.load %arg10[%381, %c0_146, %c0_147] : memref<8x8x32xbf16, #tpu.memory_space<vmem>>, vector<1x8x32xbf16>
    %383 = vector.shape_cast %382 : vector<1x8x32xbf16> to vector<8x32xbf16>
    %384 = arith.extf %383 : vector<8x32xbf16> to vector<8x32xf32>
    %385 = arith.mulf %370, %360 : vector<8x32xf32>
    %386 = arith.addf %384, %385 : vector<8x32xf32>
    %387 = math.tanh %386 : vector<8x32xf32>
    %cst_148 = arith.constant 1.000000e+00 : f32
    %388 = vector.broadcast %cst_148 : f32 to vector<8x32xf32>
    %389 = arith.subf %388, %380 : vector<8x32xf32>
    %390 = arith.mulf %389, %387 : vector<8x32xf32>
    %391 = arith.mulf %380, %349 : vector<8x32xf32>
    %392 = arith.addf %390, %391 : vector<8x32xf32>
    %393 = arith.addf %350, %392 : vector<8x32xf32>
    %c8_i32 = arith.constant 8 : i32
    %c0_149 = arith.constant 0 : index
    %c0_150 = arith.constant 0 : index
    %394 = vector.load %arg11[%c0_149, %c0_150] : memref<8x32xf32, #tpu.memory_space<vmem>>, vector<8x32xf32>
    tpu.vector_store %arg11[%c0_149, %c0_150], %392 {strides = array<i32>} : memref<8x32xf32, #tpu.memory_space<vmem>>, vector<8x32xf32>,
    %c0_151 = arith.constant 0 : index
    %c0_152 = arith.constant 0 : index
    %395 = vector.load %arg7[%c0_151, %c0_152] : memref<8x32xf32, #tpu.memory_space<vmem>>, vector<8x32xf32>
    tpu.vector_store %arg7[%c0_151, %c0_152], %393 {strides = array<i32>} : memref<8x32xf32, #tpu.memory_space<vmem>>, vector<8x32xf32>,
    %c0_i32_153 = arith.constant 0 : i32
    %396 = arith.cmpi eq, %arg1, %c0_i32_153 : i32
    %397 = arith.extui %396 : i1 to i32
    %c0_i32_154 = arith.constant 0 : i32
    %398 = arith.cmpi ne, %397, %c0_i32_154 : i32
    scf.if %398 {
      %c0_155 = arith.constant 0 : index
      %c0_156 = arith.constant 0 : index
      %399 = vector.load %arg7[%c0_155, %c0_156] : memref<8x32xf32, #tpu.memory_space<vmem>>, vector<8x32xf32>
      %cst_157 = arith.constant 1.250000e-01 : f32
      %400 = vector.broadcast %cst_157 : f32 to vector<8x32xf32>
      %401 = arith.mulf %399, %400 : vector<8x32xf32>
      %c0_158 = arith.constant 0 : index
      %c0_159 = arith.constant 0 : index
      %402 = vector.load %arg7[%c0_158, %c0_159] : memref<8x32xf32, #tpu.memory_space<vmem>>, vector<8x32xf32>
      tpu.vector_store %arg7[%c0_158, %c0_159], %401 {strides = array<i32>} : memref<8x32xf32, #tpu.memory_space<vmem>>, vector<8x32xf32>,
    } else {
    }
    return
  }
  func.func @transform_0(%arg0: i32, %arg1: i32) -> (i32, i32, i32) {
    %c0_i32 = arith.constant 0 : i32
    %c0_i32_0 = arith.constant 0 : i32
    return %arg1, %arg0, %c0_i32 : i32, i32, i32
  }
  func.func @transform_1(%arg0: i32, %arg1: i32) -> (i32, i32, i32) {
    %c0_i32 = arith.constant 0 : i32
    %c0_i32_0 = arith.constant 0 : i32
    %c0_i32_1 = arith.constant 0 : i32
    %c0_i32_2 = arith.constant 0 : i32
    return %c0_i32, %c0_i32_0, %c0_i32_1 : i32, i32, i32
  }
  func.func @transform_2(%arg0: i32, %arg1: i32) -> (i32, i32, i32) {
    %c0_i32 = arith.constant 0 : i32
    %c0_i32_0 = arith.constant 0 : i32
    %c0_i32_1 = arith.constant 0 : i32
    %c0_i32_2 = arith.constant 0 : i32
    return %c0_i32, %c0_i32_0, %c0_i32_1 : i32, i32, i32
  }
  func.func @transform_3(%arg0: i32, %arg1: i32) -> (i32, i32, i32) {
    %c0_i32 = arith.constant 0 : i32
    %c0_i32_0 = arith.constant 0 : i32
    %c0_i32_1 = arith.constant 0 : i32
    %c0_i32_2 = arith.constant 0 : i32
    return %c0_i32, %c0_i32_0, %c0_i32_1 : i32, i32, i32
  }
  func.func @transform_4(%arg0: i32, %arg1: i32) -> (i32, i32, i32) {
    %c0_i32 = arith.constant 0 : i32
    %c0_i32_0 = arith.constant 0 : i32
    %c0_i32_1 = arith.constant 0 : i32
    %c0_i32_2 = arith.constant 0 : i32
    return %c0_i32, %c0_i32_0, %c0_i32_1 : i32, i32, i32
  }
  func.func @transform_5(%arg0: i32, %arg1: i32) -> (i32, i32) {
    %c0_i32 = arith.constant 0 : i32
    %c0_i32_0 = arith.constant 0 : i32
    return %arg0, %c0_i32 : i32, i32
  }
}

</mosaic_0001>

<bundles_post_ra>
// kernel: s4gnn_forward.3
= control target key start
LH: loop header
LB: loop body
LE: loop exit
PB: predicated region body
PF: predicated region fallthrough
CT: control target
= control target key end

     0   :  { %6 = vsyncpa [#allocation3], 0  ;;  %s272_s0 = inlined_call_operand.hbm [shape: f32[2,4,32], index: 0, kind: input, shape index: {}]   ;;  %s273_s1 = inlined_call_operand.hbm [shape: f32[2,4,4], index: 1, kind: output, shape index: {}]  }
   0x1   :  { %7 = vsyncpa [#allocation4], 0  ;;  %s226_s6 = smov [#allocation2]   ;;  %s178_s10 = scalar_lea.hbm %s272_s0, 128 }
   0x2   :  { %s13_s7 = sshll.u32 %s226_s6, 4  ;;  %p179_p0 = scmp.ne.s32.totalorder %s272_s0, %s178_s10  ;;  %s14_s7 = int_to_ptr.vmem [resolvable:$true] %s13_s7 }
   0x3   :  { %p182_p1 = scmp.lt.u32.totalorder %s178_s10, %s272_s0 }
   0x5   :  { %p184_p2 = pnand %p182_p1, %p179_p0 }
   0x7   :  { %187 = shalt.err (!%p184_p2)
}
   0x8   :  { %s188_s15 = scalar_lea.vmem %s14_s7, 128  ;;  %p193_p4 = scmp.lt.s32.totalorder %s14_s7, %s14_s7 }
   0x9   :  { %p189_p3 = scmp.ne.s32.totalorder %s14_s7, %s188_s15  ;;  %p194_p5 = scmp.lt.s32.totalorder %s188_s15, %s188_s15 }
   0xb   :  { %p195_p6 = por %p194_p5, %p193_p4 }
   0xd   :  { %p196_p7 = pnand %p195_p6, %p189_p3 }
   0xf   :  { %199 = shalt.err (!%p196_p7)
}
  0x10   :  { %s227_s16 = smov 64   ;;  %s228_s17 = smov 4  }
  0x11   :  { %19 = dma.hbm_to_vmem [thread:$0]  %s272_s0, 128, %s14_s7, [#allocation3], %s227_s16, %s227_s16, %s228_s17  }
  0x12   :  { %222 = dma.done.wait [#allocation3], 128  }
  0x13   :  { %223 = vsyncadd [#allocation3], 4294967168  ;;  %v24_v0 = vld [vmem:[#allocation2] sm:$0xf]  ;;  %vm28_vm0 = vcmask 257024   ;;  %v229_v6 = vmov 0.0  }
  0x14   :  { %v25_v1 = vld [vmem:[#allocation2 + $0x4] sm:$0xf]  ;;  %v26_v2 = vmul.f32 %v24_v0, %v24_v0  ;;  %156 = vmatprep.subr.bf16.mxu0 %v229_v6  ;;  %162 = vmatprep.subr.bf16.mxu1 %v229_v6  ;;  %vm230_vm1 = vmmov 0   ;;  %vm43_vm2 = vcmask 261120   ;;  %vm130_vm3 = vcmask 27648   ;;  %s231_s0 = smov [#allocation5]  }
  0x15   :  { %v27_v3 = vmul.f32 %v25_v1, %v25_v1  ;;  %158 = vmatprep.mubr.msk.bf16.mxu0 %vm230_vm1, %v229_v6  ;;  %164 = vmatprep.mubr.msk.bf16.mxu1 %vm230_vm1, %v229_v6  ;;  %s138_s20 = sshll.u32 %s231_s0, 4  ;;  %s139_s20 = int_to_ptr.vmem [resolvable:$true] %s138_s20 }
  0x16   :  { %v29_v4 = vsel %vm28_vm0, %v26_v2, 0.0  ;;  %s200_s21 = scalar_lea.vmem %s139_s20, 128  ;;  %p205_p9 = scmp.lt.s32.totalorder %s139_s20, %s139_s20 }
  0x17   :  { %30 = vadd.xlane.f32.xlu0 %v29_v4  ;;  %v32_v5 = vsel %vm28_vm0, %v27_v3, 0.0  ;;  %p201_p8 = scmp.ne.s32.totalorder %s139_s20, %s200_s21  ;;  %p206_p10 = scmp.lt.s32.totalorder %s200_s21, %s200_s21 }
  0x19   :  { %p207_p11 = por %p206_p10, %p205_p9 }
  0x1b   :  { %33 = vadd.xlane.f32.xlu0 %v32_v5  ;;  %p208_p12 = pnand %p207_p11, %p201_p8 }
  0xa4   :  { %v31_v7 = vpop.xlane.xlu0 %30 }
  0xa5   :  { %v35_v8 = vadd.f32 1e-12, %v31_v7 }
  0xa7   :  { %174 = vrsqrt.f32 %v35_v8 }
  0xa8   :  { %v34_v9 = vpop.xlane.xlu0 %33 }
  0xa9   :  { %v36_v10 = vadd.f32 1e-12, %v34_v9 }
  0xab   :  { %176 = vrsqrt.f32 %v36_v10 }
  0xb1   :  { %v175_v11 = vpop.eup %174 }
  0xb2   :  { %v39_v12 = vmul.f32 %v175_v11, %v24_v0 }
  0xb4   :  { %v41_v13 = vpack.c.bf16 %v39_v12, %v39_v12 }
  0xb5   :  { %v177_v14 = vpop.eup %176 }
  0xb6   :  { %v45_v15 = vsel %vm43_vm2, %v41_v13, 0  ;;  %v40_v16 = vmul.f32 %v177_v14, %v25_v1 }
  0xb7   :  { %157 = vmatpush3.bf16.xpose.msra.mxu0 %v45_v15 }
  0xb8   :  { %v42_v17 = vpack.c.bf16 %v40_v16, %v40_v16 }
  0xba   :  { %v88_v18 = vsel %vm43_vm2, %v42_v17, 0 }
  0xbb   :  { %163 = vmatpush3.bf16.xpose.msra.mxu1 %v88_v18 }
  0xbe   :  { %159 = vmatmul.mubr.msk.bf16.vlgmr.msra.gmra.mrb[0].mxu0 %vm43_vm2, %v41_v13 }
  0xc2   :  { %165 = vmatmul.mubr.msk.bf16.vlgmr.msra.gmra.mrb[0].mxu1 %vm43_vm2, %v42_v17 }
 0x191   :  { %v81_v19 = vpop.f32.mrb[0].mxu0 }
 0x192   :  { %131 = vst.msk [vmem:[#allocation5] sm:$0xf] %vm130_vm3, %v81_v19  ;;  %v160_v20 = vpop.f32.mrb[1].mxu0 }
 0x193   :  { %v84_v21 = vpop.f32.mrb[2].mxu0 }
 0x194   :  { %v161_v22 = vpop.f32.mrb[3].mxu0 }
 0x195   :  { %v124_v23 = vpop.f32.mrb[0].mxu1 }
 0x196   :  { %132 = vst.msk [vmem:[#allocation5 + $0x4] sm:$0xf] %vm130_vm3, %v124_v23  ;;  %v166_v24 = vpop.f32.mrb[1].mxu1 }
 0x197   :  { %v127_v25 = vpop.f32.mrb[2].mxu1 }
 0x198   :  { %211 = shalt.err (!%p208_p12)
}
 0x199   :  { %s212_s24 = scalar_lea.hbm %s273_s1, 128 }
 0x19a   :  { %p213_p13 = scmp.ne.s32.totalorder %s273_s1, %s212_s24  ;;  %p216_p0 = scmp.lt.u32.totalorder %s212_s24, %s273_s1 }
 0x19c   :  { %p218_p1 = pnand %p216_p0, %p213_p13 }
 0x19e   :  { %221 = shalt.err (!%p218_p1)
}
 0x19f   :  { %144 = dma.vmem_to_hbm [thread:$0]  %s139_s20, 128, %s273_s1, [#allocation4], %s227_s16, %s227_s16, %s228_s17   ;;  %v167_v26 = vpop.f32.mrb[3].mxu1 }
 0x1a0   :  { %224 = dma.done.wait [#allocation4], 128  }
 0x1a1   :  { %225 = vsyncadd [#allocation4], 4294967168 }
 0x1a2   :  { %148 = vsyncpa [#allocation3], 1 }
 0x1a3   :  { %149 = vsyncpa [#allocation4], 1 }

// kernel: s4gnn_forward.5
= control target key start
LH: loop header
LB: loop body
LE: loop exit
PB: predicated region body
PF: predicated region fallthrough
CT: control target
= control target key end

     0   :  { %s1130_s0 = inlined_call_operand.hbm [shape: f32[2,4,4], index: 0, kind: input, shape index: {}]   ;;  %s1131_s1 = inlined_call_operand.hbm [shape: f32[2,4,32], index: 1, kind: input, shape index: {}]   ;;  %s1132_s2 = inlined_call_operand.hbm [shape: bf16[32,32], index: 2, kind: input, shape index: {}]   ;;  %s1133_s3 = inlined_call_operand.hbm [shape: f32[1,32], index: 3, kind: input, shape index: {}]   ;;  %s1134_s4 = inlined_call_operand.hbm [shape: bf16[32,32], index: 4, kind: input, shape index: {}]   ;;  %s1135_s5 = inlined_call_operand.hbm [shape: f32[1,32], index: 5, kind: input, shape index: {}]   ;;  %s1136_s6 = inlined_call_operand.hbm [shape: bf16[32,1], index: 6, kind: input, shape index: {}]   ;;  %s1137_s7 = inlined_call_operand.<no memory space> [shape: f32[1,1], index: 7, kind: input, shape index: {}]   ;;  %s1138_s8 = inlined_call_operand.hbm [shape: f32[2,1], index: 8, kind: output, shape index: {}]  }
   0x1   :  { %v13_v0 = vstv %s1137_s7 }
   0x2   :  { %14 = vst [vmem:[#allocation2] sm:$0x1] %v13_v0 }
   0x3   :  { %15 = vsyncpa [#allocation4], 0 }
   0x4   :  { %16 = vsyncpa [#allocation7], 0 }
   0x5   :  { %17 = vsyncpa [#allocation10], 0 }
   0x6   :  { %18 = vsyncpa [#allocation13], 0 }
   0x7   :  { %19 = vsyncpa [#allocation5], 0  ;;  %s902_s29 = smov [#allocation6]   ;;  %s903_s9 = smov [#allocation9]  }
   0x8   :  { %s37_s30 = sshll.u32 %s902_s29, 4  ;;  %s62_s10 = sshll.u32 %s903_s9, 4  ;;  %s38_s30 = int_to_ptr.vmem [resolvable:$true] %s37_s30  ;;  %s962_s10 = int_to_ptr.vmem [resolvable:$true] %s62_s10 }
   0x9   :  { %s716_s13 = scalar_lea.hbm %s1131_s1, 128 }
   0xa   :  { %p717_p0 = scmp.ne.s32.totalorder %s1131_s1, %s716_s13  ;;  %p720_p1 = scmp.lt.u32.totalorder %s716_s13, %s1131_s1 }
   0xc   :  { %p722_p2 = pnand %p720_p1, %p717_p0 }
   0xe   :  { %725 = shalt.err (!%p722_p2)
}
   0xf   :  { %s726_s17 = scalar_lea.vmem %s38_s30, 128  ;;  %p731_p4 = scmp.lt.s32.totalorder %s38_s30, %s38_s30 }
  0x10   :  { %p727_p3 = scmp.ne.s32.totalorder %s38_s30, %s726_s17  ;;  %p732_p5 = scmp.lt.s32.totalorder %s726_s17, %s726_s17 }
  0x12   :  { %p733_p6 = por %p732_p5, %p731_p4 }
  0x14   :  { %p734_p7 = pnand %p733_p6, %p727_p3 }
  0x16   :  { %737 = shalt.err (!%p734_p7)
}
  0x17   :  { %s904_s18 = smov 64   ;;  %s905_s19 = smov 4  }
  0x18   :  { %43 = dma.hbm_to_vmem [thread:$0]  %s1131_s1, 128, %s38_s30, [#allocation7], %s904_s18, %s904_s18, %s905_s19  }
  0x19   :  { %s738_s24 = scalar_lea.hbm %s1133_s3, 16 }
  0x1a   :  { %p739_p8 = scmp.ne.s32.totalorder %s1133_s3, %s738_s24  ;;  %p742_p9 = scmp.lt.u32.totalorder %s738_s24, %s1133_s3 }
  0x1c   :  { %p744_p10 = pnand %p742_p9, %p739_p8 }
  0x1e   :  { %747 = shalt.err (!%p744_p10)
}
  0x1f   :  { %s748_s29 = scalar_lea.vmem %s962_s10, 16  ;;  %s752_s1 = scalar_lea.vmem %s962_s10, 32 }
  0x20   :  { %p749_p11 = scmp.ne.s32.totalorder %s962_s10, %s748_s29  ;;  %p753_p12 = scmp.lt.s32.totalorder %s962_s10, %s962_s10 }
  0x21   :  { %p754_p13 = scmp.lt.s32.totalorder %s752_s1, %s748_s29 }
  0x23   :  { %p755_p0 = por %p754_p13, %p753_p12 }
  0x25   :  { %p756_p1 = pnand %p755_p0, %p749_p11 }
  0x27   :  { %759 = shalt.err (!%p756_p1)
}
  0x28   :  { %65 = dma.hbm_to_vmem [thread:$0]  %s1133_s3, 16, %s962_s10, [#allocation10]  }
  0x29   :  { %s906_s11 = smov [#allocation12]   ;;  %s907_s13 = smov [#allocation3]  }
  0x2a   :  { %s84_s12 = sshll.u32 %s906_s11, 4  ;;  %s25_s14 = sshll.u32 %s907_s13, 4  ;;  %s85_s12 = int_to_ptr.vmem [resolvable:$true] %s84_s12  ;;  %s997_s14 = int_to_ptr.vmem [resolvable:$true] %s25_s14 }
  0x2b   :  { %s760_s16 = scalar_lea.hbm %s1135_s5, 16 }
  0x2c   :  { %p761_p2 = scmp.ne.s32.totalorder %s1135_s5, %s760_s16  ;;  %p764_p3 = scmp.lt.u32.totalorder %s760_s16, %s1135_s5 }
  0x2e   :  { %p766_p4 = pnand %p764_p3, %p761_p2 }
  0x30   :  { %769 = shalt.err (!%p766_p4)
}
  0x31   :  { %s770_s3 = scalar_lea.vmem %s85_s12, 16  ;;  %s774_s10 = scalar_lea.vmem %s85_s12, 32 }
  0x32   :  { %p771_p5 = scmp.ne.s32.totalorder %s85_s12, %s770_s3  ;;  %p775_p6 = scmp.lt.s32.totalorder %s85_s12, %s85_s12 }
  0x33   :  { %p776_p7 = scmp.lt.s32.totalorder %s774_s10, %s770_s3 }
  0x35   :  { %p777_p8 = por %p776_p7, %p775_p6 }
  0x37   :  { %p778_p9 = pnand %p777_p8, %p771_p5 }
  0x39   :  { %781 = shalt.err (!%p778_p9)
}
  0x3a   :  { %87 = dma.hbm_to_vmem [thread:$0]  %s1135_s5, 16, %s85_s12, [#allocation13]  }
  0x3b   :  { %s782_s27 = scalar_lea.hbm %s1130_s0, 128 }
  0x3c   :  { %p783_p10 = scmp.ne.s32.totalorder %s1130_s0, %s782_s27  ;;  %p786_p11 = scmp.lt.u32.totalorder %s782_s27, %s1130_s0 }
  0x3e   :  { %p788_p12 = pnand %p786_p11, %p783_p10 }
  0x40   :  { %791 = shalt.err (!%p788_p12)
}
  0x41   :  { %s792_s9 = scalar_lea.vmem %s997_s14, 128  ;;  %p797_p0 = scmp.lt.s32.totalorder %s997_s14, %s997_s14 }
  0x42   :  { %p793_p13 = scmp.ne.s32.totalorder %s997_s14, %s792_s9  ;;  %p798_p1 = scmp.lt.s32.totalorder %s792_s9, %s792_s9 }
  0x44   :  { %p799_p2 = por %p798_p1, %p797_p0 }
  0x46   :  { %p800_p3 = pnand %p799_p2, %p793_p13 }
  0x48   :  { %803 = shalt.err (!%p800_p3)
}
  0x49   :  { %31 = dma.hbm_to_vmem [thread:$0]  %s1130_s0, 128, %s997_s14, [#allocation4], %s904_s18, %s904_s18, %s905_s19  }
  0x4a   :  { %s908_s12 = smov [#allocation8]   ;;  %s909_s15 = smov [#allocation11]  }
  0x4b   :  { %s49_s13 = sshll.u32 %s908_s12, 4  ;;  %s71_s7 = sshll.u32 %s909_s15, 4  ;;  %s50_s13 = int_to_ptr.vmem [resolvable:$true] %s49_s13  ;;  %s1031_s7 = int_to_ptr.vmem [resolvable:$true] %s71_s7 }
  0x4c   :  { %s804_s20 = scalar_lea.hbm %s1132_s2, 256 }
  0x4d   :  { %p805_p4 = scmp.ne.s32.totalorder %s1132_s2, %s804_s20  ;;  %p808_p5 = scmp.lt.u32.totalorder %s804_s20, %s1132_s2 }
  0x4f   :  { %p810_p6 = pnand %p808_p5, %p805_p4 }
  0x51   :  { %813 = shalt.err (!%p810_p6)
}
  0x52   :  { %s814_s0 = scalar_lea.vmem %s50_s13, 256  ;;  %p819_p8 = scmp.lt.s32.totalorder %s50_s13, %s50_s13 }
  0x53   :  { %p815_p7 = scmp.ne.s32.totalorder %s50_s13, %s814_s0  ;;  %p820_p9 = scmp.lt.s32.totalorder %s814_s0, %s814_s0 }
  0x55   :  { %p821_p10 = por %p820_p9, %p819_p8 }
  0x57   :  { %p822_p11 = pnand %p821_p10, %p815_p7 }
  0x59   :  { %825 = shalt.err (!%p822_p11)
}
  0x5a   :  { %55 = dma.hbm_to_vmem [thread:$0]  %s1132_s2, 256, %s50_s13, [#allocation7], %s904_s18, %s904_s18, %s905_s19  }
  0x5b   :  { %s826_s26 = scalar_lea.hbm %s1134_s4, 256 }
  0x5c   :  { %p827_p12 = scmp.ne.s32.totalorder %s1134_s4, %s826_s26  ;;  %p830_p13 = scmp.lt.u32.totalorder %s826_s26, %s1134_s4 }
  0x5e   :  { %p832_p0 = pnand %p830_p13, %p827_p12 }
  0x60   :  { %835 = shalt.err (!%p832_p0)
}
  0x61   :  { %s836_s30 = scalar_lea.vmem %s1031_s7, 256  ;;  %p841_p2 = scmp.lt.s32.totalorder %s1031_s7, %s1031_s7 }
  0x62   :  { %p837_p1 = scmp.ne.s32.totalorder %s1031_s7, %s836_s30  ;;  %p842_p3 = scmp.lt.s32.totalorder %s836_s30, %s836_s30 }
  0x64   :  { %p843_p4 = por %p842_p3, %p841_p2 }
  0x66   :  { %p844_p5 = pnand %p843_p4, %p837_p1 }
  0x68   :  { %847 = shalt.err (!%p844_p5)
}
  0x69   :  { %77 = dma.hbm_to_vmem [thread:$0]  %s1134_s4, 256, %s1031_s7, [#allocation10], %s904_s18, %s904_s18, %s905_s19  }
  0x6a   :  { %s910_s5 = smov [#allocation14]   ;;  %s848_s15 = scalar_lea.hbm %s1136_s6, 256 }
  0x6b   :  { %s93_s11 = sshll.u32 %s910_s5, 4  ;;  %p849_p6 = scmp.ne.s32.totalorder %s1136_s6, %s848_s15  ;;  %s94_s11 = int_to_ptr.vmem [resolvable:$true] %s93_s11 }
  0x6c   :  { %p852_p7 = scmp.lt.u32.totalorder %s848_s15, %s1136_s6 }
  0x6e   :  { %p854_p8 = pnand %p852_p7, %p849_p6 }
  0x70   :  { %857 = shalt.err (!%p854_p8)
}
  0x71   :  { %s858_s22 = scalar_lea.vmem %s94_s11, 256  ;;  %p863_p10 = scmp.lt.s32.totalorder %s94_s11, %s94_s11 }
  0x72   :  { %p859_p9 = scmp.ne.s32.totalorder %s94_s11, %s858_s22  ;;  %p864_p11 = scmp.lt.s32.totalorder %s858_s22, %s858_s22 }
  0x74   :  { %p865_p12 = por %p864_p11, %p863_p10 }
  0x76   :  { %p866_p13 = pnand %p865_p12, %p859_p9 }
  0x78   :  { %869 = shalt.err (!%p866_p13)
}
  0x79   :  { %99 = dma.hbm_to_vmem [thread:$0]  %s1136_s6, 256, %s94_s11, [#allocation13], %s904_s18, %s904_s18, %s905_s19  }
  0x7a   :  { %892 = dma.done.wait [#allocation4], 128  }
  0x7b   :  { %893 = vsyncadd [#allocation4], 4294967168 }
  0x7c   :  { %894 = dma.done.wait [#allocation7], 384  }
  0x7d   :  { %895 = vsyncadd [#allocation7], 4294966912 }
  0x7e   :  { %896 = dma.done.wait [#allocation10], 272  }
  0x7f   :  { %897 = vsyncadd [#allocation10], 4294967024 }
  0x80   :  { %898 = dma.done.wait [#allocation13], 272  }
  0x81   :  { %899 = vsyncadd [#allocation13], 4294967024  ;;  %v911_v1 = vmov 0.0   ;;  %vm912_vm0 = vmmov 0   ;;  %v701_v2 = vld [vmem:[#allocation8] sm:$0xff]   ;;  %v702_v3 = vld [vmem:[#allocation8 + $0x8] sm:$0xff]  }
  0x82   :  { %641 = vmatprep.subr.bf16.mxu0 %v911_v1  ;;  %645 = vmatprep.mubr.msk.bf16.mxu0 %vm912_vm0, %v911_v1  ;;  %vm126_vm1 = vcmask 27648   ;;  %v703_v4 = vld [vmem:[#allocation6] sm:$0xff]   ;;  %v124_v5 = vld [vmem:[#allocation3] sm:$0xf]  ;;  %v125_v6 = vld [vmem:[#allocation3 + $0x4] sm:$0xf] }
  0x83   :  { %649 = vmatprep.subr.bf16.mxu1 %v911_v1  ;;  %651 = vmatprep.mubr.msk.bf16.mxu1 %vm912_vm0, %v911_v1  ;;  %v127_v7 = vsel %vm126_vm1, %v124_v5, 0.0  ;;  %v165_v8 = vpack.c.bf16 %v703_v4, %v703_v4  ;;  %vm182_vm2 = vcmask 261120   ;;  %v130_v9 = vsel %vm126_vm1, %v125_v6, 0.0  ;;  %v704_v47 = vld [vmem:[#allocation11] sm:$0xff]   ;;  %v705_v48 = vld [vmem:[#allocation11 + $0x8] sm:$0xff]   ;;  %s913_s6 = smov [#allocation15]  }
  0x84   :  { %642 = vmatpush3.bf16.msra.mxu0 %v701_v2  ;;  %128 = vadd.xlane.f32.xlu0 %v127_v7  ;;  %v137_v10 = vrot.slane %v127_v7, 4  ;;  %v143_v13 = vrot.slane %v130_v9, 4  ;;  %vm242_vm3 = vcmask 1041408   ;;  %vm238_vm4 = vcmask 31744   ;;  %v611_v53 = vld [vmem:[#allocation9] ss:$0 sm:$0xff] }
  0x85   :  { %643 = vmatprep.subr.bf16.mxu0 %v911_v1  ;;  %vm498_vm5 = vcmask 257024   ;;  %vm530_vm6 = vcmask 1041409   ;;  %s596_s18 = sshll.u32 %s913_s6, 4  ;;  %vm588_vm7 = vcmask 1024   ;;  %s597_s18 = int_to_ptr.vmem [resolvable:$true] %s596_s18 }
  0x86   :  { %v138_v11 = vadd.f32 %v137_v10, %v127_v7  ;;  %v144_v15 = vadd.f32 %v143_v13, %v130_v9  ;;  %v706_v10 = vld [vmem:[#allocation14] sm:$0xff]   ;;  %s870_s19 = scalar_lea.vmem %s597_s18, 32  ;;  %p875_p1 = scmp.lt.s32.totalorder %s597_s18, %s597_s18 }
  0x87   :  { %p871_p0 = scmp.ne.s32.totalorder %s597_s18, %s870_s19  ;;  %p876_p2 = scmp.lt.s32.totalorder %s870_s19, %s870_s19 }
  0x88   :  { %644 = vmatpush3.bf16.msra.mxu0 %v702_v3  ;;  %131 = vadd.xlane.f32.xlu0 %v130_v9  ;;  %v139_v12 = vrot.slane %v138_v11, 2  ;;  %v145_v17 = vrot.slane %v144_v15, 2 }
  0x89   :  { %661 = vmatprep.subr.bf16.mxu0 %v911_v1  ;;  %p877_p3 = por %p876_p2, %p875_p1 }
  0x8a   :  { %v140_v14 = vadd.f32 %v139_v12, %v138_v11  ;;  %v146_v20 = vadd.f32 %v145_v17, %v144_v15  ;;  %v707_v11 = vld [vmem:[#allocation14 + $0x8] sm:$0xff]   ;;  %v617_v12 = vld [vmem:[#allocation12] ss:$0 sm:$0xff] }
  0x8b   :  { %646 = vmatmul.mubr.msk.bf16.vlgmr.msra.gmra.mrb[0].mxu0 %vm182_vm2, %v165_v8  ;;  %p878_p4 = pnand %p877_p3, %p871_p0 }
  0x8c   :  { %665 = vmatprep.mubr.msk.bf16.mxu0 %vm912_vm0, %v911_v1  ;;  %v141_v16 = vrot.slane %v140_v14, 1  ;;  %v147_v23 = vrot.slane %v146_v20, 1  ;;  %662 = vmatpush3.bf16.msra.mxu0 %v704_v47 }
  0x8d   :  { %663 = vmatprep.subr.bf16.mxu0 %v911_v1 }
  0x8e   :  { %v142_v19 = vadd.f32 %v141_v16, %v140_v14  ;;  %v148_v25 = vadd.f32 %v147_v23, %v146_v20 }
  0x90   :  { %v149_v22 = vmax.f32 %v142_v19, 1e-12  ;;  %v150_v27 = vmax.f32 %v148_v25, 1e-12  ;;  %664 = vmatpush3.bf16.msra.mxu0 %v705_v48 }
  0x91   :  { %675 = vmatprep.subr.bf16.mxu0 %v911_v1 }
 0x111   :  { %v129_v18 = vpop.xlane.xlu0 %128 }
 0x112   :  { %v133_v21 = vmax.f32 %v129_v18, 1e-12 }
 0x114   :  { %708 = vrsqrt.f32 %v133_v21 }
 0x115   :  { %v132_v24 = vpop.xlane.xlu0 %131  ;;  %710 = vrsqrt.f32 %v149_v22 }
 0x116   :  { %v134_v26 = vmax.f32 %v132_v24, 1e-12 }
 0x118   :  { %712 = vrsqrt.f32 %v134_v26 }
 0x119   :  { %714 = vrsqrt.f32 %v150_v27 }
 0x11e   :  { %v709_v28 = vpop.eup %708 }
 0x11f   :  { %v153_v29 = vmul.f32 %v709_v28, %v124_v5  ;;  %v711_v30 = vpop.eup %710 }
 0x121   :  { %v155_v31 = vmul.f32 %v711_v30, %v153_v29 }
 0x122   :  { %v713_v32 = vpop.eup %712 }
 0x123   :  { %v154_v38 = vmul.f32 %v713_v32, %v125_v6  ;;  %v157_v42 = vpack.c.bf16 %v155_v31, %v155_v31  ;;  %v715_v43 = vpop.eup %714 }
 0x125   :  { %v156_v45 = vmul.f32 %v715_v43, %v154_v38 }
 0x127   :  { %v158_v46 = vpack.c.bf16 %v156_v45, %v156_v45 }
 0x15e   :  { %v220_v33 = vpop.f32.mrb[0].mxu0 }
 0x15f   :  { %v227_v34 = vcombine.high %v220_v33, %v220_v33  ;;  %v229_v35 = vpack.c.bf16 %v220_v33, %v220_v33  ;;  %v647_v36 = vpop.f32.mrb[1].mxu0 }
 0x160   :  { %v223_v37 = vpop.f32.mrb[2].mxu0 }
 0x161   :  { %v230_v39 = vpack.c.bf16 %v227_v34, %v227_v34  ;;  %v648_v40 = vpop.f32.mrb[3].mxu0  ;;  %v244_v41 = vsel %vm242_vm3, %v229_v35, 0 }
 0x162   :  { %650 = vmatpush3.bf16.msra.mxu1 %v244_v41 }
 0x163   :  { %655 = vmatprep.subr.bf16.mxu1 %v911_v1  ;;  %v290_v44 = vsel %vm242_vm3, %v230_v39, 0 }
 0x165   :  { %652 = vmatmul.mubr.msk.bf16.vlgmr.msra.gmra.mrb[0].mxu1 %vm238_vm4, %v157_v42 }
 0x166   :  { %656 = vmatpush3.bf16.msra.mxu1 %v290_v44  ;;  %657 = vmatprep.mubr.msk.bf16.mxu1 %vm912_vm0, %v911_v1  ;;  %v620_v44 = vld [vmem:[#allocation2] ss:$0 sm:$0xff] }
 0x167   :  { %669 = vmatprep.subr.bf16.mxu1 %v911_v1 }
 0x16d   :  { %658 = vmatmul.mubr.msk.bf16.vlgmr.msra.gmra.mrb[4].mxu1 %vm238_vm4, %v158_v46 }
 0x16e   :  { %671 = vmatprep.mubr.msk.bf16.mxu1 %vm912_vm0, %v911_v1 }
 0x238   :  { %v280_v49 = vpop.f32.mrb[0].mxu1 }
 0x239   :  { %v653_v50 = vpop.f32.mrb[1].mxu1  ;;  %v281_v54 = vadd.f32 %v611_v53, %v280_v49 }
 0x23a   :  { %v283_v51 = vpop.f32.mrb[2].mxu1 }
 0x23b   :  { %v654_v52 = vpop.f32.mrb[3].mxu1  ;;  %v332_v59 = vmax.f32 %v281_v54, 0.0 }
 0x240   :  { %v326_v55 = vpop.f32.mrb[4].mxu1 }
 0x241   :  { %v327_v56 = vadd.f32 %v611_v53, %v326_v55  ;;  %v659_v57 = vpop.f32.mrb[5].mxu1 }
 0x242   :  { %v329_v58 = vpop.f32.mrb[6].mxu1 }
 0x243   :  { %v333_v60 = vmax.f32 %v327_v56, 0.0  ;;  %v660_v61 = vpop.f32.mrb[7].mxu1 }
 0x245   :  { %v336_v62 = vcombine.low %v332_v59, %v333_v60 }
 0x247   :  { %v338_v63 = vpack.c.bf16 %v336_v62, %v336_v62 }
 0x249   :  { %666 = vmatmul.mubr.msk.bf16.vlgmr.msra.gmra.mrb[4].mxu0 %vm182_vm2, %v338_v63 }
 0x24a   :  { %677 = vmatprep.mubr.msk.bf16.mxu0 %vm912_vm0, %v911_v1 }
 0x31c   :  { %v392_v0 = vpop.f32.mrb[4].mxu0 }
 0x31d   :  { %v399_v2 = vcombine.high %v392_v0, %v392_v0  ;;  %v401_v3 = vpack.c.bf16 %v392_v0, %v392_v0  ;;  %v667_v4 = vpop.f32.mrb[5].mxu0 }
 0x31e   :  { %v395_v5 = vpop.f32.mrb[6].mxu0 }
 0x31f   :  { %v402_v6 = vpack.c.bf16 %v399_v2, %v399_v2  ;;  %v668_v7 = vpop.f32.mrb[7].mxu0  ;;  %v411_v8 = vsel %vm242_vm3, %v401_v3, 0 }
 0x320   :  { %670 = vmatpush3.bf16.msra.mxu1 %v411_v8 }
 0x321   :  { %v454_v9 = vsel %vm242_vm3, %v402_v6, 0  ;;  %681 = vmatprep.subr.bf16.mxu1 %v911_v1 }
 0x322   :  { %676 = vmatpush3.bf16.msra.mxu0 %v454_v9 }
 0x323   :  { %672 = vmatmul.mubr.msk.bf16.vlgmr.msra.gmra.mrb[8].mxu1 %vm238_vm4, %v157_v42 }
 0x324   :  { %685 = vmatprep.mubr.msk.bf16.mxu1 %vm912_vm0, %v911_v1  ;;  %682 = vmatpush3.bf16.msra.mxu1 %v706_v10 }
 0x325   :  { %678 = vmatmul.mubr.msk.bf16.vlgmr.msra.gmra.mrb[8].mxu0 %vm238_vm4, %v158_v46  ;;  %683 = vmatprep.subr.bf16.mxu1 %v911_v1 }
 0x328   :  { %684 = vmatpush3.bf16.msra.mxu1 %v707_v11 }
 0x3f6   :  { %v447_v13 = vpop.f32.mrb[8].mxu1 }
 0x3f7   :  { %v448_v14 = vadd.f32 %v617_v12, %v447_v13  ;;  %v673_v15 = vpop.f32.mrb[9].mxu1 }
 0x3f8   :  { %v450_v16 = vpop.f32.mrb[10].mxu1  ;;  %v490_v17 = vpop.f32.mrb[8].mxu0 }
 0x3f9   :  { %v496_v18 = vmax.f32 %v448_v14, 0.0  ;;  %v491_v19 = vadd.f32 %v617_v12, %v490_v17  ;;  %v674_v20 = vpop.f32.mrb[11].mxu1  ;;  %v679_v21 = vpop.f32.mrb[9].mxu0 }
 0x3fa   :  { %v493_v22 = vpop.f32.mrb[10].mxu0 }
 0x3fb   :  { %v499_v23 = vsel %vm498_vm5, %v496_v18, 0.0  ;;  %v497_v24 = vmax.f32 %v491_v19, 0.0  ;;  %v680_v25 = vpop.f32.mrb[11].mxu0 }
 0x3fc   :  { %v500_v26 = vrot.slane %v499_v23, 4 }
 0x3fd   :  { %v506_v27 = vsel %vm498_vm5, %v497_v24, 0.0 }
 0x3fe   :  { %v501_v1 = vadd.f32 %v500_v26, %v499_v23  ;;  %v507_v28 = vrot.slane %v506_v27, 4 }
 0x400   :  { %v502_v29 = vrot.slane %v501_v1, 2  ;;  %v508_v30 = vadd.f32 %v507_v28, %v506_v27 }
 0x402   :  { %v503_v31 = vadd.f32 %v502_v29, %v501_v1  ;;  %v509_v32 = vrot.slane %v508_v30, 2 }
 0x404   :  { %v504_v33 = vrot.slane %v503_v31, 1  ;;  %v510_v34 = vadd.f32 %v509_v32, %v508_v30 }
 0x406   :  { %v505_v35 = vadd.f32 %v504_v33, %v503_v31  ;;  %v511_v36 = vrot.slane %v510_v34, 1 }
 0x408   :  { %v513_v37 = vpack.c.bf16 %v505_v35, %v505_v35  ;;  %v512_v38 = vadd.f32 %v511_v36, %v510_v34 }
 0x40a   :  { %v514_v39 = vpack.c.bf16 %v512_v38, %v512_v38  ;;  %v528_v40 = vunpack.c.l.b16 %v513_v37 }
 0x40c   :  { %v529_v41 = vunpack.c.l.b16 %v514_v39 }
 0x40e   :  { %v531_v42 = vsel %vm530_vm6, %v529_v41, %v528_v40 }
 0x40f   :  { %v532_v43 = vpack.c.b16 %v531_v42, %v531_v42 }
 0x411   :  { %686 = vmatmul.mubr.msk.bf16.vlgmr.msra.gmra.mrb[12].mxu1 %vm182_vm2, %v532_v43 }
 0x4e4   :  { %v582_v45 = vpop.f32.mrb[12].mxu1 }
 0x4e5   :  { %v583_v46 = vadd.f32 %v620_v44, %v582_v45  ;;  %v687_v47 = vpop.f32.mrb[13].mxu1 }
 0x4e6   :  { %v585_v48 = vpop.f32.mrb[14].mxu1 }
 0x4e7   :  { %v688_v49 = vpop.f32.mrb[15].mxu1  ;;  %589 = vst.msk [vmem:[#allocation15] sm:$0x3] %vm588_vm7, %v583_v46 }
 0x4e8   :  { %881 = shalt.err (!%p878_p4)
}
 0x4e9   :  { %s882_s0 = scalar_lea.hbm %s1138_s8, 32 }
 0x4ea   :  { %p883_p5 = scmp.ne.s32.totalorder %s1138_s8, %s882_s0  ;;  %p886_p6 = scmp.lt.u32.totalorder %s882_s0, %s1138_s8 }
 0x4ec   :  { %p888_p7 = pnand %p886_p6, %p883_p5 }
 0x4ee   :  { %891 = shalt.err (!%p888_p7)
}
 0x4ef   :  { %599 = dma.vmem_to_hbm [thread:$0]  %s597_s18, 32, %s1138_s8, [#allocation5]  }
 0x4f0   :  { %900 = dma.done.wait [#allocation5], 32  }
 0x4f1   :  { %901 = vsyncadd [#allocation5], 4294967264 }
 0x4f2   :  { %603 = vsyncpa [#allocation4], 1 }
 0x4f3   :  { %604 = vsyncpa [#allocation7], 1 }
 0x4f4   :  { %605 = vsyncpa [#allocation10], 1 }
 0x4f5   :  { %606 = vsyncpa [#allocation13], 1 }
 0x4f6   :  { %607 = vsyncpa [#allocation5], 1 }

// kernel: s4gnn_forward.4
= control target key start
LH: loop header
LB: loop body
LE: loop exit
PB: predicated region body
PF: predicated region fallthrough
CT: control target
= control target key end

     0   :  { %10 = vsyncpa [#allocation7], 0  ;;  %s2824_s0 = inlined_call_operand.hbm [shape: f32[8,8,4], index: 0, kind: input, shape index: {}]   ;;  %s2825_s1 = inlined_call_operand.hbm [shape: bf16[3,4,32], index: 1, kind: input, shape index: {}]   ;;  %s2826_s2 = inlined_call_operand.hbm [shape: bf16[3,32,32], index: 2, kind: input, shape index: {}]   ;;  %s2827_s3 = inlined_call_operand.hbm [shape: f32[3,1,32], index: 3, kind: input, shape index: {}]   ;;  %s2828_s4 = inlined_call_operand.hbm [shape: f32[3,1,32], index: 4, kind: input, shape index: {}]   ;;  %s2829_s5 = inlined_call_operand.hbm [shape: f32[8,32], index: 5, kind: output, shape index: {}]  }
   0x1   :  { %11 = vsyncpa [#allocation10], 0 }
   0x2   :  { %12 = vsyncpa [#allocation13], 0 }
   0x3   :  { %13 = vsyncpa [#allocation8], 0  ;;  %s2364_s18 = smov [#allocation9]   ;;  %s2224_s22 = scalar_lea.hbm %s2825_s1, 96 }
   0x4   :  { %s31_s19 = sshll.u32 %s2364_s18, 4  ;;  %p2225_p0 = scmp.ne.s32.totalorder %s2825_s1, %s2224_s22  ;;  %s32_s19 = int_to_ptr.vmem [resolvable:$true] %s31_s19 }
   0x5   :  { %p2228_p1 = scmp.lt.u32.totalorder %s2224_s22, %s2825_s1 }
   0x7   :  { %p2230_p2 = pnand %p2228_p1, %p2225_p0 }
   0x9   :  { %2233 = shalt.err (!%p2230_p2)
}
   0xa   :  { %s2234_s27 = scalar_lea.vmem %s32_s19, 96  ;;  %p2239_p4 = scmp.lt.s32.totalorder %s32_s19, %s32_s19 }
   0xb   :  { %p2235_p3 = scmp.ne.s32.totalorder %s32_s19, %s2234_s27  ;;  %p2240_p5 = scmp.lt.s32.totalorder %s2234_s27, %s2234_s27 }
   0xd   :  { %p2241_p6 = por %p2240_p5, %p2239_p4 }
   0xf   :  { %p2242_p7 = pnand %p2241_p6, %p2235_p3 }
  0x11   :  { %2245 = shalt.err (!%p2242_p7)
}
  0x12   :  { %s2365_s28 = smov 32   ;;  %s2366_s29 = smov 2  }
  0x13   :  { %37 = dma.hbm_to_vmem [thread:$0]  %s2825_s1, 96, %s32_s19, [#allocation10], %s2365_s28, %s2365_s28, %s2366_s29  }
  0x14   :  { %s2367_s7 = smov [#allocation12]   ;;  %s2246_s11 = scalar_lea.hbm %s2827_s3, 48 }
  0x15   :  { %s55_s8 = sshll.u32 %s2367_s7, 4  ;;  %p2247_p8 = scmp.ne.s32.totalorder %s2827_s3, %s2246_s11  ;;  %s56_s8 = int_to_ptr.vmem [resolvable:$true] %s55_s8 }
  0x16   :  { %p2250_p9 = scmp.lt.u32.totalorder %s2246_s11, %s2827_s3 }
  0x18   :  { %p2252_p10 = pnand %p2250_p9, %p2247_p8 }
  0x1a   :  { %2255 = shalt.err (!%p2252_p10)
}
  0x1b   :  { %s2256_s16 = scalar_lea.vmem %s56_s8, 48  ;;  %s2260_s1 = scalar_lea.vmem %s56_s8, 64 }
  0x1c   :  { %p2257_p11 = scmp.ne.s32.totalorder %s56_s8, %s2256_s16  ;;  %p2261_p12 = scmp.lt.s32.totalorder %s56_s8, %s56_s8 }
  0x1d   :  { %p2262_p13 = scmp.lt.s32.totalorder %s2260_s1, %s2256_s16 }
  0x1f   :  { %p2263_p0 = por %p2262_p13, %p2261_p12 }
  0x21   :  { %p2264_p1 = pnand %p2263_p0, %p2257_p11 }
  0x23   :  { %2267 = shalt.err (!%p2264_p1)
}
  0x24   :  { %s2368_s17 = smov 16   ;;  %s2369_s18 = smov 1  }
  0x25   :  { %61 = dma.hbm_to_vmem [thread:$0]  %s2827_s3, 48, %s56_s8, [#allocation13], %s2368_s17, %s2368_s17, %s2369_s18  }
  0x26   :  { %s2370_s21 = smov [#allocation6]   ;;  %s2268_s25 = scalar_lea.hbm %s2824_s0, 1024 }
  0x27   :  { %s19_s22 = sshll.u32 %s2370_s21, 4  ;;  %p2269_p2 = scmp.ne.s32.totalorder %s2824_s0, %s2268_s25  ;;  %s20_s22 = int_to_ptr.vmem [resolvable:$true] %s19_s22 }
  0x28   :  { %p2272_p3 = scmp.lt.u32.totalorder %s2268_s25, %s2824_s0 }
  0x2a   :  { %p2274_p4 = pnand %p2272_p3, %p2269_p2 }
  0x2c   :  { %2277 = shalt.err (!%p2274_p4)
}
  0x2d   :  { %s2278_s30 = scalar_lea.vmem %s20_s22, 1024  ;;  %p2283_p6 = scmp.lt.s32.totalorder %s20_s22, %s20_s22 }
  0x2e   :  { %p2279_p5 = scmp.ne.s32.totalorder %s20_s22, %s2278_s30  ;;  %p2284_p7 = scmp.lt.s32.totalorder %s2278_s30, %s2278_s30 }
  0x30   :  { %p2285_p8 = por %p2284_p7, %p2283_p6 }
  0x32   :  { %p2286_p9 = pnand %p2285_p8, %p2279_p5 }
  0x34   :  { %2289 = shalt.err (!%p2286_p9)
}
  0x35   :  { %s2371_s3 = smov 128   ;;  %s2372_s6 = smov 8  }
  0x36   :  { %25 = dma.hbm_to_vmem [thread:$0]  %s2824_s0, 1024, %s20_s22, [#allocation7], %s2371_s3, %s2371_s3, %s2372_s6  }
  0x37   :  { %s2373_s9 = smov [#allocation11]   ;;  %s2290_s13 = scalar_lea.hbm %s2826_s2, 768 }
  0x38   :  { %s43_s10 = sshll.u32 %s2373_s9, 4  ;;  %p2291_p10 = scmp.ne.s32.totalorder %s2826_s2, %s2290_s13  ;;  %s44_s10 = int_to_ptr.vmem [resolvable:$true] %s43_s10 }
  0x39   :  { %p2294_p11 = scmp.lt.u32.totalorder %s2290_s13, %s2826_s2 }
  0x3b   :  { %p2296_p12 = pnand %p2294_p11, %p2291_p10 }
  0x3d   :  { %2299 = shalt.err (!%p2296_p12)
}
  0x3e   :  { %s2300_s19 = scalar_lea.vmem %s44_s10, 768  ;;  %p2305_p0 = scmp.lt.s32.totalorder %s44_s10, %s44_s10 }
  0x3f   :  { %p2301_p13 = scmp.ne.s32.totalorder %s44_s10, %s2300_s19  ;;  %p2306_p1 = scmp.lt.s32.totalorder %s2300_s19, %s2300_s19 }
  0x41   :  { %p2307_p2 = por %p2306_p1, %p2305_p0 }
  0x43   :  { %p2308_p3 = pnand %p2307_p2, %p2301_p13 }
  0x45   :  { %2311 = shalt.err (!%p2308_p3)
}
  0x46   :  { %s2374_s0 = smov 64   ;;  %s2375_s20 = smov 4  }
  0x47   :  { %49 = dma.hbm_to_vmem [thread:$0]  %s2826_s2, 768, %s44_s10, [#allocation10], %s2374_s0, %s2374_s0, %s2375_s20  }
  0x48   :  { %s2376_s23 = smov [#allocation14]   ;;  %s2312_s27 = scalar_lea.hbm %s2828_s4, 48 }
  0x49   :  { %s67_s24 = sshll.u32 %s2376_s23, 4  ;;  %p2313_p4 = scmp.ne.s32.totalorder %s2828_s4, %s2312_s27  ;;  %s68_s24 = int_to_ptr.vmem [resolvable:$true] %s67_s24 }
  0x4a   :  { %p2316_p5 = scmp.lt.u32.totalorder %s2312_s27, %s2828_s4 }
  0x4c   :  { %p2318_p6 = pnand %p2316_p5, %p2313_p4 }
  0x4e   :  { %2321 = shalt.err (!%p2318_p6)
}
  0x4f   :  { %s2322_s6 = scalar_lea.vmem %s68_s24, 48  ;;  %s2326_s2 = scalar_lea.vmem %s68_s24, 64 }
  0x50   :  { %p2323_p7 = scmp.ne.s32.totalorder %s68_s24, %s2322_s6  ;;  %p2327_p8 = scmp.lt.s32.totalorder %s68_s24, %s68_s24 }
  0x51   :  { %p2328_p9 = scmp.lt.s32.totalorder %s2326_s2, %s2322_s6 }
  0x53   :  { %p2329_p10 = por %p2328_p9, %p2327_p8 }
  0x55   :  { %p2330_p11 = pnand %p2329_p10, %p2323_p7 }
  0x57   :  { %2333 = shalt.err (!%p2330_p11)
}
  0x58   :  { %73 = dma.hbm_to_vmem [thread:$0]  %s2828_s4, 48, %s68_s24, [#allocation13], %s2368_s17, %s2368_s17, %s2369_s18  }
  0x59   :  { %2356 = dma.done.wait [#allocation7], 1024  }
  0x5a   :  { %2357 = vsyncadd [#allocation7], 4294966272 }
  0x5b   :  { %2358 = dma.done.wait [#allocation10], 864  }
  0x5c   :  { %2359 = vsyncadd [#allocation10], 4294966432 }
  0x5d   :  { %2360 = dma.done.wait [#allocation13], 96  }
  0x5e   :  { %2361 = vsyncadd [#allocation13], 4294967200  ;;  %vm94_vm0 = vcmask 261120   ;;  %v2377_v0 = vmov 0.0   ;;  %vm130_vm1 = vcmask 1041408   ;;  %v97_v3 = vld [vmem:[#allocation6] sm:$0xff] }
  0x5f   :  { %95 = vst.msk [vmem:[#allocation5] sm:$0xff] %vm94_vm0, %v2377_v0  ;;  %96 = vst.msk [vmem:[#allocation15] sm:$0xff] %vm94_vm0, %v2377_v0  ;;  %v217_v1 = vld [vmem:[#allocation9 + $0x2] sm:$0x3]  ;;  %v109_v2 = vld [vmem:[#allocation9] sm:$0x3] }
  0x60   :  { %2116 = vmatprep.subr.msk.bf16.mxu1 %vm130_vm1, %v217_v1  ;;  %2115 = vmatprep.subr.msk.bf16.mxu0 %vm130_vm1, %v109_v2  ;;  %v227_v4 = vsel %vm130_vm1, %v217_v1, 0  ;;  %v132_v5 = vsel %vm130_vm1, %v109_v2, 0  ;;  %v98_v6 = vld [vmem:[#allocation6 + $0x8] sm:$0xff]  ;;  %vm117_vm2 = vcmask 31744   ;;  %v99_v7 = vld [vmem:[#allocation6 + $0x10] sm:$0xff]  ;;  %v100_v8 = vld [vmem:[#allocation6 + $0x18] sm:$0xff] }
  0x61   :  { %1904 = vmatpush3.bf16.msra.mxu1 %v227_v4  ;;  %1894 = vmatpush3.bf16.msra.mxu0 %v132_v5  ;;  %v105_v9 = vpack.c.bf16 %v98_v6, %v97_v3  ;;  %v106_v10 = vpack.c.bf16 %v100_v8, %v99_v7  ;;  %v2484_v11 = vld [vmem:[#allocation11] sm:$0xff]   ;;  %v103_v15 = vld [vmem:[#allocation6 + $0x30] sm:$0xff]  ;;  %v104_v16 = vld [vmem:[#allocation6 + $0x38] sm:$0xff]  ;;  %vm2378_vm3 = vmmov 0   ;;  %vm207_vm4 = vcmask 257024   ;;  %s2379_s4 = smov [#allocation15]  }
  0x62   :  { %1923 = vmatprep.subr.bf16.mxu1 %v2377_v0  ;;  %v101_v12 = vld [vmem:[#allocation6 + $0x20] sm:$0xff]  ;;  %v102_v13 = vld [vmem:[#allocation6 + $0x28] sm:$0xff]  ;;  %v108_v20 = vpack.c.bf16 %v104_v16, %v103_v15  ;;  %v2511_v23 = vld [vmem:[#allocation11 + $0x10] sm:$0xff]   ;;  %s1731_s17 = sshll.u32 %s2379_s4, 4  ;;  %s1732_s17 = int_to_ptr.vmem [resolvable:$true] %s1731_s17 }
  0x63   :  { %1905 = vmatprep.mubr.msk.bf16.mxu1 %vm117_vm2, %v105_v9  ;;  %1895 = vmatprep.mubr.msk.bf16.mxu0 %vm117_vm2, %v105_v9  ;;  %v107_v14 = vpack.c.bf16 %v102_v13, %v101_v12  ;;  %v311_v17 = vld [vmem:[#allocation9 + $0x4] sm:$0x3]  ;;  %v2493_v18 = vld [vmem:[#allocation11 + $0x8] sm:$0xff]   ;;  %v2513_v24 = vld [vmem:[#allocation11 + $0x20] sm:$0xff]   ;;  %s2334_s18 = scalar_lea.vmem %s1732_s17, 128  ;;  %p2339_p13 = scmp.lt.s32.totalorder %s1732_s17, %s1732_s17 }
  0x64   :  { %1906 = vmatmul.mubr.msk.bf16.vlgmr.msra.gmra.mrb[0].mxu1 %vm117_vm2, %v106_v10  ;;  %1896 = vmatmul.mubr.msk.bf16.vlgmr.msra.gmra.mrb[0].mxu0 %vm117_vm2, %v106_v10  ;;  %v321_v19 = vsel %vm130_vm1, %v311_v17, 0  ;;  %v2518_v25 = vld [vmem:[#allocation11 + $0x18] sm:$0xff]   ;;  %v2524_v26 = vld [vmem:[#allocation11 + $0x28] sm:$0xff]   ;;  %v1747_v27 = vld [vmem:[#allocation12 + $0x1] ss:$0 sm:$0xff]  ;;  %p2335_p12 = scmp.ne.s32.totalorder %s1732_s17, %s2334_s18  ;;  %p2340_p0 = scmp.lt.s32.totalorder %s2334_s18, %s2334_s18 }
  0x65   :  { %1924 = vmatpush3.bf16.msra.mxu1 %v2484_v11  ;;  %1909 = vmatprep.mubr.msk.bf16.mxu1 %vm117_vm2, %v107_v14  ;;  %v1742_v28 = vld [vmem:[#allocation12] ss:$0 sm:$0xff]  ;;  %v1752_v16 = vld [vmem:[#allocation12 + $0x2] ss:$0 sm:$0xff] }
  0x66   :  { %1925 = vmatprep.subr.bf16.mxu1 %v2377_v0  ;;  %2117 = vmatprep.subr.msk.bf16.mxu0 %vm130_vm1, %v311_v17  ;;  %v2506_v21 = vld [vmem:[#allocation5] sm:$0xff]  ;;  %p2341_p1 = por %p2340_p0, %p2339_p13 }
  0x67   :  { %1914 = vmatpush3.bf16.msra.mxu0 %v321_v19  ;;  %1899 = vmatprep.mubr.msk.bf16.mxu0 %vm117_vm2, %v107_v14  ;;  %v425_v22 = vpack.c.bf16 %v2506_v21, %v2506_v21 }
  0x68   :  { %1939 = vmatprep.subr.bf16.mxu0 %v2377_v0  ;;  %p2342_p2 = pnand %p2341_p1, %p2335_p12 }
  0x69   :  { %1926 = vmatpush3.bf16.msra.mxu1 %v2493_v18 }
  0x6a   :  { %1931 = vmatprep.subr.bf16.mxu1 %v2377_v0 }
  0x6c   :  { %1910 = vmatmul.mubr.msk.bf16.gmra.mrb[4].mxu1 %vm117_vm2, %v108_v20  ;;  %1900 = vmatmul.mubr.msk.bf16.gmra.mrb[4].mxu0 %vm117_vm2, %v108_v20 }
  0x6d   :  { %1927 = vmatprep.mubr.msk.bf16.mxu1 %vm2378_vm3, %v2377_v0  ;;  %1915 = vmatprep.mubr.msk.bf16.mxu0 %vm117_vm2, %v105_v9 }
  0x74   :  { %1928 = vmatmul.mubr.msk.bf16.vlgmr.msra.gmra.mrb[8].mxu1 %vm94_vm0, %v425_v22  ;;  %1916 = vmatmul.mubr.msk.bf16.vlgmr.msra.gmra.mrb[8].mxu0 %vm117_vm2, %v106_v10 }
  0x75   :  { %1932 = vmatpush3.bf16.msra.mxu1 %v2511_v23  ;;  %1935 = vmatprep.mubr.msk.bf16.mxu1 %vm2378_vm3, %v2377_v0 }
  0x76   :  { %1933 = vmatprep.subr.bf16.mxu1 %v2377_v0  ;;  %1940 = vmatpush3.bf16.msra.mxu0 %v2513_v24 }
  0x77   :  { %1919 = vmatprep.mubr.msk.bf16.mxu0 %vm117_vm2, %v107_v14  ;;  %1941 = vmatprep.subr.bf16.mxu0 %v2377_v0  ;;  %v2560_v14 = vld [vmem:[#allocation14] ss:$0 sm:$0xff] }
  0x79   :  { %1934 = vmatpush3.bf16.msra.mxu1 %v2518_v25 }
  0x7a   :  { %1942 = vmatpush3.bf16.msra.mxu0 %v2524_v26  ;;  %1947 = vmatprep.subr.bf16.mxu1 %v2377_v0 }
  0x7b   :  { %1955 = vmatprep.subr.bf16.mxu0 %v2377_v0 }
  0x7c   :  { %1936 = vmatmul.mubr.msk.bf16.vlgmr.msra.gmra.mrb[12].mxu1 %vm94_vm0, %v425_v22  ;;  %1920 = vmatmul.mubr.msk.bf16.gmra.mrb[12].mxu0 %vm117_vm2, %v108_v20 }
  0x7d   :  { %1943 = vmatprep.mubr.msk.bf16.mxu0 %vm2378_vm3, %v2377_v0  ;;  %1948 = vmatpush3.bf16.msra.mxu1 %v2484_v11 }
  0x7e   :  { %1949 = vmatprep.subr.bf16.mxu1 %v2377_v0  ;;  %1951 = vmatprep.mubr.msk.bf16.mxu1 %vm2378_vm3, %v2377_v0 }
  0x81   :  { %1950 = vmatpush3.bf16.msra.mxu1 %v2493_v18 }
  0x82   :  { %1963 = vmatprep.subr.bf16.mxu1 %v2377_v0 }
  0x84   :  { %1944 = vmatmul.mubr.msk.bf16.vlgmr.msra.gmra.mrb[16].mxu0 %vm94_vm0, %v425_v22 }
  0x85   :  { %1956 = vmatpush3.bf16.msra.mxu0 %v2511_v23  ;;  %1959 = vmatprep.mubr.msk.bf16.mxu0 %vm2378_vm3, %v2377_v0 }
  0x86   :  { %1957 = vmatprep.subr.bf16.mxu0 %v2377_v0 }
  0x89   :  { %1958 = vmatpush3.bf16.msra.mxu0 %v2518_v25 }
  0x8a   :  { %1971 = vmatprep.subr.bf16.mxu0 %v2377_v0 }
 0x137   :  { %v1907_v29 = vpop.f32.mrb[0].mxu1  ;;  %v1897_v30 = vpop.f32.mrb[0].mxu0 }
 0x138   :  { %v272_v31 = vadd.f32 %v1907_v29, %v1747_v27  ;;  %v177_v32 = vadd.f32 %v1897_v30, %v1742_v28  ;;  %v263_v33 = vpop.f32.mrb[1].mxu1  ;;  %v168_v34 = vpop.f32.mrb[1].mxu0 }
 0x139   :  { %v264_v35 = vadd.f32 %v1747_v27, %v263_v33  ;;  %v169_v36 = vadd.f32 %v1742_v28, %v168_v34  ;;  %v1908_v37 = vpop.f32.mrb[2].mxu1  ;;  %v1898_v38 = vpop.f32.mrb[2].mxu0 }
 0x13a   :  { %v296_v39 = vpack.c.bf16 %v272_v31, %v272_v31  ;;  %v201_v40 = vpack.c.bf16 %v177_v32, %v177_v32  ;;  %v275_v41 = vadd.f32 %v1908_v37, %v1747_v27  ;;  %v180_v42 = vadd.f32 %v1898_v38, %v1742_v28  ;;  %v266_v43 = vpop.f32.mrb[3].mxu1  ;;  %v171_v44 = vpop.f32.mrb[3].mxu0 }
 0x13b   :  { %v294_v45 = vpack.c.bf16 %v264_v35, %v264_v35  ;;  %v199_v46 = vpack.c.bf16 %v169_v36, %v169_v36  ;;  %v267_v47 = vadd.f32 %v1747_v27, %v266_v43  ;;  %v172_v48 = vadd.f32 %v1742_v28, %v171_v44  ;;  %v2572_v43 = vld [vmem:[#allocation14 + $0x1] ss:$0 sm:$0xff] }
 0x13c   :  { %304 = vst.msk [vmem:[#allocation3 + $0x8] sm:$0xf] %vm207_vm4, %v296_v39  ;;  %210 = vst.msk [vmem:[#allocation2 + $0x8] sm:$0xf] %vm207_vm4, %v201_v40  ;;  %v297_v49 = vpack.c.bf16 %v275_v41, %v275_v41  ;;  %v202_v50 = vpack.c.bf16 %v180_v42, %v180_v42 }
 0x13d   :  { %302 = vst.msk [vmem:[#allocation3] sm:$0xf] %vm207_vm4, %v294_v45  ;;  %208 = vst.msk [vmem:[#allocation2] sm:$0xf] %vm207_vm4, %v199_v46  ;;  %v295_v51 = vpack.c.bf16 %v267_v47, %v267_v47  ;;  %v200_v52 = vpack.c.bf16 %v172_v48, %v172_v48 }
 0x13e   :  { %305 = vst.msk [vmem:[#allocation3 + $0xc] sm:$0xf] %vm207_vm4, %v297_v49  ;;  %211 = vst.msk [vmem:[#allocation2 + $0xc] sm:$0xf] %vm207_vm4, %v202_v50 }
 0x13f   :  { %303 = vst.msk [vmem:[#allocation3 + $0x4] sm:$0xf] %vm207_vm4, %v295_v51  ;;  %209 = vst.msk [vmem:[#allocation2 + $0x4] sm:$0xf] %vm207_vm4, %v200_v52  ;;  %v1911_v53 = vpop.f32.mrb[4].mxu1  ;;  %v1901_v54 = vpop.f32.mrb[4].mxu0 }
 0x140   :  { %v288_v55 = vadd.f32 %v1911_v53, %v1747_v27  ;;  %v279_v56 = vpop.f32.mrb[5].mxu1  ;;  %v193_v57 = vadd.f32 %v1901_v54, %v1742_v28  ;;  %v184_v58 = vpop.f32.mrb[5].mxu0 }
 0x141   :  { %v280_v59 = vadd.f32 %v1747_v27, %v279_v56  ;;  %v1912_v60 = vpop.f32.mrb[6].mxu1  ;;  %v185_v61 = vadd.f32 %v1742_v28, %v184_v58  ;;  %v1902_v62 = vpop.f32.mrb[6].mxu0 }
 0x142   :  { %v300_v63 = vpack.c.bf16 %v288_v55, %v288_v55  ;;  %v291_v1 = vadd.f32 %v1912_v60, %v1747_v27  ;;  %v282_v2 = vpop.f32.mrb[7].mxu1  ;;  %v205_v3 = vpack.c.bf16 %v193_v57, %v193_v57  ;;  %v196_v4 = vadd.f32 %v1902_v62, %v1742_v28  ;;  %v187_v5 = vpop.f32.mrb[7].mxu0 }
 0x143   :  { %v298_v6 = vpack.c.bf16 %v280_v59, %v280_v59  ;;  %v283_v7 = vadd.f32 %v1747_v27, %v282_v2  ;;  %v203_v8 = vpack.c.bf16 %v185_v61, %v185_v61  ;;  %v188_v9 = vadd.f32 %v1742_v28, %v187_v5 }
 0x144   :  { %308 = vst.msk [vmem:[#allocation3 + $0x18] sm:$0xf] %vm207_vm4, %v300_v63  ;;  %v301_v10 = vpack.c.bf16 %v291_v1, %v291_v1  ;;  %214 = vst.msk [vmem:[#allocation2 + $0x18] sm:$0xf] %vm207_vm4, %v205_v3  ;;  %v206_v12 = vpack.c.bf16 %v196_v4, %v196_v4 }
 0x145   :  { %306 = vst.msk [vmem:[#allocation3 + $0x10] sm:$0xf] %vm207_vm4, %v298_v6  ;;  %v299_v13 = vpack.c.bf16 %v283_v7, %v283_v7  ;;  %212 = vst.msk [vmem:[#allocation2 + $0x10] sm:$0xf] %vm207_vm4, %v203_v8  ;;  %v204_v15 = vpack.c.bf16 %v188_v9, %v188_v9  ;;  %v2585_v9 = vld [vmem:[#allocation14 + $0x2] ss:$0 sm:$0xff] }
 0x146   :  { %309 = vst.msk [vmem:[#allocation3 + $0x1c] sm:$0xf] %vm207_vm4, %v301_v10  ;;  %v2564_v17 = vld [vmem:[#allocation2] sm:$0xff]   ;;  %215 = vst.msk [vmem:[#allocation2 + $0x1c] sm:$0xf] %vm207_vm4, %v206_v12 }
 0x147   :  { %307 = vst.msk [vmem:[#allocation3 + $0x14] sm:$0xf] %vm207_vm4, %v299_v13  ;;  %v482_v19 = vpop.f32.mrb[8].mxu1  ;;  %v605_v20 = vunpack.c.l.bf16 %v2564_v17  ;;  %213 = vst.msk [vmem:[#allocation2 + $0x14] sm:$0xf] %vm207_vm4, %v204_v15  ;;  %v1917_v22 = vpop.f32.mrb[8].mxu0 }
 0x148   :  { %v483_v27 = vadd.f32 %v2560_v14, %v482_v19  ;;  %v1929_v28 = vpop.f32.mrb[9].mxu1  ;;  %v366_v29 = vadd.f32 %v1917_v22, %v1752_v16  ;;  %v357_v30 = vpop.f32.mrb[9].mxu0  ;;  %v2574_v44 = vld [vmem:[#allocation3] sm:$0xff]  }
 0x149   :  { %v485_v31 = vpop.f32.mrb[10].mxu1  ;;  %v358_v32 = vadd.f32 %v1752_v16, %v357_v30  ;;  %v1918_v33 = vpop.f32.mrb[10].mxu0  ;;  %v614_v49 = vunpack.c.l.bf16 %v2574_v44 }
 0x14a   :  { %v606_v34 = vadd.f32 %v605_v20, %v483_v27  ;;  %v1930_v35 = vpop.f32.mrb[11].mxu1  ;;  %v390_v36 = vpack.c.bf16 %v366_v29, %v366_v29  ;;  %v369_v37 = vadd.f32 %v1918_v33, %v1752_v16  ;;  %v360_v38 = vpop.f32.mrb[11].mxu0 }
 0x14b   :  { %v388_v39 = vpack.c.bf16 %v358_v32, %v358_v32  ;;  %v361_v40 = vadd.f32 %v1752_v16, %v360_v38  ;;  %v768_v38 = vunpack.c.h.bf16 %v2574_v44 }
 0x14c   :  { %v1769_v41 = vmul.f32 -1.442695, %v606_v34  ;;  %398 = vst.msk [vmem:[#allocation4 + $0x8] sm:$0xf] %vm207_vm4, %v390_v36  ;;  %v391_v42 = vpack.c.bf16 %v369_v37, %v369_v37  ;;  %v758_v36 = vunpack.c.h.bf16 %v2564_v17 }
 0x14d   :  { %396 = vst.msk [vmem:[#allocation4] sm:$0xf] %vm207_vm4, %v388_v39  ;;  %v389_v45 = vpack.c.bf16 %v361_v40, %v361_v40 }
 0x14e   :  { %2140 = vpow2.f32 %v1769_v41  ;;  %399 = vst.msk [vmem:[#allocation4 + $0xc] sm:$0xf] %vm207_vm4, %v391_v42 }
 0x14f   :  { %v540_v46 = vpop.f32.mrb[12].mxu1  ;;  %397 = vst.msk [vmem:[#allocation4 + $0x4] sm:$0xf] %vm207_vm4, %v389_v45  ;;  %v1921_v47 = vpop.f32.mrb[12].mxu0 }
 0x150   :  { %v541_v48 = vadd.f32 %v2572_v43, %v540_v46  ;;  %v1937_v50 = vpop.f32.mrb[13].mxu1  ;;  %v382_v51 = vadd.f32 %v1921_v47, %v1752_v16  ;;  %v373_v52 = vpop.f32.mrb[13].mxu0 }
 0x151   :  { %v543_v53 = vpop.f32.mrb[14].mxu1  ;;  %v374_v54 = vadd.f32 %v1752_v16, %v373_v52  ;;  %v1922_v55 = vpop.f32.mrb[14].mxu0 }
 0x152   :  { %v615_v56 = vadd.f32 %v614_v49, %v541_v48  ;;  %v1938_v57 = vpop.f32.mrb[15].mxu1  ;;  %v394_v58 = vpack.c.bf16 %v382_v51, %v382_v51  ;;  %v385_v59 = vadd.f32 %v1922_v55, %v1752_v16  ;;  %v376_v60 = vpop.f32.mrb[15].mxu0 }
 0x153   :  { %v392_v61 = vpack.c.bf16 %v374_v54, %v374_v54  ;;  %v377_v62 = vadd.f32 %v1752_v16, %v376_v60 }
 0x154   :  { %v1770_v63 = vmul.f32 -1.442695, %v615_v56  ;;  %402 = vst.msk [vmem:[#allocation4 + $0x18] sm:$0xf] %vm207_vm4, %v394_v58  ;;  %v395_v1 = vpack.c.bf16 %v385_v59, %v385_v59 }
 0x155   :  { %400 = vst.msk [vmem:[#allocation4 + $0x10] sm:$0xf] %vm207_vm4, %v392_v61  ;;  %v393_v2 = vpack.c.bf16 %v377_v62, %v377_v62 }
 0x156   :  { %2142 = vpow2.f32 %v1770_v63  ;;  %403 = vst.msk [vmem:[#allocation4 + $0x1c] sm:$0xf] %vm207_vm4, %v395_v1  ;;  %v2588_v15 = vld [vmem:[#allocation4] sm:$0xff]  }
 0x157   :  { %401 = vst.msk [vmem:[#allocation4 + $0x14] sm:$0xf] %vm207_vm4, %v393_v2  ;;  %v598_v3 = vpop.f32.mrb[16].mxu0  ;;  %v623_v19 = vunpack.c.l.bf16 %v2588_v15  ;;  %v778_v59 = vunpack.c.h.bf16 %v2588_v15 }
 0x158   :  { %v2141_v4 = vpop.eup %2140  ;;  %v1945_v5 = vpop.f32.mrb[17].mxu0  ;;  %v599_v13 = vadd.f32 %v2585_v9, %v598_v3 }
 0x159   :  { %v610_v6 = vadd.f32 1.0, %v2141_v4  ;;  %v601_v7 = vpop.f32.mrb[18].mxu0 }
 0x15a   :  { %v1946_v8 = vpop.f32.mrb[19].mxu0 }
 0x15b   :  { %2144 = vrcp.f32 %v610_v6  ;;  %v2649_v6 = vld [vmem:[#allocation2 + $0x8] sm:$0xff]  }
 0x160   :  { %v2143_v10 = vpop.eup %2142 }
 0x161   :  { %v619_v12 = vadd.f32 1.0, %v2143_v10 }
 0x163   :  { %2146 = vrcp.f32 %v619_v12  ;;  %v913_v12 = vunpack.c.l.bf16 %v2649_v6 }
 0x165   :  { %v2145_v16 = vpop.eup %2144 }
 0x166   :  { %v624_v20 = vmul.f32 %v2145_v16, %v599_v13  ;;  %v2653_v13 = vld [vmem:[#allocation3 + $0x8] sm:$0xff]  }
 0x168   :  { %v625_v22 = vadd.f32 %v624_v20, %v623_v19 }
 0x16a   :  { %2148 = vtanh.f32 %v625_v22 }
 0x16d   :  { %v2147_v27 = vpop.eup %2146 }
 0x16e   :  { %v627_v28 = vsub.f32 1.0, %v2147_v27  ;;  %v629_v30 = vmul.f32 %v2147_v27, %v2506_v21 }
 0x174   :  { %v2149_v29 = vpop.eup %2148 }
 0x175   :  { %v628_v31 = vmul.f32 %v2149_v29, %v627_v28 }
 0x177   :  { %v2592_v32 = vadd.f32 %v629_v30, %v628_v31  ;;  %v923_v30 = vunpack.c.l.bf16 %v2653_v13 }
 0x179   :  { %v632_v33 = vpack.c.bf16 %v2592_v32, %v2592_v32 }
 0x17b   :  { %1952 = vmatmul.mubr.msk.bf16.vlgmr.msra.gmra.mrb[16].mxu1 %vm94_vm0, %v632_v33  ;;  %1960 = vmatmul.mubr.msk.bf16.vlgmr.msra.gmra.mrb[20].mxu0 %vm94_vm0, %v632_v33 }
 0x17c   :  { %1964 = vmatpush3.bf16.msra.mxu1 %v2513_v24  ;;  %1967 = vmatprep.mubr.msk.bf16.mxu1 %vm2378_vm3, %v2377_v0 }
 0x17d   :  { %1965 = vmatprep.subr.bf16.mxu1 %v2377_v0  ;;  %1972 = vmatpush3.bf16.msra.mxu0 %v2484_v11 }
 0x17e   :  { %1973 = vmatprep.subr.bf16.mxu0 %v2377_v0  ;;  %1975 = vmatprep.mubr.msk.bf16.mxu0 %vm2378_vm3, %v2377_v0 }
 0x180   :  { %1966 = vmatpush3.bf16.msra.mxu1 %v2524_v26 }
 0x181   :  { %1979 = vmatprep.subr.bf16.mxu1 %v2377_v0  ;;  %1974 = vmatpush3.bf16.msra.mxu0 %v2493_v18 }
 0x182   :  { %1987 = vmatprep.subr.bf16.mxu0 %v2377_v0 }
 0x183   :  { %1968 = vmatmul.mubr.msk.bf16.vlgmr.msra.gmra.mrb[20].mxu1 %vm94_vm0, %v632_v33 }
 0x184   :  { %1980 = vmatpush3.bf16.msra.mxu1 %v2511_v23  ;;  %1983 = vmatprep.mubr.msk.bf16.mxu1 %vm2378_vm3, %v2377_v0 }
 0x185   :  { %1981 = vmatprep.subr.bf16.mxu1 %v2377_v0 }
 0x188   :  { %1982 = vmatpush3.bf16.msra.mxu1 %v2518_v25 }
 0x189   :  { %1995 = vmatprep.subr.bf16.mxu1 %v2377_v0 }
 0x24e   :  { %v670_v21 = vpop.f32.mrb[16].mxu1  ;;  %v710_v34 = vpop.f32.mrb[20].mxu0 }
 0x24f   :  { %v671_v35 = vadd.f32 %v2560_v14, %v670_v21  ;;  %v711_v37 = vadd.f32 %v2572_v43, %v710_v34  ;;  %v1953_v39 = vpop.f32.mrb[17].mxu1  ;;  %v1961_v40 = vpop.f32.mrb[21].mxu0 }
 0x250   :  { %v673_v41 = vpop.f32.mrb[18].mxu1  ;;  %v713_v42 = vpop.f32.mrb[22].mxu0 }
 0x251   :  { %v759_v45 = vadd.f32 %v758_v36, %v671_v35  ;;  %v769_v46 = vadd.f32 %v768_v38, %v711_v37  ;;  %v1954_v47 = vpop.f32.mrb[19].mxu1  ;;  %v1962_v48 = vpop.f32.mrb[23].mxu0  ;;  %v2657_v42 = vld [vmem:[#allocation4 + $0x8] sm:$0xff]  }
 0x252   :  { %v933_v47 = vunpack.c.l.bf16 %v2657_v42 }
 0x253   :  { %v1774_v49 = vmul.f32 -1.442695, %v759_v45  ;;  %v1775_v52 = vmul.f32 -1.442695, %v769_v46 }
 0x255   :  { %2150 = vpow2.f32 %v1774_v49 }
 0x256   :  { %v750_v50 = vpop.f32.mrb[20].mxu1  ;;  %2152 = vpow2.f32 %v1775_v52 }
 0x257   :  { %v1969_v51 = vpop.f32.mrb[21].mxu1  ;;  %v751_v57 = vadd.f32 %v2585_v9, %v750_v50 }
 0x258   :  { %v753_v53 = vpop.f32.mrb[22].mxu1 }
 0x259   :  { %v1970_v54 = vpop.f32.mrb[23].mxu1 }
 0x25f   :  { %v2151_v17 = vpop.eup %2150 }
 0x260   :  { %v763_v55 = vadd.f32 1.0, %v2151_v17  ;;  %v2153_v44 = vpop.eup %2152 }
 0x261   :  { %v773_v56 = vadd.f32 1.0, %v2153_v44 }
 0x262   :  { %2154 = vrcp.f32 %v763_v55 }
 0x263   :  { %2156 = vrcp.f32 %v773_v56 }
 0x26c   :  { %v2155_v58 = vpop.eup %2154 }
 0x26d   :  { %v779_v60 = vmul.f32 %v2155_v58, %v751_v57  ;;  %v2157_v62 = vpop.eup %2156  ;;  %v1068_v58 = vunpack.c.h.bf16 %v2649_v6 }
 0x26e   :  { %v782_v63 = vsub.f32 1.0, %v2157_v62  ;;  %v784_v2 = vmul.f32 %v2157_v62, %v2592_v32 }
 0x26f   :  { %v780_v61 = vadd.f32 %v779_v60, %v778_v59  ;;  %v1078_v60 = vunpack.c.h.bf16 %v2653_v13 }
 0x271   :  { %2158 = vtanh.f32 %v780_v61 }
 0x27b   :  { %v2159_v1 = vpop.eup %2158 }
 0x27c   :  { %v783_v3 = vmul.f32 %v2159_v1, %v782_v63 }
 0x27e   :  { %v2624_v4 = vadd.f32 %v784_v2, %v783_v3 }
 0x280   :  { %v787_v5 = vpack.c.bf16 %v2624_v4, %v2624_v4 }
 0x282   :  { %1976 = vmatmul.mubr.msk.bf16.vlgmr.msra.gmra.mrb[24].mxu0 %vm94_vm0, %v787_v5  ;;  %1984 = vmatmul.mubr.msk.bf16.vlgmr.msra.gmra.mrb[24].mxu1 %vm94_vm0, %v787_v5 }
 0x283   :  { %1988 = vmatpush3.bf16.msra.mxu0 %v2513_v24  ;;  %1991 = vmatprep.mubr.msk.bf16.mxu0 %vm2378_vm3, %v2377_v0 }
 0x284   :  { %1989 = vmatprep.subr.bf16.mxu0 %v2377_v0  ;;  %1996 = vmatpush3.bf16.msra.mxu1 %v2484_v11 }
 0x285   :  { %1997 = vmatprep.subr.bf16.mxu1 %v2377_v0  ;;  %1999 = vmatprep.mubr.msk.bf16.mxu1 %vm2378_vm3, %v2377_v0 }
 0x287   :  { %1990 = vmatpush3.bf16.msra.mxu0 %v2524_v26 }
 0x288   :  { %2003 = vmatprep.subr.bf16.mxu0 %v2377_v0  ;;  %1998 = vmatpush3.bf16.msra.mxu1 %v2493_v18 }
 0x289   :  { %2011 = vmatprep.subr.bf16.mxu1 %v2377_v0 }
 0x28a   :  { %1992 = vmatmul.mubr.msk.bf16.vlgmr.msra.gmra.mrb[28].mxu0 %vm94_vm0, %v787_v5 }
 0x28b   :  { %2004 = vmatpush3.bf16.msra.mxu0 %v2511_v23  ;;  %2007 = vmatprep.mubr.msk.bf16.mxu0 %vm2378_vm3, %v2377_v0 }
 0x28c   :  { %2005 = vmatprep.subr.bf16.mxu0 %v2377_v0 }
 0x28f   :  { %2006 = vmatpush3.bf16.msra.mxu0 %v2518_v25 }
 0x290   :  { %2019 = vmatprep.subr.bf16.mxu0 %v2377_v0 }
 0x355   :  { %v825_v7 = vpop.f32.mrb[24].mxu0  ;;  %v865_v8 = vpop.f32.mrb[24].mxu1 }
 0x356   :  { %v826_v10 = vadd.f32 %v2560_v14, %v825_v7  ;;  %v1977_v15 = vpop.f32.mrb[25].mxu0  ;;  %v1985_v16 = vpop.f32.mrb[25].mxu1  ;;  %v866_v19 = vadd.f32 %v2572_v43, %v865_v8 }
 0x357   :  { %v828_v20 = vpop.f32.mrb[26].mxu0  ;;  %v868_v22 = vpop.f32.mrb[26].mxu1 }
 0x358   :  { %v914_v27 = vadd.f32 %v913_v12, %v826_v10  ;;  %v1978_v28 = vpop.f32.mrb[27].mxu0  ;;  %v1986_v29 = vpop.f32.mrb[27].mxu1  ;;  %v924_v33 = vadd.f32 %v923_v30, %v866_v19 }
 0x359   :  { %v1088_v29 = vunpack.c.h.bf16 %v2657_v42 }
 0x35a   :  { %v1779_v31 = vmul.f32 -1.442695, %v914_v27  ;;  %v1780_v35 = vmul.f32 -1.442695, %v924_v33 }
 0x35c   :  { %2160 = vpow2.f32 %v1779_v31 }
 0x35d   :  { %v905_v21 = vpop.f32.mrb[28].mxu0  ;;  %2162 = vpow2.f32 %v1780_v35 }
 0x35e   :  { %v1993_v34 = vpop.f32.mrb[29].mxu0  ;;  %v906_v45 = vadd.f32 %v2585_v9, %v905_v21 }
 0x35f   :  { %v908_v36 = vpop.f32.mrb[30].mxu0 }
 0x360   :  { %v1994_v37 = vpop.f32.mrb[31].mxu0 }
 0x366   :  { %v2161_v38 = vpop.eup %2160 }
 0x367   :  { %v918_v39 = vadd.f32 1.0, %v2161_v38  ;;  %v2163_v40 = vpop.eup %2162 }
 0x368   :  { %v928_v41 = vadd.f32 1.0, %v2163_v40 }
 0x369   :  { %2164 = vrcp.f32 %v918_v39  ;;  %v2719_v39 = vld [vmem:[#allocation2 + $0x10] sm:$0xff]  }
 0x36a   :  { %2166 = vrcp.f32 %v928_v41 }
 0x373   :  { %v2165_v46 = vpop.eup %2164 }
 0x374   :  { %v934_v48 = vmul.f32 %v2165_v46, %v906_v45  ;;  %v2167_v50 = vpop.eup %2166  ;;  %v1223_v45 = vunpack.c.l.bf16 %v2719_v39  ;;  %v2723_v46 = vld [vmem:[#allocation3 + $0x10] sm:$0xff]  }
 0x375   :  { %v937_v51 = vsub.f32 1.0, %v2167_v50  ;;  %v939_v53 = vmul.f32 %v2167_v50, %v2624_v4 }
 0x376   :  { %v935_v49 = vadd.f32 %v934_v48, %v933_v47 }
 0x378   :  { %2168 = vtanh.f32 %v935_v49 }
 0x382   :  { %v2169_v52 = vpop.eup %2168 }
 0x383   :  { %v938_v54 = vmul.f32 %v2169_v52, %v937_v51 }
 0x385   :  { %v2662_v17 = vadd.f32 %v939_v53, %v938_v54 }
 0x387   :  { %v942_v55 = vpack.c.bf16 %v2662_v17, %v2662_v17 }
 0x389   :  { %2000 = vmatmul.mubr.msk.bf16.vlgmr.msra.gmra.mrb[28].mxu1 %vm94_vm0, %v942_v55  ;;  %2008 = vmatmul.mubr.msk.bf16.vlgmr.msra.gmra.mrb[32].mxu0 %vm94_vm0, %v942_v55 }
 0x38a   :  { %2012 = vmatpush3.bf16.msra.mxu1 %v2513_v24  ;;  %2015 = vmatprep.mubr.msk.bf16.mxu1 %vm2378_vm3, %v2377_v0 }
 0x38b   :  { %2013 = vmatprep.subr.bf16.mxu1 %v2377_v0  ;;  %2020 = vmatpush3.bf16.msra.mxu0 %v2484_v11 }
 0x38c   :  { %2021 = vmatprep.subr.bf16.mxu0 %v2377_v0  ;;  %2023 = vmatprep.mubr.msk.bf16.mxu0 %vm2378_vm3, %v2377_v0 }
 0x38e   :  { %2014 = vmatpush3.bf16.msra.mxu1 %v2524_v26 }
 0x38f   :  { %2027 = vmatprep.subr.bf16.mxu1 %v2377_v0  ;;  %2022 = vmatpush3.bf16.msra.mxu0 %v2493_v18 }
 0x390   :  { %2035 = vmatprep.subr.bf16.mxu0 %v2377_v0 }
 0x391   :  { %2016 = vmatmul.mubr.msk.bf16.vlgmr.msra.gmra.mrb[32].mxu1 %vm94_vm0, %v942_v55  ;;  %v1233_v55 = vunpack.c.l.bf16 %v2723_v46 }
 0x392   :  { %2028 = vmatpush3.bf16.msra.mxu1 %v2511_v23  ;;  %2031 = vmatprep.mubr.msk.bf16.mxu1 %vm2378_vm3, %v2377_v0 }
 0x393   :  { %2029 = vmatprep.subr.bf16.mxu1 %v2377_v0 }
 0x396   :  { %2030 = vmatpush3.bf16.msra.mxu1 %v2518_v25 }
 0x397   :  { %2043 = vmatprep.subr.bf16.mxu1 %v2377_v0 }
 0x45c   :  { %v980_v44 = vpop.f32.mrb[28].mxu1  ;;  %v1020_v56 = vpop.f32.mrb[32].mxu0 }
 0x45d   :  { %v981_v57 = vadd.f32 %v2560_v14, %v980_v44  ;;  %v1021_v59 = vadd.f32 %v2572_v43, %v1020_v56  ;;  %v2001_v61 = vpop.f32.mrb[29].mxu1  ;;  %v2009_v62 = vpop.f32.mrb[33].mxu0 }
 0x45e   :  { %v983_v63 = vpop.f32.mrb[30].mxu1  ;;  %v1023_v1 = vpop.f32.mrb[34].mxu0 }
 0x45f   :  { %v1069_v2 = vadd.f32 %v1068_v58, %v981_v57  ;;  %v1079_v3 = vadd.f32 %v1078_v60, %v1021_v59  ;;  %v2002_v5 = vpop.f32.mrb[31].mxu1  ;;  %v2010_v7 = vpop.f32.mrb[35].mxu0 }
 0x461   :  { %v1784_v8 = vmul.f32 -1.442695, %v1069_v2  ;;  %v1785_v15 = vmul.f32 -1.442695, %v1079_v3  ;;  %v2727_v3 = vld [vmem:[#allocation4 + $0x10] sm:$0xff]  }
 0x463   :  { %2170 = vpow2.f32 %v1784_v8  ;;  %v1243_v8 = vunpack.c.l.bf16 %v2727_v3 }
 0x464   :  { %v1060_v10 = vpop.f32.mrb[32].mxu1  ;;  %2172 = vpow2.f32 %v1785_v15 }
 0x465   :  { %v2017_v12 = vpop.f32.mrb[33].mxu1  ;;  %v1061_v27 = vadd.f32 %v2585_v9, %v1060_v10 }
 0x466   :  { %v1063_v16 = vpop.f32.mrb[34].mxu1 }
 0x467   :  { %v2018_v19 = vpop.f32.mrb[35].mxu1 }
 0x46d   :  { %v2171_v6 = vpop.eup %2170 }
 0x46e   :  { %v1073_v20 = vadd.f32 1.0, %v2171_v6  ;;  %v2173_v13 = vpop.eup %2172 }
 0x46f   :  { %v1083_v22 = vadd.f32 1.0, %v2173_v13 }
 0x470   :  { %2174 = vrcp.f32 %v1073_v20 }
 0x471   :  { %2176 = vrcp.f32 %v1083_v22 }
 0x47a   :  { %v2175_v28 = vpop.eup %2174 }
 0x47b   :  { %v1089_v30 = vmul.f32 %v2175_v28, %v1061_v27  ;;  %v2177_v33 = vpop.eup %2176 }
 0x47c   :  { %v1092_v21 = vsub.f32 1.0, %v2177_v33  ;;  %v1094_v35 = vmul.f32 %v2177_v33, %v2662_v17 }
 0x47d   :  { %v1090_v31 = vadd.f32 %v1089_v30, %v1088_v29  ;;  %v1388_v30 = vunpack.c.h.bf16 %v2723_v46 }
 0x47f   :  { %2178 = vtanh.f32 %v1090_v31 }
 0x489   :  { %v2179_v34 = vpop.eup %2178 }
 0x48a   :  { %v1093_v36 = vmul.f32 %v2179_v34, %v1092_v21 }
 0x48c   :  { %v2694_v37 = vadd.f32 %v1094_v35, %v1093_v36 }
 0x48e   :  { %v1097_v38 = vpack.c.bf16 %v2694_v37, %v2694_v37 }
 0x490   :  { %2024 = vmatmul.mubr.msk.bf16.vlgmr.msra.gmra.mrb[36].mxu0 %vm94_vm0, %v1097_v38  ;;  %2032 = vmatmul.mubr.msk.bf16.vlgmr.msra.gmra.mrb[36].mxu1 %vm94_vm0, %v1097_v38 }
 0x491   :  { %2036 = vmatpush3.bf16.msra.mxu0 %v2513_v24  ;;  %2039 = vmatprep.mubr.msk.bf16.mxu0 %vm2378_vm3, %v2377_v0 }
 0x492   :  { %2037 = vmatprep.subr.bf16.mxu0 %v2377_v0  ;;  %2044 = vmatpush3.bf16.msra.mxu1 %v2484_v11 }
 0x493   :  { %2045 = vmatprep.subr.bf16.mxu1 %v2377_v0  ;;  %2047 = vmatprep.mubr.msk.bf16.mxu1 %vm2378_vm3, %v2377_v0 }
 0x495   :  { %2038 = vmatpush3.bf16.msra.mxu0 %v2524_v26 }
 0x496   :  { %2051 = vmatprep.subr.bf16.mxu0 %v2377_v0  ;;  %2046 = vmatpush3.bf16.msra.mxu1 %v2493_v18 }
 0x497   :  { %2059 = vmatprep.subr.bf16.mxu1 %v2377_v0 }
 0x498   :  { %2040 = vmatmul.mubr.msk.bf16.vlgmr.msra.gmra.mrb[40].mxu0 %vm94_vm0, %v1097_v38 }
 0x499   :  { %2052 = vmatpush3.bf16.msra.mxu0 %v2511_v23  ;;  %2055 = vmatprep.mubr.msk.bf16.mxu0 %vm2378_vm3, %v2377_v0 }
 0x49a   :  { %2053 = vmatprep.subr.bf16.mxu0 %v2377_v0 }
 0x49d   :  { %2054 = vmatpush3.bf16.msra.mxu0 %v2518_v25 }
 0x49e   :  { %2067 = vmatprep.subr.bf16.mxu0 %v2377_v0 }
 0x563   :  { %v1135_v40 = vpop.f32.mrb[36].mxu0  ;;  %v1175_v41 = vpop.f32.mrb[36].mxu1 }
 0x564   :  { %v1136_v42 = vadd.f32 %v2560_v14, %v1135_v40  ;;  %v2025_v47 = vpop.f32.mrb[37].mxu0  ;;  %v2033_v48 = vpop.f32.mrb[37].mxu1  ;;  %v1176_v49 = vadd.f32 %v2572_v43, %v1175_v41 }
 0x565   :  { %v1138_v50 = vpop.f32.mrb[38].mxu0  ;;  %v1178_v51 = vpop.f32.mrb[38].mxu1 }
 0x566   :  { %v1224_v52 = vadd.f32 %v1223_v45, %v1136_v42  ;;  %v2026_v53 = vpop.f32.mrb[39].mxu0  ;;  %v2034_v54 = vpop.f32.mrb[39].mxu1  ;;  %v1234_v56 = vadd.f32 %v1233_v55, %v1176_v49 }
 0x567   :  { %v1398_v54 = vunpack.c.h.bf16 %v2727_v3 }
 0x568   :  { %v1789_v44 = vmul.f32 -1.442695, %v1224_v52  ;;  %v1790_v59 = vmul.f32 -1.442695, %v1234_v56 }
 0x56a   :  { %2180 = vpow2.f32 %v1789_v44 }
 0x56b   :  { %v1215_v57 = vpop.f32.mrb[40].mxu0  ;;  %2182 = vpow2.f32 %v1790_v59 }
 0x56c   :  { %v2041_v58 = vpop.f32.mrb[41].mxu0  ;;  %v1216_v5 = vadd.f32 %v2585_v9, %v1215_v57 }
 0x56d   :  { %v1218_v60 = vpop.f32.mrb[42].mxu0 }
 0x56e   :  { %v2042_v61 = vpop.f32.mrb[43].mxu0 }
 0x574   :  { %v2181_v62 = vpop.eup %2180 }
 0x575   :  { %v1228_v63 = vadd.f32 1.0, %v2181_v62  ;;  %v2183_v1 = vpop.eup %2182 }
 0x576   :  { %v1238_v2 = vadd.f32 1.0, %v2183_v1  ;;  %v2221_v1 = vld [vmem:[#allocation11 + $0x8] sm:$0xff]  }
 0x577   :  { %2184 = vrcp.f32 %v1228_v63  ;;  %v2220_v63 = vld [vmem:[#allocation11] sm:$0xff]  }
 0x578   :  { %2186 = vrcp.f32 %v1238_v2 }
 0x581   :  { %v2185_v7 = vpop.eup %2184 }
 0x582   :  { %v1244_v10 = vmul.f32 %v2185_v7, %v1216_v5  ;;  %v2187_v15 = vpop.eup %2186  ;;  %v1542_v7 = vld [vmem:[#allocation3 + $0x18] sm:$0xff]  }
 0x583   :  { %v1247_v16 = vsub.f32 1.0, %v2187_v15  ;;  %v1249_v6 = vmul.f32 %v2187_v15, %v2694_v37 }
 0x584   :  { %v1245_v12 = vadd.f32 %v1244_v10, %v1243_v8 }
 0x586   :  { %2188 = vtanh.f32 %v1245_v12 }
 0x590   :  { %v2189_v19 = vpop.eup %2188 }
 0x591   :  { %v1248_v20 = vmul.f32 %v2189_v19, %v1247_v16 }
 0x593   :  { %v2732_v13 = vadd.f32 %v1249_v6, %v1248_v20  ;;  %v1543_v20 = vunpack.c.l.bf16 %v1542_v7 }
 0x595   :  { %v1252_v22 = vpack.c.bf16 %v2732_v13, %v2732_v13 }
 0x597   :  { %2048 = vmatmul.mubr.msk.bf16.vlgmr.msra.gmra.mrb[40].mxu1 %vm94_vm0, %v1252_v22  ;;  %2056 = vmatmul.mubr.msk.bf16.vlgmr.msra.gmra.mrb[44].mxu0 %vm94_vm0, %v1252_v22 }
 0x598   :  { %2060 = vmatpush3.bf16.msra.mxu1 %v2513_v24  ;;  %2063 = vmatprep.mubr.msk.bf16.mxu1 %vm2378_vm3, %v2377_v0 }
 0x599   :  { %2061 = vmatprep.subr.bf16.mxu1 %v2377_v0  ;;  %2068 = vmatpush3.bf16.msra.mxu0 %v2484_v11 }
 0x59a   :  { %2069 = vmatprep.subr.bf16.mxu0 %v2377_v0  ;;  %2071 = vmatprep.mubr.msk.bf16.mxu0 %vm2378_vm3, %v2377_v0 }
 0x59c   :  { %2062 = vmatpush3.bf16.msra.mxu1 %v2524_v26 }
 0x59d   :  { %2075 = vmatprep.subr.bf16.mxu1 %v2377_v0  ;;  %2070 = vmatpush3.bf16.msra.mxu0 %v2493_v18  ;;  %v1378_v18 = vunpack.c.h.bf16 %v2719_v39 }
 0x59e   :  { %2083 = vmatprep.subr.bf16.mxu0 %v2377_v0 }
 0x59f   :  { %2064 = vmatmul.mubr.msk.bf16.vlgmr.msra.gmra.mrb[44].mxu1 %vm94_vm0, %v1252_v22 }
 0x5a0   :  { %2076 = vmatpush3.bf16.msra.mxu1 %v2511_v23  ;;  %2079 = vmatprep.mubr.msk.bf16.mxu1 %vm2378_vm3, %v2377_v0 }
 0x5a1   :  { %2077 = vmatprep.subr.bf16.mxu1 %v2377_v0 }
 0x5a4   :  { %2078 = vmatpush3.bf16.msra.mxu1 %v2518_v25 }
 0x5a5   :  { %2091 = vmatprep.subr.bf16.mxu1 %v2377_v0 }
 0x66a   :  { %v1290_v11 = vpop.f32.mrb[40].mxu1  ;;  %v1330_v27 = vpop.f32.mrb[44].mxu0 }
 0x66b   :  { %v1291_v28 = vadd.f32 %v2560_v14, %v1290_v11  ;;  %v1331_v29 = vadd.f32 %v2572_v43, %v1330_v27  ;;  %v2049_v31 = vpop.f32.mrb[41].mxu1  ;;  %v2057_v33 = vpop.f32.mrb[45].mxu0 }
 0x66c   :  { %v1293_v21 = vpop.f32.mrb[42].mxu1  ;;  %v1333_v34 = vpop.f32.mrb[46].mxu0 }
 0x66d   :  { %v1379_v35 = vadd.f32 %v1378_v18, %v1291_v28  ;;  %v1389_v36 = vadd.f32 %v1388_v30, %v1331_v29  ;;  %v2050_v38 = vpop.f32.mrb[43].mxu1  ;;  %v2058_v40 = vpop.f32.mrb[47].mxu0  ;;  %v1552_v34 = vld [vmem:[#allocation4 + $0x18] sm:$0xff]  }
 0x66e   :  { %v1553_v38 = vunpack.c.l.bf16 %v1552_v34 }
 0x66f   :  { %v1794_v41 = vmul.f32 -1.442695, %v1379_v35  ;;  %v1795_v47 = vmul.f32 -1.442695, %v1389_v36 }
 0x671   :  { %2190 = vpow2.f32 %v1794_v41 }
 0x672   :  { %v1370_v42 = vpop.f32.mrb[44].mxu1  ;;  %2192 = vpow2.f32 %v1795_v47 }
 0x673   :  { %v2065_v45 = vpop.f32.mrb[45].mxu1  ;;  %v1371_v52 = vadd.f32 %v2585_v9, %v1370_v42 }
 0x674   :  { %v1373_v48 = vpop.f32.mrb[46].mxu1 }
 0x675   :  { %v2066_v49 = vpop.f32.mrb[47].mxu1 }
 0x67b   :  { %v2191_v39 = vpop.eup %2190 }
 0x67c   :  { %v1383_v50 = vadd.f32 1.0, %v2191_v39  ;;  %v2193_v46 = vpop.eup %2192 }
 0x67d   :  { %v1393_v51 = vadd.f32 1.0, %v2193_v46  ;;  %v2222_v46 = vld [vmem:[#allocation11 + $0x20] sm:$0xff]  }
 0x67e   :  { %2194 = vrcp.f32 %v1383_v50 }
 0x67f   :  { %2196 = vrcp.f32 %v1393_v51  ;;  %v2223_v51 = vld [vmem:[#allocation11 + $0x28] sm:$0xff]  }
 0x688   :  { %v2195_v53 = vpop.eup %2194 }
 0x689   :  { %v1399_v55 = vmul.f32 %v2195_v53, %v1371_v52  ;;  %v2197_v56 = vpop.eup %2196 }
 0x68a   :  { %v1402_v57 = vsub.f32 1.0, %v2197_v56  ;;  %v1404_v59 = vmul.f32 %v2197_v56, %v2732_v13  ;;  %v1698_v56 = vunpack.c.h.bf16 %v1542_v7 }
 0x68b   :  { %v1400_v44 = vadd.f32 %v1399_v55, %v1398_v54 }
 0x68d   :  { %2198 = vtanh.f32 %v1400_v44 }
 0x697   :  { %v2199_v58 = vpop.eup %2198 }
 0x698   :  { %v1403_v60 = vmul.f32 %v2199_v58, %v1402_v57 }
 0x69a   :  { %v2764_v61 = vadd.f32 %v1404_v59, %v1403_v60 }
 0x69c   :  { %v1407_v62 = vpack.c.bf16 %v2764_v61, %v2764_v61 }
 0x69e   :  { %2072 = vmatmul.mubr.msk.bf16.vlgmr.msra.gmra.mrb[48].mxu0 %vm94_vm0, %v1407_v62  ;;  %2080 = vmatmul.mubr.msk.bf16.vlgmr.msra.gmra.mrb[48].mxu1 %vm94_vm0, %v1407_v62 }
 0x69f   :  { %2084 = vmatpush3.bf16.msra.mxu0 %v2513_v24  ;;  %2087 = vmatprep.mubr.msk.bf16.mxu0 %vm2378_vm3, %v2377_v0  ;;  %v2786_v24 = vld [vmem:[#allocation2 + $0x18] sm:$0xff]  }
 0x6a0   :  { %2085 = vmatprep.subr.bf16.mxu0 %v2377_v0  ;;  %2092 = vmatpush3.bf16.msra.mxu1 %v2220_v63  ;;  %v1533_v5 = vunpack.c.l.bf16 %v2786_v24  ;;  %v1688_v55 = vunpack.c.h.bf16 %v2786_v24 }
 0x6a1   :  { %2093 = vmatprep.subr.bf16.mxu1 %v2377_v0  ;;  %2095 = vmatprep.mubr.msk.bf16.mxu1 %vm2378_vm3, %v2377_v0 }
 0x6a3   :  { %2086 = vmatpush3.bf16.msra.mxu0 %v2524_v26 }
 0x6a4   :  { %2099 = vmatprep.subr.bf16.mxu0 %v2377_v0  ;;  %2094 = vmatpush3.bf16.msra.mxu1 %v2221_v1 }
 0x6a5   :  { %2107 = vmatprep.subr.bf16.mxu1 %v2377_v0 }
 0x6a6   :  { %2088 = vmatmul.mubr.msk.bf16.vlgmr.msra.gmra.mrb[52].mxu0 %vm94_vm0, %v1407_v62 }
 0x6a7   :  { %2100 = vmatpush3.bf16.msra.mxu0 %v2511_v23  ;;  %2103 = vmatprep.mubr.msk.bf16.mxu0 %vm2378_vm3, %v2377_v0 }
 0x6a8   :  { %2101 = vmatprep.subr.bf16.mxu0 %v2377_v0 }
 0x6ab   :  { %2102 = vmatpush3.bf16.msra.mxu0 %v2518_v25 }
 0x771   :  { %v1445_v26 = vpop.f32.mrb[48].mxu0  ;;  %v1485_v2 = vpop.f32.mrb[48].mxu1 }
 0x772   :  { %v1446_v3 = vadd.f32 %v2560_v14, %v1445_v26  ;;  %v2073_v8 = vpop.f32.mrb[49].mxu0  ;;  %v2081_v10 = vpop.f32.mrb[49].mxu1  ;;  %v1486_v23 = vadd.f32 %v2572_v43, %v1485_v2 }
 0x773   :  { %v1448_v12 = vpop.f32.mrb[50].mxu0  ;;  %v1488_v15 = vpop.f32.mrb[50].mxu1 }
 0x774   :  { %v1534_v16 = vadd.f32 %v1533_v5, %v1446_v3  ;;  %v2074_v19 = vpop.f32.mrb[51].mxu0  ;;  %v2082_v6 = vpop.f32.mrb[51].mxu1  ;;  %v1544_v22 = vadd.f32 %v1543_v20, %v1486_v23  ;;  %v1708_v15 = vunpack.c.h.bf16 %v1552_v34 }
 0x775   :  { %v424_v6 = vld [vmem:[#allocation15] sm:$0xff] }
 0x776   :  { %v1799_v25 = vmul.f32 -1.442695, %v1534_v16  ;;  %v1800_v28 = vmul.f32 -1.442695, %v1544_v22  ;;  %v631_v20 = vadd.f32 %v2592_v32, %v424_v6 }
 0x778   :  { %2200 = vpow2.f32 %v1799_v25  ;;  %v786_v25 = vadd.f32 %v2624_v4, %v631_v20 }
 0x779   :  { %v1525_v11 = vpop.f32.mrb[52].mxu0  ;;  %2202 = vpow2.f32 %v1800_v28 }
 0x77a   :  { %v2089_v27 = vpop.f32.mrb[53].mxu0  ;;  %v1526_v35 = vadd.f32 %v2585_v9, %v1525_v11  ;;  %v941_v22 = vadd.f32 %v2662_v17, %v786_v25 }
 0x77b   :  { %v1528_v18 = vpop.f32.mrb[54].mxu0 }
 0x77c   :  { %v2090_v29 = vpop.f32.mrb[55].mxu0  ;;  %v1096_v27 = vadd.f32 %v2694_v37, %v941_v22 }
 0x77e   :  { %v1251_v18 = vadd.f32 %v2732_v13, %v1096_v27 }
 0x782   :  { %v2201_v30 = vpop.eup %2200 }
 0x783   :  { %v1538_v31 = vadd.f32 1.0, %v2201_v30  ;;  %v2203_v33 = vpop.eup %2202 }
 0x784   :  { %v1548_v21 = vadd.f32 1.0, %v2203_v33 }
 0x785   :  { %2204 = vrcp.f32 %v1538_v31  ;;  %v1406_v31 = vadd.f32 %v2764_v61, %v1251_v18 }
 0x786   :  { %2206 = vrcp.f32 %v1548_v21 }
 0x78f   :  { %v2205_v36 = vpop.eup %2204 }
 0x790   :  { %v1554_v40 = vmul.f32 %v2205_v36, %v1526_v35  ;;  %v2207_v42 = vpop.eup %2206 }
 0x791   :  { %v1557_v45 = vsub.f32 1.0, %v2207_v42  ;;  %v1559_v48 = vmul.f32 %v2207_v42, %v2764_v61 }
 0x792   :  { %v1555_v41 = vadd.f32 %v1554_v40, %v1553_v38 }
 0x794   :  { %2208 = vtanh.f32 %v1555_v41 }
 0x79e   :  { %v2209_v47 = vpop.eup %2208 }
 0x79f   :  { %v1558_v49 = vmul.f32 %v2209_v47, %v1557_v45 }
 0x7a1   :  { %v1560_v39 = vadd.f32 %v1559_v48, %v1558_v49 }
 0x7a3   :  { %v1562_v50 = vpack.c.bf16 %v1560_v39, %v1560_v39  ;;  %v1561_v21 = vadd.f32 %v1560_v39, %v1406_v31 }
 0x7a5   :  { %2096 = vmatmul.mubr.msk.bf16.vlgmr.msra.gmra.mrb[52].mxu1 %vm94_vm0, %v1562_v50  ;;  %2104 = vmatmul.mubr.msk.bf16.vlgmr.msra.gmra.mrb[56].mxu0 %vm94_vm0, %v1562_v50 }
 0x7a6   :  { %2108 = vmatpush3.bf16.msra.mxu1 %v2222_v46  ;;  %2111 = vmatprep.mubr.msk.bf16.mxu1 %vm2378_vm3, %v2377_v0 }
 0x7a7   :  { %2109 = vmatprep.subr.bf16.mxu1 %v2377_v0 }
 0x7aa   :  { %2110 = vmatpush3.bf16.msra.mxu1 %v2223_v51 }
 0x7ad   :  { %2112 = vmatmul.mubr.msk.bf16.vlgmr.msra.gmra.mrb[56].mxu1 %vm94_vm0, %v1562_v50 }
 0x878   :  { %v1600_v52 = vpop.f32.mrb[52].mxu1  ;;  %v1640_v53 = vpop.f32.mrb[56].mxu0 }
 0x879   :  { %v1601_v54 = vadd.f32 %v2560_v14, %v1600_v52  ;;  %v1641_v44 = vadd.f32 %v2572_v43, %v1640_v53  ;;  %v2097_v57 = vpop.f32.mrb[53].mxu1  ;;  %v2105_v58 = vpop.f32.mrb[57].mxu0 }
 0x87a   :  { %v1603_v59 = vpop.f32.mrb[54].mxu1  ;;  %v1643_v60 = vpop.f32.mrb[58].mxu0 }
 0x87b   :  { %v1689_v62 = vadd.f32 %v1688_v55, %v1601_v54  ;;  %v1699_v63 = vadd.f32 %v1698_v56, %v1641_v44  ;;  %v2098_v0 = vpop.f32.mrb[55].mxu1  ;;  %v2106_v1 = vpop.f32.mrb[59].mxu0 }
 0x87d   :  { %v1804_v26 = vmul.f32 -1.442695, %v1689_v62  ;;  %v1805_v5 = vmul.f32 -1.442695, %v1699_v63 }
 0x87f   :  { %2210 = vpow2.f32 %v1804_v26 }
 0x880   :  { %v1680_v2 = vpop.f32.mrb[56].mxu1  ;;  %2212 = vpow2.f32 %v1805_v5 }
 0x881   :  { %v2113_v3 = vpop.f32.mrb[57].mxu1  ;;  %v1681_v23 = vadd.f32 %v2585_v9, %v1680_v2 }
 0x882   :  { %v1683_v8 = vpop.f32.mrb[58].mxu1 }
 0x883   :  { %v2114_v14 = vpop.f32.mrb[59].mxu1 }
 0x889   :  { %v2211_v24 = vpop.eup %2210 }
 0x88a   :  { %v1693_v10 = vadd.f32 1.0, %v2211_v24  ;;  %v2213_v43 = vpop.eup %2212 }
 0x88b   :  { %v1703_v7 = vadd.f32 1.0, %v2213_v43 }
 0x88c   :  { %2214 = vrcp.f32 %v1693_v10 }
 0x88d   :  { %2216 = vrcp.f32 %v1703_v7 }
 0x896   :  { %v2215_v12 = vpop.eup %2214 }
 0x897   :  { %v1709_v16 = vmul.f32 %v2215_v12, %v1681_v23  ;;  %v2217_v11 = vpop.eup %2216 }
 0x898   :  { %v1712_v28 = vsub.f32 1.0, %v2217_v11  ;;  %v1714_v29 = vmul.f32 %v2217_v11, %v1560_v39 }
 0x899   :  { %v1710_v19 = vadd.f32 %v1709_v16, %v1708_v15 }
 0x89b   :  { %2218 = vtanh.f32 %v1710_v19 }
 0x8a5   :  { %v2219_v9 = vpop.eup %2218 }
 0x8a6   :  { %v1713_v30 = vmul.f32 %v2219_v9, %v1712_v28 }
 0x8a8   :  { %v1715_v33 = vadd.f32 %v1714_v29, %v1713_v30 }
 0x8aa   :  { %1717 = vst.msk [vmem:[#allocation5] sm:$0xff] %vm94_vm0, %v1715_v33  ;;  %v1716_v32 = vadd.f32 %v1715_v33, %v1561_v21 }
 0x8ac   :  { %1718 = vst.msk [vmem:[#allocation15] sm:$0xff] %vm94_vm0, %v1716_v32 }
 0x8b3   :  { %v1722_v4 = vld [vmem:[#allocation15] sm:$0xff] }
 0x8b4   :  { %v1723_v17 = vmul.f32 0.125, %v1722_v4 }
 0x8b6   :  { %1724 = vst.msk [vmem:[#allocation15] sm:$0xff] %vm94_vm0, %v1723_v17 }
 0x8b7   :  { %2345 = shalt.err (!%p2342_p2)
}
 0x8b8   :  { %s2346_s11 = scalar_lea.hbm %s2829_s5, 128 }
 0x8b9   :  { %p2347_p3 = scmp.ne.s32.totalorder %s2829_s5, %s2346_s11  ;;  %p2350_p4 = scmp.lt.u32.totalorder %s2346_s11, %s2829_s5 }
 0x8bb   :  { %p2352_p5 = pnand %p2350_p4, %p2347_p3 }
 0x8bd   :  { %2355 = shalt.err (!%p2352_p5)
}
 0x8be   :  { %1734 = dma.vmem_to_hbm [thread:$0]  %s1732_s17, 128, %s2829_s5, [#allocation8]  }
 0x8bf   :  { %2362 = dma.done.wait [#allocation8], 128  }
 0x8c0   :  { %2363 = vsyncadd [#allocation8], 4294967168 }
 0x8c1   :  { %1738 = vsyncpa [#allocation7], 1 }
 0x8c2   :  { %1739 = vsyncpa [#allocation10], 1 }
 0x8c3   :  { %1740 = vsyncpa [#allocation13], 1 }
 0x8c4   :  { %1741 = vsyncpa [#allocation8], 1 }

</bundles_post_ra>
